<compile_context>
chip_gen: v5e
topology: v5e:2x2
jax: 0.10.0
libtpu: 0.0.40
codegen_flags: <defaults>
</compile_context>

<pallas_src>
import random

import jax
import jax.numpy as jnp
from jax.experimental import pallas as pl
from jax.experimental.pallas import tpu as pltpu

# ----------------------------- model dimensions -----------------------------
BATCH = 2
IMG = 64
PATCH = 16
L_SEQ = (IMG // PATCH) * (IMG // PATCH)      # 16 spatial positions
P_DIM = PATCH * PATCH * 3                    # 768 patch features
ENC_DIM = 32                                 # encoder_dim
DEC_DIM = 32                                 # decoder_dim
ATT_DIM = 32                                 # attention_dim
EMB_DIM = 16                                 # embedding_dim
OUT_DIM = 64                                 # output_dim (target vocab size)
OUT_PAD = 128                                # lane-padded prediction width
TRG_LEN = 8
DROPOUT_P = 0.0                              # decoder_dropout -> eval-mode identity

_VMEM = pl.BlockSpec(memory_space=pltpu.MemorySpace.VMEM)


# ------------------------------ Encoder kernel ------------------------------
def encoder_kernel(patches_ref, wp_ref, bp_ref, wu_ref, enc_ref, uhs_ref):
    # TODO(synk): the frozen pretrained ResNet-50 backbone cannot be reproduced
    # in-script; it is replaced by a single strided patch-embedding + ReLU stem.
    feat = jnp.maximum(
        jnp.dot(patches_ref[...], wp_ref[...],
                preferred_element_type=jnp.float32) + bp_ref[...], 0.0)   # (B*L, E) f32
    enc_ref[...] = feat
    # Hoisted attention key projection U(encoder_outputs) — computed once here.
    uhs_ref[...] = jnp.dot(feat.astype(jnp.bfloat16), wu_ref[...],
                           preferred_element_type=jnp.float32)
    # NOTE: Seq2Seq zero-initialises the decoder state, so the reference's
    # mean-pool + init_h path is dead and deliberately not computed.


# --------------------- Fused decoder (whole decode loop) ---------------------
def decoder_kernel(tf_ref,                                     # SMEM scalar prefetch
                   enc_ref, uhs_ref, trg_ref, emb_ref,
                   att_a_ref, att_b_ref,
                   w_lstm_ref, b_lstm_ref, w_out_ref, b_out_ref,
                   pred_ref):
    bsz, _l, _e = enc_ref.shape
    dec = DEC_DIM
    two = 2 * dec
    vocab = emb_ref.shape[0]
    steps = pred_ref.shape[0]

    # Hoisted loads — everything stays resident for the whole decode loop.
    enc = enc_ref[...]                                         # (B, L, E)   f32
    uhs = uhs_ref[...]                                         # (B, L, A)   f32
    trg_all = trg_ref[...]                                     # (B, T)      int32
    emb_tab = emb_ref[...]                                     # (V, EMB)    bf16
    att_a = att_a_ref[...]                                     # (1, A)      f32
    w_lstm = w_lstm_ref[...]                                   # (112, 256)  bf16
    b_lstm = b_lstm_ref[...]                                   # (1, 256)    f32
    w_out = w_out_ref[...]                                     # (112, 128)  bf16
    b_out = b_out_ref[...]                                     # (1, 128)    f32

    lane_v = jax.lax.broadcasted_iota(jnp.int32, (bsz, vocab), 1)
    lane_o = jax.lax.broadcasted_iota(jnp.int32, (bsz, OUT_PAD), 1)

    # Initial recurrent state (PyTorch Seq2Seq: zeros; encoder hidden discarded).
    h = jnp.zeros((bsz, two), jnp.float32)                     # [hf | hb]
    c = jnp.zeros((bsz, two), jnp.float32)                     # [cf | cb]
    # Attention query projection W(h_prev)+b; h_prev == 0 at t=0 so it's just the bias.
    w_ah = jnp.broadcast_to(att_b_ref[...], (bsz, ATT_DIM)).astype(jnp.float32)
    tok = trg_all[:, 0:1]                                      # input = trg[0], (B, 1)

    for t in range(steps):                                     # fully unrolled in-kernel
        # ---- embedding lookup via one-hot matmul; Dropout(p=0) == identity -----
        onehot = (lane_v == tok).astype(jnp.bfloat16)
        embedded = jnp.dot(onehot, emb_tab,
                           preferred_element_type=jnp.float32)              # (B, EMB)

        # ---- Attention(encoder_outputs, hidden[0][0]) ---------------------------
        # w_ah was produced by the previous step's fused fc_out matmul.
        combined = jnp.tanh(uhs + w_ah[:, None, :])                          # (B, L, A)
        scores = jnp.sum(combined * att_a[None, :, :], axis=-1)              # (B, L)
        scores = scores - jnp.max(scores, axis=-1, keepdims=True)
        e = jnp.exp(scores)
        attn = e * pl.reciprocal(jnp.sum(e, axis=-1, keepdims=True), approx=True)
        weighted = jnp.sum(attn[:, :, None] * enc, axis=1)                   # (B, E)

        # ---- single-step bidirectional LSTM, both directions in ONE matmul ------
        # rows: [emb | weighted | hf | hb]; cols: [i_f i_b|f_f f_b|o_f o_b|g_f g_b]
        x_cat = jnp.concatenate([embedded, weighted, h], axis=1).astype(jnp.bfloat16)
        gates = (jnp.dot(x_cat, w_lstm,
                         preferred_element_type=jnp.float32) + b_lstm)       # (B, 256)
        sig = jax.nn.sigmoid(gates[:, :3 * two])               # only the i/f/o lanes
        i_g = sig[:, 0:two]
        f_g = sig[:, two:2 * two]
        o_g = sig[:, 2 * two:3 * two]
        g_g = jnp.tanh(gates[:, 3 * two:])                     # only the g lanes
        c = f_g * c + i_g * g_g                                # (B, 2*DEC)
        h = o_g * jnp.tanh(c)                                  # (B, 2*DEC) = [hf'|hb']

        # ---- fc_out(cat(output, weighted, embedded)), fused with next step's ----
        # attention query projection: lanes 0:64 = logits, 64:96 = W(hf')+b_att.
        out_in = jnp.concatenate([h, weighted, embedded], axis=1).astype(jnp.bfloat16)
        pred_full = (jnp.dot(out_in, w_out,
                             preferred_element_type=jnp.float32) + b_out)    # (B, 128)
        pred_ref[t] = pred_full
        w_ah = pred_full[:, OUT_DIM:OUT_DIM + ATT_DIM]         # carried to next step

        # ---- next input token: teacher forcing vs argmax (lane-masked) ----------
        valid = lane_o < OUT_DIM
        masked = jnp.where(valid, pred_full, -jnp.inf)
        m = jnp.max(masked, axis=1, keepdims=True)
        top1 = jnp.min(jnp.where((masked == m) & valid, lane_o, OUT_PAD),
                       axis=1, keepdims=True)
        tf = tf_ref[t]                                         # 0/1 scalar (SMEM)
        tok = jnp.where(tf == 1, trg_all[:, t + 1:t + 2], top1)


# ------------------------------- JAX wrappers --------------------------------
def encoder_forward(images_nchw, params):
    b = images_nchw.shape[0]
    x = jnp.transpose(images_nchw, (0, 2, 3, 1))               # NCHW -> NHWC
    h, w, c = x.shape[1], x.shape[2], x.shape[3]
    gh, gw = h // PATCH, w // PATCH
    l = gh * gw
    x = x.reshape(b, gh, PATCH, gw, PATCH, c)
    patches = jnp.transpose(x, (0, 1, 3, 2, 4, 5)).reshape(b * l, PATCH * PATCH * c)
    patches = patches.astype(jnp.bfloat16)                     # bf16 MXU operand
    enc2, uhs2 = pl.pallas_call(
        encoder_kernel,
        out_shape=(jax.ShapeDtypeStruct((b * l, ENC_DIM), jnp.float32),
                   jax.ShapeDtypeStruct((b * l, ATT_DIM), jnp.float32)),
        in_specs=[_VMEM] * 4,
        out_specs=(_VMEM, _VMEM),
    )(patches, params['wp'], params['bp'], params['att_u'])
    return enc2.reshape(b, l, ENC_DIM), uhs2.reshape(b, l, ATT_DIM)


def decode_all(enc, uhs, trg_t, tf_mask, params):
    b = enc.shape[0]
    steps = trg_t.shape[1] - 1
    const2 = lambda i, tf: (0, 0)
    const3 = lambda i, tf: (0, 0, 0)
    grid_spec = pltpu.PrefetchScalarGridSpec(
        num_scalar_prefetch=1,
        grid=(1,),                                             # single invocation
        in_specs=[
            pl.BlockSpec(enc.shape, const3),
            pl.BlockSpec(uhs.shape, const3),
            pl.BlockSpec(trg_t.shape, const2),
            pl.BlockSpec(params['embedding'].shape, const2),
            pl.BlockSpec(params['att_a'].shape, const2),
            pl.BlockSpec(params['att_b'].shape, const2),
            pl.BlockSpec(params['w_lstm'].shape, const2),
            pl.BlockSpec(params['b_lstm'].shape, const2),
            pl.BlockSpec(params['w_out'].shape, const2),
            pl.BlockSpec(params['b_out'].shape, const2),
        ],
        out_specs=pl.BlockSpec((steps, b, OUT_PAD), const3),   # resident, one writeback
    )
    return pl.pallas_call(
        decoder_kernel,
        grid_spec=grid_spec,
        out_shape=jax.ShapeDtypeStruct((steps, b, OUT_PAD), jnp.float32),
        compiler_params=pltpu.CompilerParams(dimension_semantics=("arbitrary",)),
    )(tf_mask, enc, uhs, trg_t, params['embedding'],
      params['att_a'], params['att_b'],
      params['w_lstm'], params['b_lstm'], params['w_out'], params['b_out'])


@jax.jit
def seq2seq_forward(src, trg, tf_mask, params):
    trg_length, batch_size = trg.shape
    encoder_outputs, uhs = encoder_forward(src, params)
    trg_t = jnp.transpose(trg).astype(jnp.int32)               # (B, T)
    preds = decode_all(encoder_outputs, uhs, trg_t, tf_mask, params)  # (T-1, B, 128)
    outputs = jnp.concatenate(
        [jnp.zeros((1, batch_size, OUT_DIM), jnp.float32), preds[:, :, :OUT_DIM]],
        axis=0)                                                # outputs[0] stays zero
    return outputs


# --------------------------- deterministic params ----------------------------
def init_params(key):
    ks = jax.random.split(key, 19)

    def u(k, shape, scale=0.1):
        return jax.random.uniform(k, shape, jnp.float32, -1.0, 1.0) * scale

    p = {}
    # Encoder stem (ResNet-50 stand-in, 2-D weight).  init_h is dead (see kernel).
    p['wp'] = u(ks[0], (P_DIM, ENC_DIM)).astype(jnp.bfloat16)
    p['bp'] = u(ks[1], (1, ENC_DIM))

    # Attention: W: Linear(DEC, ATT), U: Linear(ENC, ATT, bias=False), A: Linear(ATT, 1)
    w_w = u(ks[4], (ATT_DIM, DEC_DIM))
    w_b = u(ks[5], (ATT_DIM,))
    u_w = u(ks[6], (ATT_DIM, ENC_DIM))
    a_w = u(ks[7], (1, ATT_DIM))
    att_w_t = w_w.T                                            # (DEC, ATT) — fused below
    p['att_b'] = w_b.reshape(1, ATT_DIM)
    p['att_u'] = u_w.T.astype(jnp.bfloat16)                    # hoisted key projection
    p['att_a'] = a_w

    # Embedding(OUT, EMB)
    p['embedding'] = u(ks[8], (OUT_DIM, EMB_DIM), 1.0).astype(jnp.bfloat16)

    # Bidirectional LSTM(EMB+ENC, DEC): PyTorch-shaped params packed into ONE
    # fused weight.  Rows: [emb(16) | weighted(32) | hf(32) | hb(32)].
    # Columns: [i_f i_b | f_f f_b | o_f o_b | g_f g_b], each DEC wide.
    def torch_lstm(k0, k1, k2, k3):
        w_ih = u(k0, (4 * DEC_DIM, EMB_DIM + ENC_DIM))   # cols = [embedded, weighted]
        w_hh = u(k1, (4 * DEC_DIM, DEC_DIM))
        b_ih = u(k2, (4 * DEC_DIM,))
        b_hh = u(k3, (4 * DEC_DIM,))
        return w_ih, w_hh, b_ih + b_hh

    dirs = [torch_lstm(ks[9], ks[10], ks[11], ks[12]),    # forward direction
            torch_lstm(ks[13], ks[14], ks[15], ks[16])]   # backward direction
    in_x = EMB_DIM + ENC_DIM
    w_lstm = jnp.zeros((in_x + 2 * DEC_DIM, 8 * DEC_DIM), jnp.float32)
    b_lstm = jnp.zeros((1, 8 * DEC_DIM), jnp.float32)
    gate_src = {'i': 0, 'f': 1, 'g': 2, 'o': 3}           # PyTorch row-block order
    gate_dst = {'i': 0, 'f': 1, 'o': 2, 'g': 3}           # fused column-group order
    for d, (w_ih, w_hh, bias) in enumerate(dirs):
        for g in ('i', 'f', 'g', 'o'):
            src = slice(gate_src[g] * DEC_DIM, (gate_src[g] + 1) * DEC_DIM)
            c0 = gate_dst[g] * 2 * DEC_DIM + d * DEC_DIM
            w_lstm = w_lstm.at[0:in_x, c0:c0 + DEC_DIM].set(w_ih[src, :].T)
            h0 = in_x + d * DEC_DIM
            w_lstm = w_lstm.at[h0:h0 + DEC_DIM, c0:c0 + DEC_DIM].set(w_hh[src, :].T)
            b_lstm = b_lstm.at[0, c0:c0 + DEC_DIM].set(bias[src])
    p['w_lstm'] = w_lstm.astype(jnp.bfloat16)
    p['b_lstm'] = b_lstm

    # fc_out over cat(output[2*DEC], weighted[ENC], embedded[EMB]) -> OUT, padded to
    # 128 lanes.  The attention query projection W (rows = hf) is fused into the
    # otherwise-dead pad lanes 64:96 (its bias goes into b_out there); the remaining
    # pad lanes are zero and excluded from the argmax by an explicit lane mask.
    fc_w = u(ks[17], (OUT_DIM, 2 * DEC_DIM + ENC_DIM + EMB_DIM))
    fc_b = u(ks[18], (OUT_DIM,))
    w_out = jnp.zeros((2 * DEC_DIM + ENC_DIM + EMB_DIM, OUT_PAD), jnp.float32)
    w_out = w_out.at[:, :OUT_DIM].set(fc_w.T)
    w_out = w_out.at[0:DEC_DIM, OUT_DIM:OUT_DIM + ATT_DIM].set(att_w_t)
    b_out = jnp.zeros((1, OUT_PAD), jnp.float32)
    b_out = b_out.at[0, :OUT_DIM].set(fc_b)
    b_out = b_out.at[0, OUT_DIM:OUT_DIM + ATT_DIM].set(w_b)
    p['w_out'] = w_out.astype(jnp.bfloat16)
    p['b_out'] = b_out
    return p


if __name__ == "__main__":
    random.seed(0)                                    # teacher-forcing coin flips
    key = jax.random.PRNGKey(0)
    k_params, k_src, k_trg = jax.random.split(key, 3)
    params = init_params(k_params)

    src = jax.random.normal(k_src, (BATCH, 3, IMG, IMG), jnp.float32)   # NCHW (PyTorch)
    trg = jax.random.randint(k_trg, (TRG_LEN, BATCH), 0, OUT_DIM, jnp.int32)

    teacher_forcing_ratio = 0.5
    # Coin flips precomputed on host (one per decode step), keeping the jitted
    # program free of Python randomness.
    tf_mask = jnp.array([1 if random.random() < teacher_forcing_ratio else 0
                         for _ in range(TRG_LEN - 1)], dtype=jnp.int32)

    outputs = seq2seq_forward(src, trg, tf_mask, params)
    outputs = jax.block_until_ready(outputs)
    assert outputs.shape == (TRG_LEN, BATCH, OUT_DIM)
    print("KERNEL_OK")
</pallas_src>

<mosaic_0001>
module attributes {stable_mosaic.version = 11 : i64} {
  func.func @encoder_kernel(%arg0: memref<32x768xbf16, #tpu.memory_space<vmem>>, %arg1: memref<768x32xbf16, #tpu.memory_space<vmem>>, %arg2: memref<1x32xf32, #tpu.memory_space<vmem>>, %arg3: memref<32x32xbf16, #tpu.memory_space<vmem>>, %arg4: memref<32x32xf32, #tpu.memory_space<vmem>>, %arg5: memref<32x32xf32, #tpu.memory_space<vmem>>) attributes {dimension_semantics = [], scalar_prefetch = 0 : i64, scratch_operands = 0 : i64, tpu.core_type = #tpu.core_type<tc>} {
    %c0 = arith.constant 0 : index
    %c0_0 = arith.constant 0 : index
    %0 = vector.load %arg0[%c0, %c0_0] : memref<32x768xbf16, #tpu.memory_space<vmem>>, vector<32x768xbf16>
    %c0_1 = arith.constant 0 : index
    %c0_2 = arith.constant 0 : index
    %1 = vector.load %arg1[%c0_1, %c0_2] : memref<768x32xbf16, #tpu.memory_space<vmem>>, vector<768x32xbf16>
    %cst = arith.constant dense<0.000000e+00> : vector<32x32xf32>
    %2 = tpu.matmul %0, %1, %cst {dimension_numbers = #tpu.dot_dimension_numbers<[1], [0], [0], [1], [0, 0, 1, 1], [], []>} : vector<32x768xbf16>, vector<768x32xbf16>, vector<32x32xf32> -> vector<32x32xf32>
    %c0_3 = arith.constant 0 : index
    %c0_4 = arith.constant 0 : index
    %3 = vector.load %arg2[%c0_3, %c0_4] : memref<1x32xf32, #tpu.memory_space<vmem>>, vector<1x32xf32>
    %4 = vector.broadcast %3 : vector<1x32xf32> to vector<32x32xf32>
    %5 = arith.addf %2, %4 : vector<32x32xf32>
    %cst_5 = arith.constant 0.000000e+00 : f32
    %6 = vector.broadcast %cst_5 : f32 to vector<32x32xf32>
    %7 = arith.maximumf %5, %6 : vector<32x32xf32>
    %c0_6 = arith.constant 0 : index
    %c0_7 = arith.constant 0 : index
    %8 = vector.load %arg4[%c0_6, %c0_7] : memref<32x32xf32, #tpu.memory_space<vmem>>, vector<32x32xf32>
    tpu.vector_store %arg4[%c0_6, %c0_7], %7 {strides = array<i32>} : memref<32x32xf32, #tpu.memory_space<vmem>>, vector<32x32xf32>,
    %9 = arith.truncf %7 : vector<32x32xf32> to vector<32x32xbf16>
    %c0_8 = arith.constant 0 : index
    %c0_9 = arith.constant 0 : index
    %10 = vector.load %arg3[%c0_8, %c0_9] : memref<32x32xbf16, #tpu.memory_space<vmem>>, vector<32x32xbf16>
    %cst_10 = arith.constant dense<0.000000e+00> : vector<32x32xf32>
    %11 = tpu.matmul %9, %10, %cst_10 {dimension_numbers = #tpu.dot_dimension_numbers<[1], [0], [0], [1], [0, 0, 1, 1], [], []>} : vector<32x32xbf16>, vector<32x32xbf16>, vector<32x32xf32> -> vector<32x32xf32>
    %c0_11 = arith.constant 0 : index
    %c0_12 = arith.constant 0 : index
    %12 = vector.load %arg5[%c0_11, %c0_12] : memref<32x32xf32, #tpu.memory_space<vmem>>, vector<32x32xf32>
    tpu.vector_store %arg5[%c0_11, %c0_12], %11 {strides = array<i32>} : memref<32x32xf32, #tpu.memory_space<vmem>>, vector<32x32xf32>,
    return
  }
}

module attributes {stable_mosaic.version = 11 : i64} {
  func.func @decoder_kernel(%arg0: i32, %arg1: memref<7xi32, #tpu.memory_space<smem>>, %arg2: memref<2x16x32xf32, #tpu.memory_space<vmem>>, %arg3: memref<2x16x32xf32, #tpu.memory_space<vmem>>, %arg4: memref<2x8xi32, #tpu.memory_space<vmem>>, %arg5: memref<64x16xbf16, #tpu.memory_space<vmem>>, %arg6: memref<1x32xf32, #tpu.memory_space<vmem>>, %arg7: memref<1x32xf32, #tpu.memory_space<vmem>>, %arg8: memref<112x256xbf16, #tpu.memory_space<vmem>>, %arg9: memref<1x256xf32, #tpu.memory_space<vmem>>, %arg10: memref<112x128xbf16, #tpu.memory_space<vmem>>, %arg11: memref<1x128xf32, #tpu.memory_space<vmem>>, %arg12: memref<7x2x128xf32, #tpu.memory_space<vmem>>) attributes {dimension_semantics = [#tpu.dimension_semantics<arbitrary>], iteration_bounds = array<i64: 1>, scalar_prefetch = 1 : i64, scratch_operands = 0 : i64, tpu.core_type = #tpu.core_type<tc>, window_params = [{pipeline_mode = #tpu.pipeline_mode<synchronous>, transform_indices = @transform_0, window_bounds = array<i64: 2, 16, 32>}, {pipeline_mode = #tpu.pipeline_mode<synchronous>, transform_indices = @transform_1, window_bounds = array<i64: 2, 16, 32>}, {pipeline_mode = #tpu.pipeline_mode<synchronous>, transform_indices = @transform_2, window_bounds = array<i64: 2, 8>}, {pipeline_mode = #tpu.pipeline_mode<synchronous>, transform_indices = @transform_3, window_bounds = array<i64: 64, 16>}, {pipeline_mode = #tpu.pipeline_mode<synchronous>, transform_indices = @transform_4, window_bounds = array<i64: 1, 32>}, {pipeline_mode = #tpu.pipeline_mode<synchronous>, transform_indices = @transform_5, window_bounds = array<i64: 1, 32>}, {pipeline_mode = #tpu.pipeline_mode<synchronous>, transform_indices = @transform_6, window_bounds = array<i64: 112, 256>}, {pipeline_mode = #tpu.pipeline_mode<synchronous>, transform_indices = @transform_7, window_bounds = array<i64: 1, 256>}, {pipeline_mode = #tpu.pipeline_mode<synchronous>, transform_indices = @transform_8, window_bounds = array<i64: 112, 128>}, {pipeline_mode = #tpu.pipeline_mode<synchronous>, transform_indices = @transform_9, window_bounds = array<i64: 1, 128>}, {pipeline_mode = #tpu.pipeline_mode<synchronous>, transform_indices = @transform_10, window_bounds = array<i64: 7, 2, 128>}]} {
    %c0 = arith.constant 0 : index
    %c0_0 = arith.constant 0 : index
    %c0_1 = arith.constant 0 : index
    %0 = vector.load %arg2[%c0, %c0_0, %c0_1] : memref<2x16x32xf32, #tpu.memory_space<vmem>>, vector<2x16x32xf32>
    %c0_2 = arith.constant 0 : index
    %c0_3 = arith.constant 0 : index
    %c0_4 = arith.constant 0 : index
    %1 = vector.load %arg3[%c0_2, %c0_3, %c0_4] : memref<2x16x32xf32, #tpu.memory_space<vmem>>, vector<2x16x32xf32>
    %c0_5 = arith.constant 0 : index
    %c0_6 = arith.constant 0 : index
    %2 = vector.load %arg4[%c0_5, %c0_6] : memref<2x8xi32, #tpu.memory_space<vmem>>, vector<2x8xi32>
    %c0_7 = arith.constant 0 : index
    %c0_8 = arith.constant 0 : index
    %3 = vector.load %arg5[%c0_7, %c0_8] : memref<64x16xbf16, #tpu.memory_space<vmem>>, vector<64x16xbf16>
    %c0_9 = arith.constant 0 : index
    %c0_10 = arith.constant 0 : index
    %4 = vector.load %arg6[%c0_9, %c0_10] : memref<1x32xf32, #tpu.memory_space<vmem>>, vector<1x32xf32>
    %c0_11 = arith.constant 0 : index
    %c0_12 = arith.constant 0 : index
    %5 = vector.load %arg8[%c0_11, %c0_12] : memref<112x256xbf16, #tpu.memory_space<vmem>>, vector<112x256xbf16>
    %c0_13 = arith.constant 0 : index
    %c0_14 = arith.constant 0 : index
    %6 = vector.load %arg9[%c0_13, %c0_14] : memref<1x256xf32, #tpu.memory_space<vmem>>, vector<1x256xf32>
    %c0_15 = arith.constant 0 : index
    %c0_16 = arith.constant 0 : index
    %7 = vector.load %arg10[%c0_15, %c0_16] : memref<112x128xbf16, #tpu.memory_space<vmem>>, vector<112x128xbf16>
    %c0_17 = arith.constant 0 : index
    %c0_18 = arith.constant 0 : index
    %8 = vector.load %arg11[%c0_17, %c0_18] : memref<1x128xf32, #tpu.memory_space<vmem>>, vector<1x128xf32>
    %9 = tpu.iota {dimensions = array<i32: 1>} : vector<2x64xi32>
    %10 = tpu.iota {dimensions = array<i32: 1>} : vector<2x128xi32>
    %cst = arith.constant 0.000000e+00 : f32
    %11 = vector.broadcast %cst : f32 to vector<2x64xf32>
    %cst_19 = arith.constant 0.000000e+00 : f32
    %12 = vector.broadcast %cst_19 : f32 to vector<2x64xf32>
    %c0_20 = arith.constant 0 : index
    %c0_21 = arith.constant 0 : index
    %13 = vector.load %arg7[%c0_20, %c0_21] : memref<1x32xf32, #tpu.memory_space<vmem>>, vector<1x32xf32>
    %14 = vector.shape_cast %13 : vector<1x32xf32> to vector<1x32xf32>
    %15 = vector.broadcast %14 : vector<1x32xf32> to vector<2x32xf32>
    %16 = vector.extract_strided_slice %2 {offsets = [0, 0], sizes = [2, 1], strides = [1, 1]} : vector<2x8xi32> to vector<2x1xi32>
    %17 = vector.broadcast %16 : vector<2x1xi32> to vector<2x64xi32>
    %18 = arith.cmpi eq, %9, %17 : vector<2x64xi32>
    %19 = arith.extui %18 : vector<2x64xi1> to vector<2x64xi32>
    %20 = arith.sitofp %19 : vector<2x64xi32> to vector<2x64xf32>
    %21 = arith.truncf %20 : vector<2x64xf32> to vector<2x64xbf16>
    %cst_22 = arith.constant dense<0.000000e+00> : vector<2x16xf32>
    %22 = tpu.matmul %21, %3, %cst_22 {dimension_numbers = #tpu.dot_dimension_numbers<[1], [0], [0], [1], [0, 0, 1, 1], [], []>} : vector<2x64xbf16>, vector<64x16xbf16>, vector<2x16xf32> -> vector<2x16xf32>
    %23 = vector.shape_cast %15 : vector<2x32xf32> to vector<2x1x32xf32>
    %24 = vector.broadcast %23 : vector<2x1x32xf32> to vector<2x16x32xf32>
    %25 = arith.addf %1, %24 : vector<2x16x32xf32>
    %26 = math.tanh %25 : vector<2x16x32xf32>
    %27 = vector.shape_cast %4 : vector<1x32xf32> to vector<1x1x32xf32>
    %28 = vector.broadcast %27 : vector<1x1x32xf32> to vector<2x16x32xf32>
    %29 = arith.mulf %26, %28 : vector<2x16x32xf32>
    %cst_23 = arith.constant dense<0.000000e+00> : vector<2x16xf32>
    %30 = vector.multi_reduction <add>, %29, %cst_23 [2] : vector<2x16x32xf32> to vector<2x16xf32>
    %cst_24 = arith.constant dense<0xFF800000> : vector<2xf32>
    %31 = vector.multi_reduction <maximumf>, %30, %cst_24 [1] : vector<2x16xf32> to vector<2xf32>
    %32 = vector.shape_cast %31 : vector<2xf32> to vector<2x1xf32>
    %33 = vector.broadcast %32 : vector<2x1xf32> to vector<2x16xf32>
    %34 = arith.subf %30, %33 : vector<2x16xf32>
    %35 = math.exp %34 : vector<2x16xf32>
    %cst_25 = arith.constant dense<0.000000e+00> : vector<2xf32>
    %36 = vector.multi_reduction <add>, %35, %cst_25 [1] : vector<2x16xf32> to vector<2xf32>
    %37 = vector.shape_cast %36 : vector<2xf32> to vector<2x1xf32>
    %38 = tpu.reciprocal %37 {approx = true} : vector<2x1xf32> -> vector<2x1xf32>
    %39 = vector.broadcast %38 : vector<2x1xf32> to vector<2x16xf32>
    %40 = arith.mulf %35, %39 : vector<2x16xf32>
    %41 = vector.shape_cast %40 : vector<2x16xf32> to vector<2x16x1xf32>
    %42 = vector.broadcast %41 : vector<2x16x1xf32> to vector<2x16x32xf32>
    %43 = arith.mulf %42, %0 : vector<2x16x32xf32>
    %cst_26 = arith.constant dense<0.000000e+00> : vector<2x32xf32>
    %44 = vector.multi_reduction <add>, %43, %cst_26 [1] : vector<2x16x32xf32> to vector<2x32xf32>
    %45 = tpu.concatenate %22, %44, %11 in 1 : vector<2x16xf32>, vector<2x32xf32>, vector<2x64xf32> -> vector<2x112xf32>
    %46 = arith.truncf %45 : vector<2x112xf32> to vector<2x112xbf16>
    %cst_27 = arith.constant dense<0.000000e+00> : vector<2x256xf32>
    %47 = tpu.matmul %46, %5, %cst_27 {dimension_numbers = #tpu.dot_dimension_numbers<[1], [0], [0], [1], [0, 0, 1, 1], [], []>} : vector<2x112xbf16>, vector<112x256xbf16>, vector<2x256xf32> -> vector<2x256xf32>
    %48 = vector.broadcast %6 : vector<1x256xf32> to vector<2x256xf32>
    %49 = arith.addf %47, %48 : vector<2x256xf32>
    %50 = vector.extract_strided_slice %49 {offsets = [0, 0], sizes = [2, 192], strides = [1, 1]} : vector<2x256xf32> to vector<2x192xf32>
    %51 = arith.negf %50 : vector<2x192xf32>
    %52 = math.exp %51 : vector<2x192xf32>
    %cst_28 = arith.constant 1.000000e+00 : f32
    %53 = vector.broadcast %cst_28 : f32 to vector<2x192xf32>
    %54 = arith.addf %53, %52 : vector<2x192xf32>
    %55 = arith.divf %53, %54 : vector<2x192xf32>
    %56 = vector.extract_strided_slice %55 {offsets = [0, 0], sizes = [2, 64], strides = [1, 1]} : vector<2x192xf32> to vector<2x64xf32>
    %57 = vector.extract_strided_slice %55 {offsets = [0, 64], sizes = [2, 64], strides = [1, 1]} : vector<2x192xf32> to vector<2x64xf32>
    %58 = vector.extract_strided_slice %55 {offsets = [0, 128], sizes = [2, 64], strides = [1, 1]} : vector<2x192xf32> to vector<2x64xf32>
    %59 = vector.extract_strided_slice %49 {offsets = [0, 192], sizes = [2, 64], strides = [1, 1]} : vector<2x256xf32> to vector<2x64xf32>
    %60 = math.tanh %59 : vector<2x64xf32>
    %61 = arith.mulf %57, %12 : vector<2x64xf32>
    %62 = arith.mulf %56, %60 : vector<2x64xf32>
    %63 = arith.addf %61, %62 : vector<2x64xf32>
    %64 = math.tanh %63 : vector<2x64xf32>
    %65 = arith.mulf %58, %64 : vector<2x64xf32>
    %66 = tpu.concatenate %65, %44, %22 in 1 : vector<2x64xf32>, vector<2x32xf32>, vector<2x16xf32> -> vector<2x112xf32>
    %67 = arith.truncf %66 : vector<2x112xf32> to vector<2x112xbf16>
    %cst_29 = arith.constant dense<0.000000e+00> : vector<2x128xf32>
    %68 = tpu.matmul %67, %7, %cst_29 {dimension_numbers = #tpu.dot_dimension_numbers<[1], [0], [0], [1], [0, 0, 1, 1], [], []>} : vector<2x112xbf16>, vector<112x128xbf16>, vector<2x128xf32> -> vector<2x128xf32>
    %69 = vector.broadcast %8 : vector<1x128xf32> to vector<2x128xf32>
    %70 = arith.addf %68, %69 : vector<2x128xf32>
    %c0_30 = arith.constant 0 : index
    %c0_31 = arith.constant 0 : index
    %c0_32 = arith.constant 0 : index
    %71 = vector.load %arg12[%c0_30, %c0_31, %c0_32] : memref<7x2x128xf32, #tpu.memory_space<vmem>>, vector<1x2x128xf32>
    %72 = vector.shape_cast %71 : vector<1x2x128xf32> to vector<2x128xf32>
    %73 = vector.shape_cast %70 : vector<2x128xf32> to vector<1x2x128xf32>
    tpu.vector_store %arg12[%c0_30, %c0_31, %c0_32], %73 {strides = array<i32>} : memref<7x2x128xf32, #tpu.memory_space<vmem>>, vector<1x2x128xf32>,
    %74 = vector.extract_strided_slice %70 {offsets = [0, 64], sizes = [2, 32], strides = [1, 1]} : vector<2x128xf32> to vector<2x32xf32>
    %c64_i32 = arith.constant 64 : i32
    %75 = vector.broadcast %c64_i32 : i32 to vector<2x128xi32>
    %76 = arith.cmpi slt, %10, %75 : vector<2x128xi32>
    %cst_33 = arith.constant 0xFF800000 : f32
    %77 = vector.broadcast %cst_33 : f32 to vector<2x128xf32>
    %78 = arith.select %76, %70, %77 : vector<2x128xi1>, vector<2x128xf32>
    %cst_34 = arith.constant dense<0xFF800000> : vector<2xf32>
    %79 = vector.multi_reduction <maximumf>, %78, %cst_34 [1] : vector<2x128xf32> to vector<2xf32>
    %80 = vector.shape_cast %79 : vector<2xf32> to vector<2x1xf32>
    %81 = vector.broadcast %80 : vector<2x1xf32> to vector<2x128xf32>
    %82 = arith.cmpf oeq, %78, %81 : vector<2x128xf32>
    %83 = arith.andi %82, %76 : vector<2x128xi1>
    %c128_i32 = arith.constant 128 : i32
    %84 = vector.broadcast %c128_i32 : i32 to vector<2x128xi32>
    %85 = arith.select %83, %10, %84 : vector<2x128xi1>, vector<2x128xi32>
    %cst_35 = arith.constant dense<2147483647> : vector<2xi32>
    %86 = vector.multi_reduction <minsi>, %85, %cst_35 [1] : vector<2x128xi32> to vector<2xi32>
    %87 = vector.shape_cast %86 : vector<2xi32> to vector<2x1xi32>
    %c0_36 = arith.constant 0 : index
    %88 = memref.load %arg1[%c0_36] : memref<7xi32, #tpu.memory_space<smem>>
    %c1_i32 = arith.constant 1 : i32
    %89 = arith.cmpi eq, %88, %c1_i32 : i32
    %90 = vector.extract_strided_slice %2 {offsets = [0, 1], sizes = [2, 1], strides = [1, 1]} : vector<2x8xi32> to vector<2x1xi32>
    %91 = arith.select %89, %90, %87 : vector<2x1xi32>
    %92 = vector.broadcast %91 : vector<2x1xi32> to vector<2x64xi32>
    %93 = arith.cmpi eq, %9, %92 : vector<2x64xi32>
    %94 = arith.extui %93 : vector<2x64xi1> to vector<2x64xi32>
    %95 = arith.sitofp %94 : vector<2x64xi32> to vector<2x64xf32>
    %96 = arith.truncf %95 : vector<2x64xf32> to vector<2x64xbf16>
    %cst_37 = arith.constant dense<0.000000e+00> : vector<2x16xf32>
    %97 = tpu.matmul %96, %3, %cst_37 {dimension_numbers = #tpu.dot_dimension_numbers<[1], [0], [0], [1], [0, 0, 1, 1], [], []>} : vector<2x64xbf16>, vector<64x16xbf16>, vector<2x16xf32> -> vector<2x16xf32>
    %98 = vector.shape_cast %74 : vector<2x32xf32> to vector<2x1x32xf32>
    %99 = vector.broadcast %98 : vector<2x1x32xf32> to vector<2x16x32xf32>
    %100 = arith.addf %1, %99 : vector<2x16x32xf32>
    %101 = math.tanh %100 : vector<2x16x32xf32>
    %102 = vector.shape_cast %4 : vector<1x32xf32> to vector<1x1x32xf32>
    %103 = vector.broadcast %102 : vector<1x1x32xf32> to vector<2x16x32xf32>
    %104 = arith.mulf %101, %103 : vector<2x16x32xf32>
    %cst_38 = arith.constant dense<0.000000e+00> : vector<2x16xf32>
    %105 = vector.multi_reduction <add>, %104, %cst_38 [2] : vector<2x16x32xf32> to vector<2x16xf32>
    %cst_39 = arith.constant dense<0xFF800000> : vector<2xf32>
    %106 = vector.multi_reduction <maximumf>, %105, %cst_39 [1] : vector<2x16xf32> to vector<2xf32>
    %107 = vector.shape_cast %106 : vector<2xf32> to vector<2x1xf32>
    %108 = vector.broadcast %107 : vector<2x1xf32> to vector<2x16xf32>
    %109 = arith.subf %105, %108 : vector<2x16xf32>
    %110 = math.exp %109 : vector<2x16xf32>
    %cst_40 = arith.constant dense<0.000000e+00> : vector<2xf32>
    %111 = vector.multi_reduction <add>, %110, %cst_40 [1] : vector<2x16xf32> to vector<2xf32>
    %112 = vector.shape_cast %111 : vector<2xf32> to vector<2x1xf32>
    %113 = tpu.reciprocal %112 {approx = true} : vector<2x1xf32> -> vector<2x1xf32>
    %114 = vector.broadcast %113 : vector<2x1xf32> to vector<2x16xf32>
    %115 = arith.mulf %110, %114 : vector<2x16xf32>
    %116 = vector.shape_cast %115 : vector<2x16xf32> to vector<2x16x1xf32>
    %117 = vector.broadcast %116 : vector<2x16x1xf32> to vector<2x16x32xf32>
    %118 = arith.mulf %117, %0 : vector<2x16x32xf32>
    %cst_41 = arith.constant dense<0.000000e+00> : vector<2x32xf32>
    %119 = vector.multi_reduction <add>, %118, %cst_41 [1] : vector<2x16x32xf32> to vector<2x32xf32>
    %120 = tpu.concatenate %97, %119, %65 in 1 : vector<2x16xf32>, vector<2x32xf32>, vector<2x64xf32> -> vector<2x112xf32>
    %121 = arith.truncf %120 : vector<2x112xf32> to vector<2x112xbf16>
    %cst_42 = arith.constant dense<0.000000e+00> : vector<2x256xf32>
    %122 = tpu.matmul %121, %5, %cst_42 {dimension_numbers = #tpu.dot_dimension_numbers<[1], [0], [0], [1], [0, 0, 1, 1], [], []>} : vector<2x112xbf16>, vector<112x256xbf16>, vector<2x256xf32> -> vector<2x256xf32>
    %123 = vector.broadcast %6 : vector<1x256xf32> to vector<2x256xf32>
    %124 = arith.addf %122, %123 : vector<2x256xf32>
    %125 = vector.extract_strided_slice %124 {offsets = [0, 0], sizes = [2, 192], strides = [1, 1]} : vector<2x256xf32> to vector<2x192xf32>
    %126 = arith.negf %125 : vector<2x192xf32>
    %127 = math.exp %126 : vector<2x192xf32>
    %cst_43 = arith.constant 1.000000e+00 : f32
    %128 = vector.broadcast %cst_43 : f32 to vector<2x192xf32>
    %129 = arith.addf %128, %127 : vector<2x192xf32>
    %130 = arith.divf %128, %129 : vector<2x192xf32>
    %131 = vector.extract_strided_slice %130 {offsets = [0, 0], sizes = [2, 64], strides = [1, 1]} : vector<2x192xf32> to vector<2x64xf32>
    %132 = vector.extract_strided_slice %130 {offsets = [0, 64], sizes = [2, 64], strides = [1, 1]} : vector<2x192xf32> to vector<2x64xf32>
    %133 = vector.extract_strided_slice %130 {offsets = [0, 128], sizes = [2, 64], strides = [1, 1]} : vector<2x192xf32> to vector<2x64xf32>
    %134 = vector.extract_strided_slice %124 {offsets = [0, 192], sizes = [2, 64], strides = [1, 1]} : vector<2x256xf32> to vector<2x64xf32>
    %135 = math.tanh %134 : vector<2x64xf32>
    %136 = arith.mulf %132, %63 : vector<2x64xf32>
    %137 = arith.mulf %131, %135 : vector<2x64xf32>
    %138 = arith.addf %136, %137 : vector<2x64xf32>
    %139 = math.tanh %138 : vector<2x64xf32>
    %140 = arith.mulf %133, %139 : vector<2x64xf32>
    %141 = tpu.concatenate %140, %119, %97 in 1 : vector<2x64xf32>, vector<2x32xf32>, vector<2x16xf32> -> vector<2x112xf32>
    %142 = arith.truncf %141 : vector<2x112xf32> to vector<2x112xbf16>
    %cst_44 = arith.constant dense<0.000000e+00> : vector<2x128xf32>
    %143 = tpu.matmul %142, %7, %cst_44 {dimension_numbers = #tpu.dot_dimension_numbers<[1], [0], [0], [1], [0, 0, 1, 1], [], []>} : vector<2x112xbf16>, vector<112x128xbf16>, vector<2x128xf32> -> vector<2x128xf32>
    %144 = vector.broadcast %8 : vector<1x128xf32> to vector<2x128xf32>
    %145 = arith.addf %143, %144 : vector<2x128xf32>
    %c1 = arith.constant 1 : index
    %c0_45 = arith.constant 0 : index
    %c0_46 = arith.constant 0 : index
    %146 = vector.load %arg12[%c1, %c0_45, %c0_46] : memref<7x2x128xf32, #tpu.memory_space<vmem>>, vector<1x2x128xf32>
    %147 = vector.shape_cast %146 : vector<1x2x128xf32> to vector<2x128xf32>
    %148 = vector.shape_cast %145 : vector<2x128xf32> to vector<1x2x128xf32>
    tpu.vector_store %arg12[%c1, %c0_45, %c0_46], %148 {strides = array<i32>} : memref<7x2x128xf32, #tpu.memory_space<vmem>>, vector<1x2x128xf32>,
    %149 = vector.extract_strided_slice %145 {offsets = [0, 64], sizes = [2, 32], strides = [1, 1]} : vector<2x128xf32> to vector<2x32xf32>
    %c64_i32_47 = arith.constant 64 : i32
    %150 = vector.broadcast %c64_i32_47 : i32 to vector<2x128xi32>
    %151 = arith.cmpi slt, %10, %150 : vector<2x128xi32>
    %cst_48 = arith.constant 0xFF800000 : f32
    %152 = vector.broadcast %cst_48 : f32 to vector<2x128xf32>
    %153 = arith.select %151, %145, %152 : vector<2x128xi1>, vector<2x128xf32>
    %cst_49 = arith.constant dense<0xFF800000> : vector<2xf32>
    %154 = vector.multi_reduction <maximumf>, %153, %cst_49 [1] : vector<2x128xf32> to vector<2xf32>
    %155 = vector.shape_cast %154 : vector<2xf32> to vector<2x1xf32>
    %156 = vector.broadcast %155 : vector<2x1xf32> to vector<2x128xf32>
    %157 = arith.cmpf oeq, %153, %156 : vector<2x128xf32>
    %158 = arith.andi %157, %151 : vector<2x128xi1>
    %c128_i32_50 = arith.constant 128 : i32
    %159 = vector.broadcast %c128_i32_50 : i32 to vector<2x128xi32>
    %160 = arith.select %158, %10, %159 : vector<2x128xi1>, vector<2x128xi32>
    %cst_51 = arith.constant dense<2147483647> : vector<2xi32>
    %161 = vector.multi_reduction <minsi>, %160, %cst_51 [1] : vector<2x128xi32> to vector<2xi32>
    %162 = vector.shape_cast %161 : vector<2xi32> to vector<2x1xi32>
    %c1_52 = arith.constant 1 : index
    %163 = memref.load %arg1[%c1_52] : memref<7xi32, #tpu.memory_space<smem>>
    %c1_i32_53 = arith.constant 1 : i32
    %164 = arith.cmpi eq, %163, %c1_i32_53 : i32
    %165 = vector.extract_strided_slice %2 {offsets = [0, 2], sizes = [2, 1], strides = [1, 1]} : vector<2x8xi32> to vector<2x1xi32>
    %166 = arith.select %164, %165, %162 : vector<2x1xi32>
    %167 = vector.broadcast %166 : vector<2x1xi32> to vector<2x64xi32>
    %168 = arith.cmpi eq, %9, %167 : vector<2x64xi32>
    %169 = arith.extui %168 : vector<2x64xi1> to vector<2x64xi32>
    %170 = arith.sitofp %169 : vector<2x64xi32> to vector<2x64xf32>
    %171 = arith.truncf %170 : vector<2x64xf32> to vector<2x64xbf16>
    %cst_54 = arith.constant dense<0.000000e+00> : vector<2x16xf32>
    %172 = tpu.matmul %171, %3, %cst_54 {dimension_numbers = #tpu.dot_dimension_numbers<[1], [0], [0], [1], [0, 0, 1, 1], [], []>} : vector<2x64xbf16>, vector<64x16xbf16>, vector<2x16xf32> -> vector<2x16xf32>
    %173 = vector.shape_cast %149 : vector<2x32xf32> to vector<2x1x32xf32>
    %174 = vector.broadcast %173 : vector<2x1x32xf32> to vector<2x16x32xf32>
    %175 = arith.addf %1, %174 : vector<2x16x32xf32>
    %176 = math.tanh %175 : vector<2x16x32xf32>
    %177 = vector.shape_cast %4 : vector<1x32xf32> to vector<1x1x32xf32>
    %178 = vector.broadcast %177 : vector<1x1x32xf32> to vector<2x16x32xf32>
    %179 = arith.mulf %176, %178 : vector<2x16x32xf32>
    %cst_55 = arith.constant dense<0.000000e+00> : vector<2x16xf32>
    %180 = vector.multi_reduction <add>, %179, %cst_55 [2] : vector<2x16x32xf32> to vector<2x16xf32>
    %cst_56 = arith.constant dense<0xFF800000> : vector<2xf32>
    %181 = vector.multi_reduction <maximumf>, %180, %cst_56 [1] : vector<2x16xf32> to vector<2xf32>
    %182 = vector.shape_cast %181 : vector<2xf32> to vector<2x1xf32>
    %183 = vector.broadcast %182 : vector<2x1xf32> to vector<2x16xf32>
    %184 = arith.subf %180, %183 : vector<2x16xf32>
    %185 = math.exp %184 : vector<2x16xf32>
    %cst_57 = arith.constant dense<0.000000e+00> : vector<2xf32>
    %186 = vector.multi_reduction <add>, %185, %cst_57 [1] : vector<2x16xf32> to vector<2xf32>
    %187 = vector.shape_cast %186 : vector<2xf32> to vector<2x1xf32>
    %188 = tpu.reciprocal %187 {approx = true} : vector<2x1xf32> -> vector<2x1xf32>
    %189 = vector.broadcast %188 : vector<2x1xf32> to vector<2x16xf32>
    %190 = arith.mulf %185, %189 : vector<2x16xf32>
    %191 = vector.shape_cast %190 : vector<2x16xf32> to vector<2x16x1xf32>
    %192 = vector.broadcast %191 : vector<2x16x1xf32> to vector<2x16x32xf32>
    %193 = arith.mulf %192, %0 : vector<2x16x32xf32>
    %cst_58 = arith.constant dense<0.000000e+00> : vector<2x32xf32>
    %194 = vector.multi_reduction <add>, %193, %cst_58 [1] : vector<2x16x32xf32> to vector<2x32xf32>
    %195 = tpu.concatenate %172, %194, %140 in 1 : vector<2x16xf32>, vector<2x32xf32>, vector<2x64xf32> -> vector<2x112xf32>
    %196 = arith.truncf %195 : vector<2x112xf32> to vector<2x112xbf16>
    %cst_59 = arith.constant dense<0.000000e+00> : vector<2x256xf32>
    %197 = tpu.matmul %196, %5, %cst_59 {dimension_numbers = #tpu.dot_dimension_numbers<[1], [0], [0], [1], [0, 0, 1, 1], [], []>} : vector<2x112xbf16>, vector<112x256xbf16>, vector<2x256xf32> -> vector<2x256xf32>
    %198 = vector.broadcast %6 : vector<1x256xf32> to vector<2x256xf32>
    %199 = arith.addf %197, %198 : vector<2x256xf32>
    %200 = vector.extract_strided_slice %199 {offsets = [0, 0], sizes = [2, 192], strides = [1, 1]} : vector<2x256xf32> to vector<2x192xf32>
    %201 = arith.negf %200 : vector<2x192xf32>
    %202 = math.exp %201 : vector<2x192xf32>
    %cst_60 = arith.constant 1.000000e+00 : f32
    %203 = vector.broadcast %cst_60 : f32 to vector<2x192xf32>
    %204 = arith.addf %203, %202 : vector<2x192xf32>
    %205 = arith.divf %203, %204 : vector<2x192xf32>
    %206 = vector.extract_strided_slice %205 {offsets = [0, 0], sizes = [2, 64], strides = [1, 1]} : vector<2x192xf32> to vector<2x64xf32>
    %207 = vector.extract_strided_slice %205 {offsets = [0, 64], sizes = [2, 64], strides = [1, 1]} : vector<2x192xf32> to vector<2x64xf32>
    %208 = vector.extract_strided_slice %205 {offsets = [0, 128], sizes = [2, 64], strides = [1, 1]} : vector<2x192xf32> to vector<2x64xf32>
    %209 = vector.extract_strided_slice %199 {offsets = [0, 192], sizes = [2, 64], strides = [1, 1]} : vector<2x256xf32> to vector<2x64xf32>
    %210 = math.tanh %209 : vector<2x64xf32>
    %211 = arith.mulf %207, %138 : vector<2x64xf32>
    %212 = arith.mulf %206, %210 : vector<2x64xf32>
    %213 = arith.addf %211, %212 : vector<2x64xf32>
    %214 = math.tanh %213 : vector<2x64xf32>
    %215 = arith.mulf %208, %214 : vector<2x64xf32>
    %216 = tpu.concatenate %215, %194, %172 in 1 : vector<2x64xf32>, vector<2x32xf32>, vector<2x16xf32> -> vector<2x112xf32>
    %217 = arith.truncf %216 : vector<2x112xf32> to vector<2x112xbf16>
    %cst_61 = arith.constant dense<0.000000e+00> : vector<2x128xf32>
    %218 = tpu.matmul %217, %7, %cst_61 {dimension_numbers = #tpu.dot_dimension_numbers<[1], [0], [0], [1], [0, 0, 1, 1], [], []>} : vector<2x112xbf16>, vector<112x128xbf16>, vector<2x128xf32> -> vector<2x128xf32>
    %219 = vector.broadcast %8 : vector<1x128xf32> to vector<2x128xf32>
    %220 = arith.addf %218, %219 : vector<2x128xf32>
    %c2 = arith.constant 2 : index
    %c0_62 = arith.constant 0 : index
    %c0_63 = arith.constant 0 : index
    %221 = vector.load %arg12[%c2, %c0_62, %c0_63] : memref<7x2x128xf32, #tpu.memory_space<vmem>>, vector<1x2x128xf32>
    %222 = vector.shape_cast %221 : vector<1x2x128xf32> to vector<2x128xf32>
    %223 = vector.shape_cast %220 : vector<2x128xf32> to vector<1x2x128xf32>
    tpu.vector_store %arg12[%c2, %c0_62, %c0_63], %223 {strides = array<i32>} : memref<7x2x128xf32, #tpu.memory_space<vmem>>, vector<1x2x128xf32>,
    %224 = vector.extract_strided_slice %220 {offsets = [0, 64], sizes = [2, 32], strides = [1, 1]} : vector<2x128xf32> to vector<2x32xf32>
    %c64_i32_64 = arith.constant 64 : i32
    %225 = vector.broadcast %c64_i32_64 : i32 to vector<2x128xi32>
    %226 = arith.cmpi slt, %10, %225 : vector<2x128xi32>
    %cst_65 = arith.constant 0xFF800000 : f32
    %227 = vector.broadcast %cst_65 : f32 to vector<2x128xf32>
    %228 = arith.select %226, %220, %227 : vector<2x128xi1>, vector<2x128xf32>
    %cst_66 = arith.constant dense<0xFF800000> : vector<2xf32>
    %229 = vector.multi_reduction <maximumf>, %228, %cst_66 [1] : vector<2x128xf32> to vector<2xf32>
    %230 = vector.shape_cast %229 : vector<2xf32> to vector<2x1xf32>
    %231 = vector.broadcast %230 : vector<2x1xf32> to vector<2x128xf32>
    %232 = arith.cmpf oeq, %228, %231 : vector<2x128xf32>
    %233 = arith.andi %232, %226 : vector<2x128xi1>
    %c128_i32_67 = arith.constant 128 : i32
    %234 = vector.broadcast %c128_i32_67 : i32 to vector<2x128xi32>
    %235 = arith.select %233, %10, %234 : vector<2x128xi1>, vector<2x128xi32>
    %cst_68 = arith.constant dense<2147483647> : vector<2xi32>
    %236 = vector.multi_reduction <minsi>, %235, %cst_68 [1] : vector<2x128xi32> to vector<2xi32>
    %237 = vector.shape_cast %236 : vector<2xi32> to vector<2x1xi32>
    %c2_69 = arith.constant 2 : index
    %238 = memref.load %arg1[%c2_69] : memref<7xi32, #tpu.memory_space<smem>>
    %c1_i32_70 = arith.constant 1 : i32
    %239 = arith.cmpi eq, %238, %c1_i32_70 : i32
    %240 = vector.extract_strided_slice %2 {offsets = [0, 3], sizes = [2, 1], strides = [1, 1]} : vector<2x8xi32> to vector<2x1xi32>
    %241 = arith.select %239, %240, %237 : vector<2x1xi32>
    %242 = vector.broadcast %241 : vector<2x1xi32> to vector<2x64xi32>
    %243 = arith.cmpi eq, %9, %242 : vector<2x64xi32>
    %244 = arith.extui %243 : vector<2x64xi1> to vector<2x64xi32>
    %245 = arith.sitofp %244 : vector<2x64xi32> to vector<2x64xf32>
    %246 = arith.truncf %245 : vector<2x64xf32> to vector<2x64xbf16>
    %cst_71 = arith.constant dense<0.000000e+00> : vector<2x16xf32>
    %247 = tpu.matmul %246, %3, %cst_71 {dimension_numbers = #tpu.dot_dimension_numbers<[1], [0], [0], [1], [0, 0, 1, 1], [], []>} : vector<2x64xbf16>, vector<64x16xbf16>, vector<2x16xf32> -> vector<2x16xf32>
    %248 = vector.shape_cast %224 : vector<2x32xf32> to vector<2x1x32xf32>
    %249 = vector.broadcast %248 : vector<2x1x32xf32> to vector<2x16x32xf32>
    %250 = arith.addf %1, %249 : vector<2x16x32xf32>
    %251 = math.tanh %250 : vector<2x16x32xf32>
    %252 = vector.shape_cast %4 : vector<1x32xf32> to vector<1x1x32xf32>
    %253 = vector.broadcast %252 : vector<1x1x32xf32> to vector<2x16x32xf32>
    %254 = arith.mulf %251, %253 : vector<2x16x32xf32>
    %cst_72 = arith.constant dense<0.000000e+00> : vector<2x16xf32>
    %255 = vector.multi_reduction <add>, %254, %cst_72 [2] : vector<2x16x32xf32> to vector<2x16xf32>
    %cst_73 = arith.constant dense<0xFF800000> : vector<2xf32>
    %256 = vector.multi_reduction <maximumf>, %255, %cst_73 [1] : vector<2x16xf32> to vector<2xf32>
    %257 = vector.shape_cast %256 : vector<2xf32> to vector<2x1xf32>
    %258 = vector.broadcast %257 : vector<2x1xf32> to vector<2x16xf32>
    %259 = arith.subf %255, %258 : vector<2x16xf32>
    %260 = math.exp %259 : vector<2x16xf32>
    %cst_74 = arith.constant dense<0.000000e+00> : vector<2xf32>
    %261 = vector.multi_reduction <add>, %260, %cst_74 [1] : vector<2x16xf32> to vector<2xf32>
    %262 = vector.shape_cast %261 : vector<2xf32> to vector<2x1xf32>
    %263 = tpu.reciprocal %262 {approx = true} : vector<2x1xf32> -> vector<2x1xf32>
    %264 = vector.broadcast %263 : vector<2x1xf32> to vector<2x16xf32>
    %265 = arith.mulf %260, %264 : vector<2x16xf32>
    %266 = vector.shape_cast %265 : vector<2x16xf32> to vector<2x16x1xf32>
    %267 = vector.broadcast %266 : vector<2x16x1xf32> to vector<2x16x32xf32>
    %268 = arith.mulf %267, %0 : vector<2x16x32xf32>
    %cst_75 = arith.constant dense<0.000000e+00> : vector<2x32xf32>
    %269 = vector.multi_reduction <add>, %268, %cst_75 [1] : vector<2x16x32xf32> to vector<2x32xf32>
    %270 = tpu.concatenate %247, %269, %215 in 1 : vector<2x16xf32>, vector<2x32xf32>, vector<2x64xf32> -> vector<2x112xf32>
    %271 = arith.truncf %270 : vector<2x112xf32> to vector<2x112xbf16>
    %cst_76 = arith.constant dense<0.000000e+00> : vector<2x256xf32>
    %272 = tpu.matmul %271, %5, %cst_76 {dimension_numbers = #tpu.dot_dimension_numbers<[1], [0], [0], [1], [0, 0, 1, 1], [], []>} : vector<2x112xbf16>, vector<112x256xbf16>, vector<2x256xf32> -> vector<2x256xf32>
    %273 = vector.broadcast %6 : vector<1x256xf32> to vector<2x256xf32>
    %274 = arith.addf %272, %273 : vector<2x256xf32>
    %275 = vector.extract_strided_slice %274 {offsets = [0, 0], sizes = [2, 192], strides = [1, 1]} : vector<2x256xf32> to vector<2x192xf32>
    %276 = arith.negf %275 : vector<2x192xf32>
    %277 = math.exp %276 : vector<2x192xf32>
    %cst_77 = arith.constant 1.000000e+00 : f32
    %278 = vector.broadcast %cst_77 : f32 to vector<2x192xf32>
    %279 = arith.addf %278, %277 : vector<2x192xf32>
    %280 = arith.divf %278, %279 : vector<2x192xf32>
    %281 = vector.extract_strided_slice %280 {offsets = [0, 0], sizes = [2, 64], strides = [1, 1]} : vector<2x192xf32> to vector<2x64xf32>
    %282 = vector.extract_strided_slice %280 {offsets = [0, 64], sizes = [2, 64], strides = [1, 1]} : vector<2x192xf32> to vector<2x64xf32>
    %283 = vector.extract_strided_slice %280 {offsets = [0, 128], sizes = [2, 64], strides = [1, 1]} : vector<2x192xf32> to vector<2x64xf32>
    %284 = vector.extract_strided_slice %274 {offsets = [0, 192], sizes = [2, 64], strides = [1, 1]} : vector<2x256xf32> to vector<2x64xf32>
    %285 = math.tanh %284 : vector<2x64xf32>
    %286 = arith.mulf %282, %213 : vector<2x64xf32>
    %287 = arith.mulf %281, %285 : vector<2x64xf32>
    %288 = arith.addf %286, %287 : vector<2x64xf32>
    %289 = math.tanh %288 : vector<2x64xf32>
    %290 = arith.mulf %283, %289 : vector<2x64xf32>
    %291 = tpu.concatenate %290, %269, %247 in 1 : vector<2x64xf32>, vector<2x32xf32>, vector<2x16xf32> -> vector<2x112xf32>
    %292 = arith.truncf %291 : vector<2x112xf32> to vector<2x112xbf16>
    %cst_78 = arith.constant dense<0.000000e+00> : vector<2x128xf32>
    %293 = tpu.matmul %292, %7, %cst_78 {dimension_numbers = #tpu.dot_dimension_numbers<[1], [0], [0], [1], [0, 0, 1, 1], [], []>} : vector<2x112xbf16>, vector<112x128xbf16>, vector<2x128xf32> -> vector<2x128xf32>
    %294 = vector.broadcast %8 : vector<1x128xf32> to vector<2x128xf32>
    %295 = arith.addf %293, %294 : vector<2x128xf32>
    %c3 = arith.constant 3 : index
    %c0_79 = arith.constant 0 : index
    %c0_80 = arith.constant 0 : index
    %296 = vector.load %arg12[%c3, %c0_79, %c0_80] : memref<7x2x128xf32, #tpu.memory_space<vmem>>, vector<1x2x128xf32>
    %297 = vector.shape_cast %296 : vector<1x2x128xf32> to vector<2x128xf32>
    %298 = vector.shape_cast %295 : vector<2x128xf32> to vector<1x2x128xf32>
    tpu.vector_store %arg12[%c3, %c0_79, %c0_80], %298 {strides = array<i32>} : memref<7x2x128xf32, #tpu.memory_space<vmem>>, vector<1x2x128xf32>,
    %299 = vector.extract_strided_slice %295 {offsets = [0, 64], sizes = [2, 32], strides = [1, 1]} : vector<2x128xf32> to vector<2x32xf32>
    %c64_i32_81 = arith.constant 64 : i32
    %300 = vector.broadcast %c64_i32_81 : i32 to vector<2x128xi32>
    %301 = arith.cmpi slt, %10, %300 : vector<2x128xi32>
    %cst_82 = arith.constant 0xFF800000 : f32
    %302 = vector.broadcast %cst_82 : f32 to vector<2x128xf32>
    %303 = arith.select %301, %295, %302 : vector<2x128xi1>, vector<2x128xf32>
    %cst_83 = arith.constant dense<0xFF800000> : vector<2xf32>
    %304 = vector.multi_reduction <maximumf>, %303, %cst_83 [1] : vector<2x128xf32> to vector<2xf32>
    %305 = vector.shape_cast %304 : vector<2xf32> to vector<2x1xf32>
    %306 = vector.broadcast %305 : vector<2x1xf32> to vector<2x128xf32>
    %307 = arith.cmpf oeq, %303, %306 : vector<2x128xf32>
    %308 = arith.andi %307, %301 : vector<2x128xi1>
    %c128_i32_84 = arith.constant 128 : i32
    %309 = vector.broadcast %c128_i32_84 : i32 to vector<2x128xi32>
    %310 = arith.select %308, %10, %309 : vector<2x128xi1>, vector<2x128xi32>
    %cst_85 = arith.constant dense<2147483647> : vector<2xi32>
    %311 = vector.multi_reduction <minsi>, %310, %cst_85 [1] : vector<2x128xi32> to vector<2xi32>
    %312 = vector.shape_cast %311 : vector<2xi32> to vector<2x1xi32>
    %c3_86 = arith.constant 3 : index
    %313 = memref.load %arg1[%c3_86] : memref<7xi32, #tpu.memory_space<smem>>
    %c1_i32_87 = arith.constant 1 : i32
    %314 = arith.cmpi eq, %313, %c1_i32_87 : i32
    %315 = vector.extract_strided_slice %2 {offsets = [0, 4], sizes = [2, 1], strides = [1, 1]} : vector<2x8xi32> to vector<2x1xi32>
    %316 = arith.select %314, %315, %312 : vector<2x1xi32>
    %317 = vector.broadcast %316 : vector<2x1xi32> to vector<2x64xi32>
    %318 = arith.cmpi eq, %9, %317 : vector<2x64xi32>
    %319 = arith.extui %318 : vector<2x64xi1> to vector<2x64xi32>
    %320 = arith.sitofp %319 : vector<2x64xi32> to vector<2x64xf32>
    %321 = arith.truncf %320 : vector<2x64xf32> to vector<2x64xbf16>
    %cst_88 = arith.constant dense<0.000000e+00> : vector<2x16xf32>
    %322 = tpu.matmul %321, %3, %cst_88 {dimension_numbers = #tpu.dot_dimension_numbers<[1], [0], [0], [1], [0, 0, 1, 1], [], []>} : vector<2x64xbf16>, vector<64x16xbf16>, vector<2x16xf32> -> vector<2x16xf32>
    %323 = vector.shape_cast %299 : vector<2x32xf32> to vector<2x1x32xf32>
    %324 = vector.broadcast %323 : vector<2x1x32xf32> to vector<2x16x32xf32>
    %325 = arith.addf %1, %324 : vector<2x16x32xf32>
    %326 = math.tanh %325 : vector<2x16x32xf32>
    %327 = vector.shape_cast %4 : vector<1x32xf32> to vector<1x1x32xf32>
    %328 = vector.broadcast %327 : vector<1x1x32xf32> to vector<2x16x32xf32>
    %329 = arith.mulf %326, %328 : vector<2x16x32xf32>
    %cst_89 = arith.constant dense<0.000000e+00> : vector<2x16xf32>
    %330 = vector.multi_reduction <add>, %329, %cst_89 [2] : vector<2x16x32xf32> to vector<2x16xf32>
    %cst_90 = arith.constant dense<0xFF800000> : vector<2xf32>
    %331 = vector.multi_reduction <maximumf>, %330, %cst_90 [1] : vector<2x16xf32> to vector<2xf32>
    %332 = vector.shape_cast %331 : vector<2xf32> to vector<2x1xf32>
    %333 = vector.broadcast %332 : vector<2x1xf32> to vector<2x16xf32>
    %334 = arith.subf %330, %333 : vector<2x16xf32>
    %335 = math.exp %334 : vector<2x16xf32>
    %cst_91 = arith.constant dense<0.000000e+00> : vector<2xf32>
    %336 = vector.multi_reduction <add>, %335, %cst_91 [1] : vector<2x16xf32> to vector<2xf32>
    %337 = vector.shape_cast %336 : vector<2xf32> to vector<2x1xf32>
    %338 = tpu.reciprocal %337 {approx = true} : vector<2x1xf32> -> vector<2x1xf32>
    %339 = vector.broadcast %338 : vector<2x1xf32> to vector<2x16xf32>
    %340 = arith.mulf %335, %339 : vector<2x16xf32>
    %341 = vector.shape_cast %340 : vector<2x16xf32> to vector<2x16x1xf32>
    %342 = vector.broadcast %341 : vector<2x16x1xf32> to vector<2x16x32xf32>
    %343 = arith.mulf %342, %0 : vector<2x16x32xf32>
    %cst_92 = arith.constant dense<0.000000e+00> : vector<2x32xf32>
    %344 = vector.multi_reduction <add>, %343, %cst_92 [1] : vector<2x16x32xf32> to vector<2x32xf32>
    %345 = tpu.concatenate %322, %344, %290 in 1 : vector<2x16xf32>, vector<2x32xf32>, vector<2x64xf32> -> vector<2x112xf32>
    %346 = arith.truncf %345 : vector<2x112xf32> to vector<2x112xbf16>
    %cst_93 = arith.constant dense<0.000000e+00> : vector<2x256xf32>
    %347 = tpu.matmul %346, %5, %cst_93 {dimension_numbers = #tpu.dot_dimension_numbers<[1], [0], [0], [1], [0, 0, 1, 1], [], []>} : vector<2x112xbf16>, vector<112x256xbf16>, vector<2x256xf32> -> vector<2x256xf32>
    %348 = vector.broadcast %6 : vector<1x256xf32> to vector<2x256xf32>
    %349 = arith.addf %347, %348 : vector<2x256xf32>
    %350 = vector.extract_strided_slice %349 {offsets = [0, 0], sizes = [2, 192], strides = [1, 1]} : vector<2x256xf32> to vector<2x192xf32>
    %351 = arith.negf %350 : vector<2x192xf32>
    %352 = math.exp %351 : vector<2x192xf32>
    %cst_94 = arith.constant 1.000000e+00 : f32
    %353 = vector.broadcast %cst_94 : f32 to vector<2x192xf32>
    %354 = arith.addf %353, %352 : vector<2x192xf32>
    %355 = arith.divf %353, %354 : vector<2x192xf32>
    %356 = vector.extract_strided_slice %355 {offsets = [0, 0], sizes = [2, 64], strides = [1, 1]} : vector<2x192xf32> to vector<2x64xf32>
    %357 = vector.extract_strided_slice %355 {offsets = [0, 64], sizes = [2, 64], strides = [1, 1]} : vector<2x192xf32> to vector<2x64xf32>
    %358 = vector.extract_strided_slice %355 {offsets = [0, 128], sizes = [2, 64], strides = [1, 1]} : vector<2x192xf32> to vector<2x64xf32>
    %359 = vector.extract_strided_slice %349 {offsets = [0, 192], sizes = [2, 64], strides = [1, 1]} : vector<2x256xf32> to vector<2x64xf32>
    %360 = math.tanh %359 : vector<2x64xf32>
    %361 = arith.mulf %357, %288 : vector<2x64xf32>
    %362 = arith.mulf %356, %360 : vector<2x64xf32>
    %363 = arith.addf %361, %362 : vector<2x64xf32>
    %364 = math.tanh %363 : vector<2x64xf32>
    %365 = arith.mulf %358, %364 : vector<2x64xf32>
    %366 = tpu.concatenate %365, %344, %322 in 1 : vector<2x64xf32>, vector<2x32xf32>, vector<2x16xf32> -> vector<2x112xf32>
    %367 = arith.truncf %366 : vector<2x112xf32> to vector<2x112xbf16>
    %cst_95 = arith.constant dense<0.000000e+00> : vector<2x128xf32>
    %368 = tpu.matmul %367, %7, %cst_95 {dimension_numbers = #tpu.dot_dimension_numbers<[1], [0], [0], [1], [0, 0, 1, 1], [], []>} : vector<2x112xbf16>, vector<112x128xbf16>, vector<2x128xf32> -> vector<2x128xf32>
    %369 = vector.broadcast %8 : vector<1x128xf32> to vector<2x128xf32>
    %370 = arith.addf %368, %369 : vector<2x128xf32>
    %c4 = arith.constant 4 : index
    %c0_96 = arith.constant 0 : index
    %c0_97 = arith.constant 0 : index
    %371 = vector.load %arg12[%c4, %c0_96, %c0_97] : memref<7x2x128xf32, #tpu.memory_space<vmem>>, vector<1x2x128xf32>
    %372 = vector.shape_cast %371 : vector<1x2x128xf32> to vector<2x128xf32>
    %373 = vector.shape_cast %370 : vector<2x128xf32> to vector<1x2x128xf32>
    tpu.vector_store %arg12[%c4, %c0_96, %c0_97], %373 {strides = array<i32>} : memref<7x2x128xf32, #tpu.memory_space<vmem>>, vector<1x2x128xf32>,
    %374 = vector.extract_strided_slice %370 {offsets = [0, 64], sizes = [2, 32], strides = [1, 1]} : vector<2x128xf32> to vector<2x32xf32>
    %c64_i32_98 = arith.constant 64 : i32
    %375 = vector.broadcast %c64_i32_98 : i32 to vector<2x128xi32>
    %376 = arith.cmpi slt, %10, %375 : vector<2x128xi32>
    %cst_99 = arith.constant 0xFF800000 : f32
    %377 = vector.broadcast %cst_99 : f32 to vector<2x128xf32>
    %378 = arith.select %376, %370, %377 : vector<2x128xi1>, vector<2x128xf32>
    %cst_100 = arith.constant dense<0xFF800000> : vector<2xf32>
    %379 = vector.multi_reduction <maximumf>, %378, %cst_100 [1] : vector<2x128xf32> to vector<2xf32>
    %380 = vector.shape_cast %379 : vector<2xf32> to vector<2x1xf32>
    %381 = vector.broadcast %380 : vector<2x1xf32> to vector<2x128xf32>
    %382 = arith.cmpf oeq, %378, %381 : vector<2x128xf32>
    %383 = arith.andi %382, %376 : vector<2x128xi1>
    %c128_i32_101 = arith.constant 128 : i32
    %384 = vector.broadcast %c128_i32_101 : i32 to vector<2x128xi32>
    %385 = arith.select %383, %10, %384 : vector<2x128xi1>, vector<2x128xi32>
    %cst_102 = arith.constant dense<2147483647> : vector<2xi32>
    %386 = vector.multi_reduction <minsi>, %385, %cst_102 [1] : vector<2x128xi32> to vector<2xi32>
    %387 = vector.shape_cast %386 : vector<2xi32> to vector<2x1xi32>
    %c4_103 = arith.constant 4 : index
    %388 = memref.load %arg1[%c4_103] : memref<7xi32, #tpu.memory_space<smem>>
    %c1_i32_104 = arith.constant 1 : i32
    %389 = arith.cmpi eq, %388, %c1_i32_104 : i32
    %390 = vector.extract_strided_slice %2 {offsets = [0, 5], sizes = [2, 1], strides = [1, 1]} : vector<2x8xi32> to vector<2x1xi32>
    %391 = arith.select %389, %390, %387 : vector<2x1xi32>
    %392 = vector.broadcast %391 : vector<2x1xi32> to vector<2x64xi32>
    %393 = arith.cmpi eq, %9, %392 : vector<2x64xi32>
    %394 = arith.extui %393 : vector<2x64xi1> to vector<2x64xi32>
    %395 = arith.sitofp %394 : vector<2x64xi32> to vector<2x64xf32>
    %396 = arith.truncf %395 : vector<2x64xf32> to vector<2x64xbf16>
    %cst_105 = arith.constant dense<0.000000e+00> : vector<2x16xf32>
    %397 = tpu.matmul %396, %3, %cst_105 {dimension_numbers = #tpu.dot_dimension_numbers<[1], [0], [0], [1], [0, 0, 1, 1], [], []>} : vector<2x64xbf16>, vector<64x16xbf16>, vector<2x16xf32> -> vector<2x16xf32>
    %398 = vector.shape_cast %374 : vector<2x32xf32> to vector<2x1x32xf32>
    %399 = vector.broadcast %398 : vector<2x1x32xf32> to vector<2x16x32xf32>
    %400 = arith.addf %1, %399 : vector<2x16x32xf32>
    %401 = math.tanh %400 : vector<2x16x32xf32>
    %402 = vector.shape_cast %4 : vector<1x32xf32> to vector<1x1x32xf32>
    %403 = vector.broadcast %402 : vector<1x1x32xf32> to vector<2x16x32xf32>
    %404 = arith.mulf %401, %403 : vector<2x16x32xf32>
    %cst_106 = arith.constant dense<0.000000e+00> : vector<2x16xf32>
    %405 = vector.multi_reduction <add>, %404, %cst_106 [2] : vector<2x16x32xf32> to vector<2x16xf32>
    %cst_107 = arith.constant dense<0xFF800000> : vector<2xf32>
    %406 = vector.multi_reduction <maximumf>, %405, %cst_107 [1] : vector<2x16xf32> to vector<2xf32>
    %407 = vector.shape_cast %406 : vector<2xf32> to vector<2x1xf32>
    %408 = vector.broadcast %407 : vector<2x1xf32> to vector<2x16xf32>
    %409 = arith.subf %405, %408 : vector<2x16xf32>
    %410 = math.exp %409 : vector<2x16xf32>
    %cst_108 = arith.constant dense<0.000000e+00> : vector<2xf32>
    %411 = vector.multi_reduction <add>, %410, %cst_108 [1] : vector<2x16xf32> to vector<2xf32>
    %412 = vector.shape_cast %411 : vector<2xf32> to vector<2x1xf32>
    %413 = tpu.reciprocal %412 {approx = true} : vector<2x1xf32> -> vector<2x1xf32>
    %414 = vector.broadcast %413 : vector<2x1xf32> to vector<2x16xf32>
    %415 = arith.mulf %410, %414 : vector<2x16xf32>
    %416 = vector.shape_cast %415 : vector<2x16xf32> to vector<2x16x1xf32>
    %417 = vector.broadcast %416 : vector<2x16x1xf32> to vector<2x16x32xf32>
    %418 = arith.mulf %417, %0 : vector<2x16x32xf32>
    %cst_109 = arith.constant dense<0.000000e+00> : vector<2x32xf32>
    %419 = vector.multi_reduction <add>, %418, %cst_109 [1] : vector<2x16x32xf32> to vector<2x32xf32>
    %420 = tpu.concatenate %397, %419, %365 in 1 : vector<2x16xf32>, vector<2x32xf32>, vector<2x64xf32> -> vector<2x112xf32>
    %421 = arith.truncf %420 : vector<2x112xf32> to vector<2x112xbf16>
    %cst_110 = arith.constant dense<0.000000e+00> : vector<2x256xf32>
    %422 = tpu.matmul %421, %5, %cst_110 {dimension_numbers = #tpu.dot_dimension_numbers<[1], [0], [0], [1], [0, 0, 1, 1], [], []>} : vector<2x112xbf16>, vector<112x256xbf16>, vector<2x256xf32> -> vector<2x256xf32>
    %423 = vector.broadcast %6 : vector<1x256xf32> to vector<2x256xf32>
    %424 = arith.addf %422, %423 : vector<2x256xf32>
    %425 = vector.extract_strided_slice %424 {offsets = [0, 0], sizes = [2, 192], strides = [1, 1]} : vector<2x256xf32> to vector<2x192xf32>
    %426 = arith.negf %425 : vector<2x192xf32>
    %427 = math.exp %426 : vector<2x192xf32>
    %cst_111 = arith.constant 1.000000e+00 : f32
    %428 = vector.broadcast %cst_111 : f32 to vector<2x192xf32>
    %429 = arith.addf %428, %427 : vector<2x192xf32>
    %430 = arith.divf %428, %429 : vector<2x192xf32>
    %431 = vector.extract_strided_slice %430 {offsets = [0, 0], sizes = [2, 64], strides = [1, 1]} : vector<2x192xf32> to vector<2x64xf32>
    %432 = vector.extract_strided_slice %430 {offsets = [0, 64], sizes = [2, 64], strides = [1, 1]} : vector<2x192xf32> to vector<2x64xf32>
    %433 = vector.extract_strided_slice %430 {offsets = [0, 128], sizes = [2, 64], strides = [1, 1]} : vector<2x192xf32> to vector<2x64xf32>
    %434 = vector.extract_strided_slice %424 {offsets = [0, 192], sizes = [2, 64], strides = [1, 1]} : vector<2x256xf32> to vector<2x64xf32>
    %435 = math.tanh %434 : vector<2x64xf32>
    %436 = arith.mulf %432, %363 : vector<2x64xf32>
    %437 = arith.mulf %431, %435 : vector<2x64xf32>
    %438 = arith.addf %436, %437 : vector<2x64xf32>
    %439 = math.tanh %438 : vector<2x64xf32>
    %440 = arith.mulf %433, %439 : vector<2x64xf32>
    %441 = tpu.concatenate %440, %419, %397 in 1 : vector<2x64xf32>, vector<2x32xf32>, vector<2x16xf32> -> vector<2x112xf32>
    %442 = arith.truncf %441 : vector<2x112xf32> to vector<2x112xbf16>
    %cst_112 = arith.constant dense<0.000000e+00> : vector<2x128xf32>
    %443 = tpu.matmul %442, %7, %cst_112 {dimension_numbers = #tpu.dot_dimension_numbers<[1], [0], [0], [1], [0, 0, 1, 1], [], []>} : vector<2x112xbf16>, vector<112x128xbf16>, vector<2x128xf32> -> vector<2x128xf32>
    %444 = vector.broadcast %8 : vector<1x128xf32> to vector<2x128xf32>
    %445 = arith.addf %443, %444 : vector<2x128xf32>
    %c5 = arith.constant 5 : index
    %c0_113 = arith.constant 0 : index
    %c0_114 = arith.constant 0 : index
    %446 = vector.load %arg12[%c5, %c0_113, %c0_114] : memref<7x2x128xf32, #tpu.memory_space<vmem>>, vector<1x2x128xf32>
    %447 = vector.shape_cast %446 : vector<1x2x128xf32> to vector<2x128xf32>
    %448 = vector.shape_cast %445 : vector<2x128xf32> to vector<1x2x128xf32>
    tpu.vector_store %arg12[%c5, %c0_113, %c0_114], %448 {strides = array<i32>} : memref<7x2x128xf32, #tpu.memory_space<vmem>>, vector<1x2x128xf32>,
    %449 = vector.extract_strided_slice %445 {offsets = [0, 64], sizes = [2, 32], strides = [1, 1]} : vector<2x128xf32> to vector<2x32xf32>
    %c64_i32_115 = arith.constant 64 : i32
    %450 = vector.broadcast %c64_i32_115 : i32 to vector<2x128xi32>
    %451 = arith.cmpi slt, %10, %450 : vector<2x128xi32>
    %cst_116 = arith.constant 0xFF800000 : f32
    %452 = vector.broadcast %cst_116 : f32 to vector<2x128xf32>
    %453 = arith.select %451, %445, %452 : vector<2x128xi1>, vector<2x128xf32>
    %cst_117 = arith.constant dense<0xFF800000> : vector<2xf32>
    %454 = vector.multi_reduction <maximumf>, %453, %cst_117 [1] : vector<2x128xf32> to vector<2xf32>
    %455 = vector.shape_cast %454 : vector<2xf32> to vector<2x1xf32>
    %456 = vector.broadcast %455 : vector<2x1xf32> to vector<2x128xf32>
    %457 = arith.cmpf oeq, %453, %456 : vector<2x128xf32>
    %458 = arith.andi %457, %451 : vector<2x128xi1>
    %c128_i32_118 = arith.constant 128 : i32
    %459 = vector.broadcast %c128_i32_118 : i32 to vector<2x128xi32>
    %460 = arith.select %458, %10, %459 : vector<2x128xi1>, vector<2x128xi32>
    %cst_119 = arith.constant dense<2147483647> : vector<2xi32>
    %461 = vector.multi_reduction <minsi>, %460, %cst_119 [1] : vector<2x128xi32> to vector<2xi32>
    %462 = vector.shape_cast %461 : vector<2xi32> to vector<2x1xi32>
    %c5_120 = arith.constant 5 : index
    %463 = memref.load %arg1[%c5_120] : memref<7xi32, #tpu.memory_space<smem>>
    %c1_i32_121 = arith.constant 1 : i32
    %464 = arith.cmpi eq, %463, %c1_i32_121 : i32
    %465 = vector.extract_strided_slice %2 {offsets = [0, 6], sizes = [2, 1], strides = [1, 1]} : vector<2x8xi32> to vector<2x1xi32>
    %466 = arith.select %464, %465, %462 : vector<2x1xi32>
    %467 = vector.broadcast %466 : vector<2x1xi32> to vector<2x64xi32>
    %468 = arith.cmpi eq, %9, %467 : vector<2x64xi32>
    %469 = arith.extui %468 : vector<2x64xi1> to vector<2x64xi32>
    %470 = arith.sitofp %469 : vector<2x64xi32> to vector<2x64xf32>
    %471 = arith.truncf %470 : vector<2x64xf32> to vector<2x64xbf16>
    %cst_122 = arith.constant dense<0.000000e+00> : vector<2x16xf32>
    %472 = tpu.matmul %471, %3, %cst_122 {dimension_numbers = #tpu.dot_dimension_numbers<[1], [0], [0], [1], [0, 0, 1, 1], [], []>} : vector<2x64xbf16>, vector<64x16xbf16>, vector<2x16xf32> -> vector<2x16xf32>
    %473 = vector.shape_cast %449 : vector<2x32xf32> to vector<2x1x32xf32>
    %474 = vector.broadcast %473 : vector<2x1x32xf32> to vector<2x16x32xf32>
    %475 = arith.addf %1, %474 : vector<2x16x32xf32>
    %476 = math.tanh %475 : vector<2x16x32xf32>
    %477 = vector.shape_cast %4 : vector<1x32xf32> to vector<1x1x32xf32>
    %478 = vector.broadcast %477 : vector<1x1x32xf32> to vector<2x16x32xf32>
    %479 = arith.mulf %476, %478 : vector<2x16x32xf32>
    %cst_123 = arith.constant dense<0.000000e+00> : vector<2x16xf32>
    %480 = vector.multi_reduction <add>, %479, %cst_123 [2] : vector<2x16x32xf32> to vector<2x16xf32>
    %cst_124 = arith.constant dense<0xFF800000> : vector<2xf32>
    %481 = vector.multi_reduction <maximumf>, %480, %cst_124 [1] : vector<2x16xf32> to vector<2xf32>
    %482 = vector.shape_cast %481 : vector<2xf32> to vector<2x1xf32>
    %483 = vector.broadcast %482 : vector<2x1xf32> to vector<2x16xf32>
    %484 = arith.subf %480, %483 : vector<2x16xf32>
    %485 = math.exp %484 : vector<2x16xf32>
    %cst_125 = arith.constant dense<0.000000e+00> : vector<2xf32>
    %486 = vector.multi_reduction <add>, %485, %cst_125 [1] : vector<2x16xf32> to vector<2xf32>
    %487 = vector.shape_cast %486 : vector<2xf32> to vector<2x1xf32>
    %488 = tpu.reciprocal %487 {approx = true} : vector<2x1xf32> -> vector<2x1xf32>
    %489 = vector.broadcast %488 : vector<2x1xf32> to vector<2x16xf32>
    %490 = arith.mulf %485, %489 : vector<2x16xf32>
    %491 = vector.shape_cast %490 : vector<2x16xf32> to vector<2x16x1xf32>
    %492 = vector.broadcast %491 : vector<2x16x1xf32> to vector<2x16x32xf32>
    %493 = arith.mulf %492, %0 : vector<2x16x32xf32>
    %cst_126 = arith.constant dense<0.000000e+00> : vector<2x32xf32>
    %494 = vector.multi_reduction <add>, %493, %cst_126 [1] : vector<2x16x32xf32> to vector<2x32xf32>
    %495 = tpu.concatenate %472, %494, %440 in 1 : vector<2x16xf32>, vector<2x32xf32>, vector<2x64xf32> -> vector<2x112xf32>
    %496 = arith.truncf %495 : vector<2x112xf32> to vector<2x112xbf16>
    %cst_127 = arith.constant dense<0.000000e+00> : vector<2x256xf32>
    %497 = tpu.matmul %496, %5, %cst_127 {dimension_numbers = #tpu.dot_dimension_numbers<[1], [0], [0], [1], [0, 0, 1, 1], [], []>} : vector<2x112xbf16>, vector<112x256xbf16>, vector<2x256xf32> -> vector<2x256xf32>
    %498 = vector.broadcast %6 : vector<1x256xf32> to vector<2x256xf32>
    %499 = arith.addf %497, %498 : vector<2x256xf32>
    %500 = vector.extract_strided_slice %499 {offsets = [0, 0], sizes = [2, 192], strides = [1, 1]} : vector<2x256xf32> to vector<2x192xf32>
    %501 = arith.negf %500 : vector<2x192xf32>
    %502 = math.exp %501 : vector<2x192xf32>
    %cst_128 = arith.constant 1.000000e+00 : f32
    %503 = vector.broadcast %cst_128 : f32 to vector<2x192xf32>
    %504 = arith.addf %503, %502 : vector<2x192xf32>
    %505 = arith.divf %503, %504 : vector<2x192xf32>
    %506 = vector.extract_strided_slice %505 {offsets = [0, 0], sizes = [2, 64], strides = [1, 1]} : vector<2x192xf32> to vector<2x64xf32>
    %507 = vector.extract_strided_slice %505 {offsets = [0, 64], sizes = [2, 64], strides = [1, 1]} : vector<2x192xf32> to vector<2x64xf32>
    %508 = vector.extract_strided_slice %505 {offsets = [0, 128], sizes = [2, 64], strides = [1, 1]} : vector<2x192xf32> to vector<2x64xf32>
    %509 = vector.extract_strided_slice %499 {offsets = [0, 192], sizes = [2, 64], strides = [1, 1]} : vector<2x256xf32> to vector<2x64xf32>
    %510 = math.tanh %509 : vector<2x64xf32>
    %511 = arith.mulf %507, %438 : vector<2x64xf32>
    %512 = arith.mulf %506, %510 : vector<2x64xf32>
    %513 = arith.addf %511, %512 : vector<2x64xf32>
    %514 = math.tanh %513 : vector<2x64xf32>
    %515 = arith.mulf %508, %514 : vector<2x64xf32>
    %516 = tpu.concatenate %515, %494, %472 in 1 : vector<2x64xf32>, vector<2x32xf32>, vector<2x16xf32> -> vector<2x112xf32>
    %517 = arith.truncf %516 : vector<2x112xf32> to vector<2x112xbf16>
    %cst_129 = arith.constant dense<0.000000e+00> : vector<2x128xf32>
    %518 = tpu.matmul %517, %7, %cst_129 {dimension_numbers = #tpu.dot_dimension_numbers<[1], [0], [0], [1], [0, 0, 1, 1], [], []>} : vector<2x112xbf16>, vector<112x128xbf16>, vector<2x128xf32> -> vector<2x128xf32>
    %519 = vector.broadcast %8 : vector<1x128xf32> to vector<2x128xf32>
    %520 = arith.addf %518, %519 : vector<2x128xf32>
    %c6 = arith.constant 6 : index
    %c0_130 = arith.constant 0 : index
    %c0_131 = arith.constant 0 : index
    %521 = vector.load %arg12[%c6, %c0_130, %c0_131] : memref<7x2x128xf32, #tpu.memory_space<vmem>>, vector<1x2x128xf32>
    %522 = vector.shape_cast %521 : vector<1x2x128xf32> to vector<2x128xf32>
    %523 = vector.shape_cast %520 : vector<2x128xf32> to vector<1x2x128xf32>
    tpu.vector_store %arg12[%c6, %c0_130, %c0_131], %523 {strides = array<i32>} : memref<7x2x128xf32, #tpu.memory_space<vmem>>, vector<1x2x128xf32>,
    return
  }
  func.func @transform_0(%arg0: i32, %arg1: memref<7xi32, #tpu.memory_space<smem>>) -> (i32, i32, i32) {
    %c0_i32 = arith.constant 0 : i32
    %c0_i32_0 = arith.constant 0 : i32
    %c0_i32_1 = arith.constant 0 : i32
    %c0_i32_2 = arith.constant 0 : i32
    return %c0_i32, %c0_i32_0, %c0_i32_1 : i32, i32, i32
  }
  func.func @transform_1(%arg0: i32, %arg1: memref<7xi32, #tpu.memory_space<smem>>) -> (i32, i32, i32) {
    %c0_i32 = arith.constant 0 : i32
    %c0_i32_0 = arith.constant 0 : i32
    %c0_i32_1 = arith.constant 0 : i32
    %c0_i32_2 = arith.constant 0 : i32
    return %c0_i32, %c0_i32_0, %c0_i32_1 : i32, i32, i32
  }
  func.func @transform_2(%arg0: i32, %arg1: memref<7xi32, #tpu.memory_space<smem>>) -> (i32, i32) {
    %c0_i32 = arith.constant 0 : i32
    %c0_i32_0 = arith.constant 0 : i32
    %c0_i32_1 = arith.constant 0 : i32
    return %c0_i32, %c0_i32_0 : i32, i32
  }
  func.func @transform_3(%arg0: i32, %arg1: memref<7xi32, #tpu.memory_space<smem>>) -> (i32, i32) {
    %c0_i32 = arith.constant 0 : i32
    %c0_i32_0 = arith.constant 0 : i32
    %c0_i32_1 = arith.constant 0 : i32
    return %c0_i32, %c0_i32_0 : i32, i32
  }
  func.func @transform_4(%arg0: i32, %arg1: memref<7xi32, #tpu.memory_space<smem>>) -> (i32, i32) {
    %c0_i32 = arith.constant 0 : i32
    %c0_i32_0 = arith.constant 0 : i32
    %c0_i32_1 = arith.constant 0 : i32
    return %c0_i32, %c0_i32_0 : i32, i32
  }
  func.func @transform_5(%arg0: i32, %arg1: memref<7xi32, #tpu.memory_space<smem>>) -> (i32, i32) {
    %c0_i32 = arith.constant 0 : i32
    %c0_i32_0 = arith.constant 0 : i32
    %c0_i32_1 = arith.constant 0 : i32
    return %c0_i32, %c0_i32_0 : i32, i32
  }
  func.func @transform_6(%arg0: i32, %arg1: memref<7xi32, #tpu.memory_space<smem>>) -> (i32, i32) {
    %c0_i32 = arith.constant 0 : i32
    %c0_i32_0 = arith.constant 0 : i32
    %c0_i32_1 = arith.constant 0 : i32
    return %c0_i32, %c0_i32_0 : i32, i32
  }
  func.func @transform_7(%arg0: i32, %arg1: memref<7xi32, #tpu.memory_space<smem>>) -> (i32, i32) {
    %c0_i32 = arith.constant 0 : i32
    %c0_i32_0 = arith.constant 0 : i32
    %c0_i32_1 = arith.constant 0 : i32
    return %c0_i32, %c0_i32_0 : i32, i32
  }
  func.func @transform_8(%arg0: i32, %arg1: memref<7xi32, #tpu.memory_space<smem>>) -> (i32, i32) {
    %c0_i32 = arith.constant 0 : i32
    %c0_i32_0 = arith.constant 0 : i32
    %c0_i32_1 = arith.constant 0 : i32
    return %c0_i32, %c0_i32_0 : i32, i32
  }
  func.func @transform_9(%arg0: i32, %arg1: memref<7xi32, #tpu.memory_space<smem>>) -> (i32, i32) {
    %c0_i32 = arith.constant 0 : i32
    %c0_i32_0 = arith.constant 0 : i32
    %c0_i32_1 = arith.constant 0 : i32
    return %c0_i32, %c0_i32_0 : i32, i32
  }
  func.func @transform_10(%arg0: i32, %arg1: memref<7xi32, #tpu.memory_space<smem>>) -> (i32, i32, i32) {
    %c0_i32 = arith.constant 0 : i32
    %c0_i32_0 = arith.constant 0 : i32
    %c0_i32_1 = arith.constant 0 : i32
    %c0_i32_2 = arith.constant 0 : i32
    return %c0_i32, %c0_i32_0, %c0_i32_1 : i32, i32, i32
  }
}

</mosaic_0001>

<bundles_post_ra>
// kernel: seq2seq_forward.2
= control target key start
LH: loop header
LB: loop body
LE: loop exit
PB: predicated region body
PF: predicated region fallthrough
CT: control target
= control target key end

     0   :  { %vm598_vm0 = vcmask 261120   ;;  %s1268_s1 = inlined_call_operand.vmem [shape: bf16[768,32], index: 1, kind: input, shape index: {}]   ;;  %s1269_s2 = inlined_call_operand.vmem [shape: f32[1,32], index: 2, kind: input, shape index: {}]   ;;  %s1270_s0 = inlined_call_operand.vmem [shape: bf16[32,768], index: 0, kind: input, shape index: {}]   ;;  %s1271_s3 = inlined_call_operand.vmem [shape: bf16[32,32], index: 3, kind: input, shape index: {}]   ;;  %s1272_s4 = inlined_call_operand.vmem [shape: f32[32,32], index: 4, kind: output, shape index: {0}]   ;;  %s1273_s5 = inlined_call_operand.vmem [shape: f32[32,32], index: 5, kind: output, shape index: {1}]  }
   0x1   :  { %v927_v0 = vld [vmem:[%s1268_s1 + $0x38] sm:$0xff]  ;;  %v926_v4 = vld [vmem:[%s1268_s1 + $0x30] sm:$0xff]  ;;  %v925_v8 = vld [vmem:[%s1268_s1 + $0x28] sm:$0xff] }
   0x2   :  { %v935_v1 = vld [vmem:[%s1268_s1 + $0x78] sm:$0xff]  ;;  %480 = vmatpush.bf16.msra.mxu0 %v927_v0  ;;  %v934_v5 = vld [vmem:[%s1268_s1 + $0x70] sm:$0xff]  ;;  %v933_v9 = vld [vmem:[%s1268_s1 + $0x68] sm:$0xff] }
   0x3   :  { %v943_v2 = vld [vmem:[%s1268_s1 + $0xb8] sm:$0xff]  ;;  %499 = vmatpush.bf16.msra.mxu1 %v935_v1  ;;  %v942_v6 = vld [vmem:[%s1268_s1 + $0xb0] sm:$0xff]  ;;  %v941_v10 = vld [vmem:[%s1268_s1 + $0xa8] sm:$0xff] }
   0x4   :  { %v951_v3 = vld [vmem:[%s1268_s1 + $0xf8] sm:$0xff]  ;;  %518 = vmatpush.bf16.msra.mxu2 %v943_v2  ;;  %v950_v7 = vld [vmem:[%s1268_s1 + $0xf0] sm:$0xff]  ;;  %v949_v11 = vld [vmem:[%s1268_s1 + $0xe8] sm:$0xff] }
   0x5   :  { %537 = vmatpush.bf16.msra.mxu3 %v951_v3  ;;  %v924_v12 = vld [vmem:[%s1268_s1 + $0x20] sm:$0xff]  ;;  %v923_v16 = vld [vmem:[%s1268_s1 + $0x18] sm:$0xff]  ;;  %v922_v20 = vld [vmem:[%s1268_s1 + $0x10] sm:$0xff] }
   0x6   :  { %481 = vmatpush.bf16.msra.mxu0 %v926_v4  ;;  %v932_v13 = vld [vmem:[%s1268_s1 + $0x60] sm:$0xff]  ;;  %v931_v17 = vld [vmem:[%s1268_s1 + $0x58] sm:$0xff]  ;;  %v930_v21 = vld [vmem:[%s1268_s1 + $0x50] sm:$0xff] }
   0x7   :  { %500 = vmatpush.bf16.msra.mxu1 %v934_v5  ;;  %v940_v14 = vld [vmem:[%s1268_s1 + $0xa0] sm:$0xff]  ;;  %v939_v18 = vld [vmem:[%s1268_s1 + $0x98] sm:$0xff]  ;;  %v938_v22 = vld [vmem:[%s1268_s1 + $0x90] sm:$0xff] }
   0x8   :  { %519 = vmatpush.bf16.msra.mxu2 %v942_v6  ;;  %v948_v15 = vld [vmem:[%s1268_s1 + $0xe0] sm:$0xff]  ;;  %v947_v19 = vld [vmem:[%s1268_s1 + $0xd8] sm:$0xff]  ;;  %v946_v23 = vld [vmem:[%s1268_s1 + $0xd0] sm:$0xff] }
   0x9   :  { %538 = vmatpush.bf16.msra.mxu3 %v950_v7  ;;  %v921_v24 = vld [vmem:[%s1268_s1 + $0x8] sm:$0xff]  ;;  %v920_v28 = vld [vmem:[%s1268_s1] sm:$0xff]  ;;  %v911_v33 = vld [vmem:[%s1270_s0 + $0x14] sm:$0xf0] }
   0xa   :  { %482 = vmatpush.bf16.msra.mxu0 %v925_v8  ;;  %v929_v25 = vld [vmem:[%s1268_s1 + $0x48] sm:$0xff]  ;;  %v928_v29 = vld [vmem:[%s1268_s1 + $0x40] sm:$0xff]  ;;  %v662_v35 = vld [vmem:[%s1270_s0 + $0x18] sm:$0xf0] }
   0xb   :  { %501 = vmatpush.bf16.msra.mxu1 %v933_v9  ;;  %v937_v26 = vld [vmem:[%s1268_s1 + $0x88] sm:$0xff]  ;;  %v936_v30 = vld [vmem:[%s1268_s1 + $0x80] sm:$0xff]  ;;  %v959_v40 = vld [vmem:[%s1268_s1 + $0x138] sm:$0xff] }
   0xc   :  { %520 = vmatpush.bf16.msra.mxu2 %v941_v10  ;;  %v945_v27 = vld [vmem:[%s1268_s1 + $0xc8] sm:$0xff]  ;;  %v944_v31 = vld [vmem:[%s1268_s1 + $0xc0] sm:$0xff]  ;;  %v967_v45 = vld [vmem:[%s1268_s1 + $0x178] sm:$0xff] }
   0xd   :  { %539 = vmatpush.bf16.msra.mxu3 %v949_v11  ;;  %v660_v32 = vld [vmem:[%s1270_s0] sm:$0xf]  ;;  %v908_v34 = vld [vmem:[%s1270_s0 + $0x4] sm:$0xf]  ;;  %v668_v36 = vld [vmem:[%s1270_s0 + $0x8] sm:$0xf] }
   0xe   :  { %483 = vmatpush.bf16.msra.mxu0 %v924_v12  ;;  %v912_v37 = vld [vmem:[%s1270_s0 + $0x1c] sm:$0xf0]  ;;  %v909_v38 = vld [vmem:[%s1270_s0 + $0xc] sm:$0xf]  ;;  %v670_v39 = vld [vmem:[%s1270_s0 + $0x20] sm:$0xf0]  ;;  %v661_v41 = vor.u32 %v911_v33, %v660_v32  ;;  %v665_v42 = vor.u32 %v908_v34, %v662_v35 }
   0xf   :  { %502 = vmatpush.bf16.msra.mxu1 %v932_v13  ;;  %v669_v43 = vor.u32 %v912_v37, %v668_v36  ;;  %v673_v44 = vor.u32 %v909_v38, %v670_v39  ;;  %v958_v46 = vld [vmem:[%s1268_s1 + $0x130] sm:$0xff]  ;;  %v957_v48 = vld [vmem:[%s1268_s1 + $0x128] sm:$0xff]  ;;  %v956_v50 = vld [vmem:[%s1268_s1 + $0x120] sm:$0xff] }
  0x10   :  { %521 = vmatpush.bf16.msra.mxu2 %v940_v14  ;;  %v966_v47 = vld [vmem:[%s1268_s1 + $0x170] sm:$0xff]  ;;  %v965_v49 = vld [vmem:[%s1268_s1 + $0x168] sm:$0xff]  ;;  %v964_v51 = vld [vmem:[%s1268_s1 + $0x160] sm:$0xff] }
  0x11   :  { %540 = vmatpush.bf16.msra.mxu3 %v948_v15  ;;  %v684_v52 = vld [vmem:[%s1270_s0 + $0x30] sm:$0xf]  ;;  %v917_v53 = vld [vmem:[%s1270_s0 + $0x44] sm:$0xf0]  ;;  %v914_v54 = vld [vmem:[%s1270_s0 + $0x34] sm:$0xf] }
  0x12   :  { %484 = vmatpush.bf16.msra.mxu0 %v923_v16  ;;  %v686_v55 = vld [vmem:[%s1270_s0 + $0x48] sm:$0xf0]  ;;  %v692_v56 = vld [vmem:[%s1270_s0 + $0x38] sm:$0xf]  ;;  %v918_v57 = vld [vmem:[%s1270_s0 + $0x4c] sm:$0xf0]  ;;  %v685_v61 = vor.u32 %v917_v53, %v684_v52 }
  0x13   :  { %503 = vmatpush.bf16.msra.mxu1 %v931_v17  ;;  %v915_v58 = vld [vmem:[%s1270_s0 + $0x3c] sm:$0xf]  ;;  %v694_v59 = vld [vmem:[%s1270_s0 + $0x50] sm:$0xf0]  ;;  %v689_v62 = vor.u32 %v914_v54, %v686_v55  ;;  %v693_v63 = vor.u32 %v918_v57, %v692_v56  ;;  %v953_v4 = vld [vmem:[%s1268_s1 + $0x108] sm:$0xff] }
  0x14   :  { %522 = vmatpush.bf16.msra.mxu2 %v939_v18  ;;  %v955_v60 = vld [vmem:[%s1268_s1 + $0x118] sm:$0xff]  ;;  %v697_v0 = vor.u32 %v915_v58, %v694_v59  ;;  %v954_v2 = vld [vmem:[%s1268_s1 + $0x110] sm:$0xff]  ;;  %v961_v5 = vld [vmem:[%s1268_s1 + $0x148] sm:$0xff] }
  0x15   :  { %541 = vmatpush.bf16.msra.mxu3 %v947_v19  ;;  %v963_v1 = vld [vmem:[%s1268_s1 + $0x158] sm:$0xff]  ;;  %v962_v3 = vld [vmem:[%s1268_s1 + $0x150] sm:$0xff]  ;;  %v952_v6 = vld [vmem:[%s1268_s1 + $0x100] sm:$0xff] }
  0x16   :  { %485 = vmatpush.bf16.msra.mxu0 %v922_v20  ;;  %v960_v7 = vld [vmem:[%s1268_s1 + $0x140] sm:$0xff]  ;;  %v676_v8 = vld [vmem:[%s1270_s0 + $0x10] sm:$0xf]  ;;  %v913_v9 = vld [vmem:[%s1270_s0 + $0x24] sm:$0xf0] }
  0x17   :  { %504 = vmatpush.bf16.msra.mxu1 %v930_v21  ;;  %v700_v10 = vld [vmem:[%s1270_s0 + $0x40] sm:$0xf]  ;;  %v919_v11 = vld [vmem:[%s1270_s0 + $0x54] sm:$0xf0]  ;;  %v910_v12 = vld [vmem:[%s1270_s0 + $0x14] sm:$0xf]  ;;  %v677_v14 = vor.u32 %v913_v9, %v676_v8 }
  0x18   :  { %523 = vmatpush.bf16.msra.mxu2 %v938_v22  ;;  %v678_v13 = vld [vmem:[%s1270_s0 + $0x28] sm:$0xf0]  ;;  %v701_v15 = vor.u32 %v919_v11, %v700_v10  ;;  %v916_v17 = vld [vmem:[%s1270_s0 + $0x44] sm:$0xf]  ;;  %v702_v18 = vld [vmem:[%s1270_s0 + $0x58] sm:$0xf0] }
  0x19   :  { %542 = vmatpush.bf16.msra.mxu3 %v946_v23  ;;  %v681_v16 = vor.u32 %v910_v12, %v678_v13  ;;  %v705_v19 = vor.u32 %v916_v17, %v702_v18  ;;  %v969_v20 = vld [vmem:[%s1271_s3 + $0x8] sm:$0xff] }
  0x1a   :  { %486 = vmatpush.bf16.msra.mxu0 %v921_v24  ;;  %v968_v24 = vld [vmem:[%s1271_s3] sm:$0xff] }
  0x1b   :  { %505 = vmatpush.bf16.msra.mxu1 %v929_v25 }
  0x1c   :  { %524 = vmatpush.bf16.msra.mxu2 %v937_v26 }
  0x1d   :  { %543 = vmatpush.bf16.msra.mxu3 %v945_v27 }
  0x1e   :  { %487 = vmatpush.bf16.msra.mxu0 %v920_v28 }
  0x1f   :  { %506 = vmatpush.bf16.msra.mxu1 %v928_v29 }
  0x20   :  { %525 = vmatpush.bf16.msra.mxu2 %v936_v30  ;;  %v978_v30 = vld [vmem:[%s1269_s2] ss:$0 sm:$0xff] }
  0x21   :  { %544 = vmatpush.bf16.msra.mxu3 %v944_v31  ;;  %488 = vmatmul.bf16.vlgmr.msra.gmra.mxu0 %v661_v41 }
  0x22   :  { %556 = vmatpush.bf16.msrb.mxu0 %v959_v40  ;;  %507 = vmatmul.bf16.vlgmr.msra.gmra.mxu1 %v665_v42 }
  0x23   :  { %526 = vmatmul.bf16.vlgmr.msra.gmra.mxu2 %v669_v43  ;;  %575 = vmatpush.bf16.msrb.mxu1 %v967_v45 }
  0x24   :  { %545 = vmatmul.bf16.vlgmr.msra.gmra.mxu3 %v673_v44  ;;  %633 = vmatpush.bf16.msrb.mxu2 %v969_v20 }
  0x25   :  { %970 = vmatpush.bf16.msrb.mxu3 %v959_v40 }
  0x26   :  { %557 = vmatpush.bf16.msrb.mxu0 %v958_v46 }
  0x27   :  { %576 = vmatpush.bf16.msrb.mxu1 %v966_v47 }
  0x28   :  { %634 = vmatpush.bf16.msrb.mxu2 %v968_v24 }
  0x29   :  { %971 = vmatpush.bf16.msrb.mxu3 %v958_v46 }
  0x2a   :  { %558 = vmatpush.bf16.msrb.mxu0 %v957_v48 }
  0x2b   :  { %577 = vmatpush.bf16.msrb.mxu1 %v965_v49 }
  0x2d   :  { %972 = vmatpush.bf16.msrb.mxu3 %v957_v48 }
  0x2e   :  { %559 = vmatpush.bf16.msrb.mxu0 %v956_v50 }
  0x2f   :  { %578 = vmatpush.bf16.msrb.mxu1 %v964_v51 }
  0x31   :  { %973 = vmatpush.bf16.msrb.mxu3 %v956_v50  ;;  %493 = vmatmul.bf16.gmra.mxu0 %v685_v61 }
  0x32   :  { %560 = vmatpush.bf16.msrb.mxu0 %v955_v60  ;;  %512 = vmatmul.bf16.gmra.mxu1 %v689_v62 }
  0x33   :  { %531 = vmatmul.bf16.gmra.mxu2 %v693_v63  ;;  %579 = vmatpush.bf16.msrb.mxu1 %v963_v1 }
  0x34   :  { %550 = vmatmul.bf16.gmra.mxu3 %v697_v0 }
  0x35   :  { %974 = vmatpush.bf16.msrb.mxu3 %v955_v60 }
  0x36   :  { %561 = vmatpush.bf16.msrb.mxu0 %v954_v2 }
  0x37   :  { %580 = vmatpush.bf16.msrb.mxu1 %v962_v3 }
  0x39   :  { %975 = vmatpush.bf16.msrb.mxu3 %v954_v2 }
  0x3a   :  { %562 = vmatpush.bf16.msrb.mxu0 %v953_v4 }
  0x3b   :  { %581 = vmatpush.bf16.msrb.mxu1 %v961_v5 }
  0x3d   :  { %976 = vmatpush.bf16.msrb.mxu3 %v953_v4 }
  0x3e   :  { %563 = vmatpush.bf16.msrb.mxu0 %v952_v6 }
  0x3f   :  { %582 = vmatpush.bf16.msrb.mxu1 %v960_v7 }
  0x41   :  { %977 = vmatpush.bf16.msrb.mxu3 %v952_v6  ;;  %564 = vmatmul.bf16.vlgmr.msrb.gmra.mxu0 %v677_v14 }
  0x42   :  { %583 = vmatmul.bf16.vlgmr.msrb.gmra.mxu1 %v681_v16 }
  0x44   :  { %569 = vmatmul.bf16.vlgmr.msrb.gmra.mxu3 %v701_v15 }
  0x52   :  { %588 = vmatmul.bf16.gmra.mxu1 %v705_v19 }
  0x9e   :  { %v489_v21 = vpop.f32.mrf.mxu0 }
  0x9f   :  { %v508_v22 = vpop.f32.mrf.mxu1  ;;  %v490_v32 = vadd.f32 %v978_v30, %v489_v21 }
  0xa1   :  { %v509_v36 = vadd.f32 %v508_v22, %v490_v32 }
  0xa6   :  { %v491_v25 = vpop.f32.mrf.mxu0  ;;  %v527_v31 = vpop.f32.mrf.mxu2 }
  0xa7   :  { %v546_v23 = vpop.f32.mrf.mxu3  ;;  %v510_v26 = vpop.f32.mrf.mxu1  ;;  %v528_v37 = vadd.f32 %v527_v31, %v509_v36  ;;  %v492_v39 = vadd.f32 %v978_v30, %v491_v25 }
  0xa9   :  { %v547_v40 = vadd.f32 %v546_v23, %v528_v37  ;;  %v511_v42 = vadd.f32 %v510_v26, %v492_v39 }
  0xae   :  { %v494_v28 = vpop.f32.mrf.mxu0  ;;  %v529_v38 = vpop.f32.mrf.mxu2 }
  0xaf   :  { %v548_v27 = vpop.f32.mrf.mxu3  ;;  %v513_v29 = vpop.f32.mrf.mxu1  ;;  %v530_v46 = vadd.f32 %v529_v38, %v511_v42  ;;  %v495_v48 = vadd.f32 %v978_v30, %v494_v28 }
  0xb1   :  { %v549_v51 = vadd.f32 %v548_v27, %v530_v46  ;;  %v514_v52 = vadd.f32 %v513_v29, %v495_v48 }
  0xb6   :  { %v496_v34 = vpop.f32.mrf.mxu0  ;;  %v532_v49 = vpop.f32.mrf.mxu2 }
  0xb7   :  { %v551_v33 = vpop.f32.mrf.mxu3  ;;  %v515_v35 = vpop.f32.mrf.mxu1  ;;  %v533_v56 = vadd.f32 %v532_v49, %v514_v52  ;;  %v497_v59 = vadd.f32 %v978_v30, %v496_v34 }
  0xb9   :  { %v552_v61 = vadd.f32 %v551_v33, %v533_v56  ;;  %v516_v0 = vadd.f32 %v515_v35, %v497_v59 }
  0xbe   :  { %v565_v41 = vpop.f32.mrf.mxu0  ;;  %v534_v62 = vpop.f32.mrf.mxu2 }
  0xbf   :  { %v553_v43 = vpop.f32.mrf.mxu3  ;;  %v566_v44 = vadd.f32 %v565_v41, %v547_v40  ;;  %v584_v45 = vpop.f32.mrf.mxu1  ;;  %v535_v3 = vadd.f32 %v534_v62, %v516_v0 }
  0xc1   :  { %v585_v47 = vadd.f32 %v584_v45, %v566_v44  ;;  %v554_v7 = vadd.f32 %v553_v43, %v535_v3 }
  0xc3   :  { %v594_v50 = vmax.f32 %v585_v47, 0.0 }
  0xc5   :  { %599 = vst.msk [vmem:[%s1272_s4] sm:$0xff] %vm598_vm0, %v594_v50 }
  0xc6   :  { %v567_v53 = vpop.f32.mrf.mxu0 }
  0xc7   :  { %v568_v54 = vadd.f32 %v567_v53, %v549_v51  ;;  %v586_v55 = vpop.f32.mrf.mxu1  ;;  %v570_v57 = vpop.f32.mrf.mxu3 }
  0xc8   :  { %v571_v1 = vadd.f32 %v570_v57, %v552_v61 }
  0xc9   :  { %v587_v58 = vadd.f32 %v586_v55, %v568_v54 }
  0xcb   :  { %v595_v60 = vmax.f32 %v587_v58, 0.0 }
  0xcd   :  { %600 = vst.msk [vmem:[%s1272_s4 + $0x8] sm:$0xff] %vm598_vm0, %v595_v60  ;;  %v603_v63 = vpack.c.bf16 %v595_v60, %v594_v50 }
  0xcf   :  { %v589_v2 = vpop.f32.mrf.mxu1  ;;  %906 = vmatmul.msk.bf16.vlgmr.msrb.gmra.mxu2 %vm598_vm0, %v603_v63  ;;  %v572_v6 = vpop.f32.mrf.mxu3 }
  0xd0   :  { %v590_v4 = vadd.f32 %v589_v2, %v571_v1  ;;  %v573_v8 = vadd.f32 %v572_v6, %v554_v7 }
  0xd2   :  { %v596_v5 = vmax.f32 %v590_v4, 0.0 }
  0xd4   :  { %601 = vst.msk [vmem:[%s1272_s4 + $0x10] sm:$0xff] %vm598_vm0, %v596_v5 }
  0xd7   :  { %v591_v9 = vpop.f32.mrf.mxu1 }
  0xd8   :  { %v592_v10 = vadd.f32 %v591_v9, %v573_v8 }
  0xda   :  { %v597_v11 = vmax.f32 %v592_v10, 0.0 }
  0xdc   :  { %602 = vst.msk [vmem:[%s1272_s4 + $0x18] sm:$0xff] %vm598_vm0, %v597_v11  ;;  %v604_v12 = vpack.c.bf16 %v597_v11, %v596_v5 }
  0xdf   :  { %907 = vmatmul.msk.bf16.gmra.mxu2 %vm598_vm0, %v604_v12 }
 0x152   :  { %v636_v13 = vpop.f32.mrf.mxu2 }
 0x153   :  { %646 = vst.msk [vmem:[%s1273_s5] sm:$0xff] %vm598_vm0, %v636_v13 }
 0x15a   :  { %v638_v14 = vpop.f32.mrf.mxu2 }
 0x15b   :  { %647 = vst.msk [vmem:[%s1273_s5 + $0x8] sm:$0xff] %vm598_vm0, %v638_v14 }
 0x162   :  { %v641_v15 = vpop.f32.mrf.mxu2 }
 0x163   :  { %648 = vst.msk [vmem:[%s1273_s5 + $0x10] sm:$0xff] %vm598_vm0, %v641_v15 }
 0x16a   :  { %v643_v16 = vpop.f32.mrf.mxu2 }
 0x16b   :  { %649 = vst.msk [vmem:[%s1273_s5 + $0x18] sm:$0xff] %vm598_vm0, %v643_v16 }

// kernel: seq2seq_forward.3
= control target key start
LH: loop header
LB: loop body
LE: loop exit
PB: predicated region body
PF: predicated region fallthrough
CT: control target
= control target key end

     0   :  { %s2954_s20 = smov [#allocation3]   ;;  %s4122_s0 = inlined_call_operand.vmem [shape: s32[7], index: 0, kind: input, shape index: {}]   ;;  %s4123_s1 = inlined_call_operand.vmem [shape: f32[2,16,32], index: 1, kind: input, shape index: {}]   ;;  %s4124_s2 = inlined_call_operand.vmem [shape: f32[2,16,32], index: 2, kind: input, shape index: {}]   ;;  %s4125_s3 = inlined_call_operand.vmem [shape: s32[2,8], index: 3, kind: input, shape index: {}]   ;;  %s4126_s4 = inlined_call_operand.vmem [shape: bf16[64,16], index: 4, kind: input, shape index: {}]   ;;  %s4127_s5 = inlined_call_operand.vmem [shape: f32[1,32], index: 5, kind: input, shape index: {}]   ;;  %s4128_s6 = inlined_call_operand.vmem [shape: f32[1,32], index: 6, kind: input, shape index: {}]   ;;  %s4129_s7 = inlined_call_operand.vmem [shape: bf16[112,256], index: 7, kind: input, shape index: {}]   ;;  %s4130_s8 = inlined_call_operand.vmem [shape: f32[1,256], index: 8, kind: input, shape index: {}]   ;;  %s4131_s9 = inlined_call_operand.vmem [shape: bf16[112,128], index: 9, kind: input, shape index: {}]   ;;  %s4132_s10 = inlined_call_operand.vmem [shape: f32[1,128], index: 10, kind: input, shape index: {}]   ;;  %s4133_s11 = inlined_call_operand.vmem [shape: f32[7,2,128], index: 11, kind: output, shape index: {}]  }
   0x1   :  { %s17_s19 = sshll.u32 %s4122_s0, 4  ;;  %s18_s19 = int_to_ptr.vmem [resolvable:$true] %s17_s19 }
   0x2   :  { %20 = dma.vmem_to_smem %s18_s19, 16, %s2954_s20, [#allocation2] }
   0x3   :  { %2952 = dma.done.wait [#allocation2], 16 }
   0x4   :  { %2953 = vsyncadd [#allocation2], 4294967280 }
   0x5   :  { %23 = sfence }
   0x6   :  { %v2690_v0 = vld [vmem:[%s4128_s6] ss:$0 sm:$0xff]  ;;  %v3041_v2 = vld [vmem:[%s4124_s2 + $0x8] sm:$0xff]  ;;  %v3046_v5 = vld [vmem:[%s4124_s2 + $0x10] sm:$0xff]  ;;  %vm166_vm0 = vcmask 261120   ;;  %v93_v25 = vlaneseq  ;;  %vm186_vm1 = vcmask 130112  }
   0x7   :  { %v3036_v1 = vld [vmem:[%s4124_s2] sm:$0xff]  ;;  %v147_v3 = vperm.slane %v2690_v0, 0  ;;  %v146_v4 = vrot.slane %v2690_v0, 1  ;;  %v3051_v6 = vld [vmem:[%s4124_s2 + $0x18] sm:$0xff]  ;;  %vm191_vm2 = vcmask 1041409   ;;  %vm194_vm3 = vcmask 123904  }
   0x8   :  { %v3060_v12 = vld [vmem:[%s4127_s5] ss:$0 sm:$0xff]  ;;  %v3070_v28 = vand.u32 127, %v93_v25  ;;  %v2955_v40 = vmov 0   ;;  %v3095_v57 = vld [vmem:[%s4126_s4 + $0x18] sm:$0xff]  ;;  %v3101_v58 = vld [vmem:[%s4126_s4 + $0x10] sm:$0xff] }
   0x9   :  { %v151_v7 = vadd.f32 %v147_v3, %v3036_v1  ;;  %v148_v8 = vperm.slane %v146_v4, 0  ;;  %v152_v9 = vadd.f32 %v147_v3, %v3041_v2  ;;  %2677 = vset.pattern.permute.xlu1 %v2955_v40  ;;  %2676 = vset.pattern.permute.xlu0 %v2955_v40  ;;  %v3089_v56 = vld [vmem:[%s4125_s3] sm:$0x3]  ;;  %v3107_v59 = vld [vmem:[%s4126_s4 + $0x8] sm:$0xff]  ;;  %v2956_v0 = vmov 0.0   ;;  %s2957_s22 = smov 96  }
   0xa   :  { %v3073_v29 = vadd.s32 4294967288, %v3070_v28  ;;  %2675 = vset.pattern.permute.xlu2 %v2955_v40  ;;  %137 = vmatpush.bf16.msra.mxu0 %v3095_v57  ;;  %v3113_v60 = vld [vmem:[%s4126_s4] sm:$0xff]  ;;  %vm129_vm5 = vcmask 523264   ;;  %s2958_s18 = smov 16   ;;  %vm300_vm6 = vcmask 130048   ;;  %vm302_vm7 = vcmask 392192  }
   0xb   :  { %2693 = vtanh.f32 %v151_v7  ;;  %v153_v10 = vadd.f32 %v148_v8, %v3046_v5  ;;  %v154_v11 = vadd.f32 %v148_v8, %v3051_v6  ;;  %vm380_vm8 = vcmask 916480   ;;  %s2959_s28 = smov 64   ;;  %s2592_s23 = sld [smem:[#allocation3 + $0x1]] }
   0xc   :  { %2695 = vtanh.f32 %v152_v9  ;;  %s2601_s26 = sld [smem:[#allocation3 + $0x2]] }
   0xd   :  { %2697 = vtanh.f32 %v153_v10 }
   0xe   :  { %2699 = vtanh.f32 %v154_v11  ;;  %138 = vmatpush.bf16.msra.mxu0 %v3101_v58 }
  0x11   :  { %v2694_v13 = vpop.eup %2693  ;;  %p886_p1 = scmp.eq.s32.totalorder %s2592_s23, 1 }
  0x12   :  { %v2696_v14 = vpop.eup %2695  ;;  %v162_v15 = vmul.f32 %v2694_v13, %v3060_v12  ;;  %139 = vmatpush.bf16.msra.mxu0 %v3107_v59  ;;  %p1208_p2 = scmp.eq.s32.totalorder %s2601_s26, 1 }
  0x13   :  { %v2698_v16 = vpop.eup %2697  ;;  %v163_v21 = vmul.f32 %v2696_v14, %v3060_v12  ;;  %s887_s24 = scalar_select %p886_p1, 1, 0 }
  0x14   :  { %v167_v17 = vsel %vm166_vm0, %v162_v15, 0.0  ;;  %v164_v18 = vmul.f32 %v2698_v16, %v3060_v12  ;;  %v2700_v19 = vpop.eup %2699  ;;  %s1209_s0 = scalar_select %p1208_p2, 1, 0 }
  0x15   :  { %168 = vadd.xlane.f32.xlu0 %v167_v17  ;;  %v165_v22 = vmul.f32 %v2700_v19, %v3060_v12  ;;  %v170_v23 = vsel %vm166_vm0, %v163_v21, 0.0 }
  0x16   :  { %v173_v20 = vsel %vm166_vm0, %v164_v18, 0.0  ;;  %140 = vmatpush.bf16.msra.mxu0 %v3113_v60 }
  0x17   :  { %174 = vadd.xlane.f32.xlu1 %v173_v20  ;;  %v176_v24 = vsel %vm166_vm0, %v165_v22, 0.0 }
  0x1a   :  { %583 = vmatpush.bf16.msrb.mxu0 %v3095_v57 }
  0x1d   :  { %171 = vadd.xlane.f32.xlu0 %v170_v23 }
  0x1e   :  { %584 = vmatpush.bf16.msrb.mxu0 %v3101_v58 }
  0x1f   :  { %177 = vadd.xlane.f32.xlu1 %v176_v24 }
  0x22   :  { %585 = vmatpush.bf16.msrb.mxu0 %v3107_v59 }
  0x26   :  { %586 = vmatpush.bf16.msrb.mxu0 %v3113_v60 }
  0x88   :  { %v169_v26 = vpop.xlane.xlu0 %168 }
  0x89   :  { %v183_v33 = vperm.slane %v169_v26, %v3070_v28 }
  0x8a   :  { %v175_v27 = vpop.xlane.xlu1 %174 }
  0x8b   :  { %v188_v34 = vperm.slane %v175_v27, %v3070_v28 }
  0x90   :  { %v172_v30 = vpop.xlane.xlu0 %171 }
  0x91   :  { %v185_v31 = vperm.slane %v172_v30, %v3073_v29 }
  0x92   :  { %v178_v32 = vpop.xlane.xlu1 %177 }
  0x93   :  { %v189_v35 = vperm.slane %v178_v32, %v3073_v29  ;;  %v187_v36 = vsel %vm186_vm1, %v185_v31, %v183_v33  ;;  %v3142_v31 = vld [vmem:[%s4123_s1] sm:$0xff]  ;;  %v2654_v33 = vld [vmem:[%s4129_s7 + $0x64] sm:$0xf0] }
  0x95   :  { %v190_v37 = vsel %vm186_vm1, %v189_v35, %v188_v34  ;;  %v2653_v34 = vld [vmem:[%s4129_s7 + $0x64] sm:$0xf] }
  0x96   :  { %v192_v38 = vsel %vm191_vm2, %v190_v37, %v187_v36  ;;  %v2547_v36 = vld [vmem:[%s4129_s7 + $0x68] sm:$0xf0]  ;;  %v2537_v37 = vld [vmem:[%s4129_s7 + $0x50] sm:$0xf] }
  0x97   :  { %v195_v39 = vsel %vm194_vm3, %v192_v38, -inf  ;;  %v2652_v38 = vld [vmem:[%s4129_s7 + $0x54] sm:$0xf0] }
  0x98   :  { %196 = vmax.xlane.f32.xlu2 %v195_v39  ;;  %v3164_v39 = vor.u32 %v2653_v34, %v2547_v36  ;;  %v2643_v36 = vld [vmem:[%s4129_s7 + $0x14] sm:$0xf] }
  0x9a   :  { %398 = vmatpush.bf16.msra.mxu2 %v3164_v39 }
 0x10b   :  { %v197_v41 = vpop.xlane.xlu2 %196 }
 0x10c   :  { %v199_v42 = vperm.slane %v197_v41, 0  ;;  %v200_v43 = vperm.slane %v197_v41, 1  ;;  %v2651_v41 = vld [vmem:[%s4129_s7 + $0x54] sm:$0xf] }
 0x10e   :  { %v203_v44 = vsub.f32 %v169_v26, %v199_v42  ;;  %v204_v45 = vsub.f32 %v172_v30, %v199_v42  ;;  %v205_v46 = vsub.f32 %v175_v27, %v200_v43  ;;  %v206_v50 = vsub.f32 %v178_v32, %v200_v43  ;;  %v2545_v32 = vld [vmem:[%s4129_s7 + $0x60] sm:$0xf]  ;;  %v2539_v42 = vld [vmem:[%s4129_s7 + $0x58] sm:$0xf0]  ;;  %v3175_v43 = vld [vmem:[%s4123_s1 + $0x8] sm:$0xff] }
 0x10f   :  { %v3153_v35 = vor.u32 %v2654_v33, %v2545_v32  ;;  %v2644_v32 = vld [vmem:[%s4129_s7 + $0x14] sm:$0xf0] }
 0x110   :  { %v207_v47 = vmul.f32 1.442695, %v203_v44  ;;  %v209_v48 = vmul.f32 1.442695, %v204_v45  ;;  %v211_v49 = vmul.f32 1.442695, %v205_v46  ;;  %v3178_v44 = vor.u32 %v2652_v38, %v2537_v37 }
 0x111   :  { %v213_v51 = vmul.f32 1.442695, %v206_v50  ;;  %385 = vmatpush.bf16.msra.mxu1 %v3153_v35  ;;  %v3182_v46 = vor.u32 %v2651_v41, %v2539_v42  ;;  %v2649_v50 = vld [vmem:[%s4129_s7 + $0x44] sm:$0xf]  ;;  %v2507_v37 = vld [vmem:[%s4129_s7 + $0x18] sm:$0xf0] }
 0x112   :  { %2701 = vpow2.f32 %v207_v47  ;;  %v2529_v47 = vld [vmem:[%s4129_s7 + $0x40] sm:$0xf]  ;;  %v3271_v42 = vor.u32 %v2643_v36, %v2507_v37 }
 0x113   :  { %2703 = vpow2.f32 %v209_v48  ;;  %v2650_v48 = vld [vmem:[%s4129_s7 + $0x44] sm:$0xf0]  ;;  %399 = vmatpush.bf16.msra.mxu2 %v3182_v46 }
 0x114   :  { %2705 = vpow2.f32 %v211_v49 }
 0x115   :  { %2707 = vpow2.f32 %v213_v51  ;;  %v2531_v51 = vld [vmem:[%s4129_s7 + $0x48] sm:$0xf0]  ;;  %386 = vmatpush.bf16.msra.mxu1 %v3178_v44 }
 0x118   :  { %v2702_v52 = vpop.eup %2701 }
 0x119   :  { %v2704_v53 = vpop.eup %2703  ;;  %220 = vperm.xlu2 %2675, %v2702_v52  }
 0x11a   :  { %v2706_v54 = vpop.eup %2705  ;;  %223 = vperm.xlu0 %2676, %v2704_v53  }
 0x11b   :  { %226 = vperm.xlu1 %2677, %v2706_v54   ;;  %v2708_v55 = vpop.eup %2707 }
 0x121   :  { %229 = vperm.xlu2 %2675, %v2708_v55  }
 0x129   :  { %99 = vperm.xlu2 %2675, %v3089_v56  }
 0x173   :  { %v221_v61 = vpop.permute.xlu2 %220 }
 0x174   :  { %v231_v8 = vperm.slane %v221_v61, %v3070_v28  ;;  %v3203_v61 = vor.u32 %v2649_v50, %v2531_v51 }
 0x176   :  { %400 = vmatpush.bf16.msra.mxu2 %v3203_v61 }
 0x17b   :  { %v230_v62 = vpop.permute.xlu2 %229 }
 0x17c   :  { %v235_v11 = vperm.slane %v230_v62, %v3073_v29  ;;  %v2521_v62 = vld [vmem:[%s4129_s7 + $0x30] sm:$0xf] }
 0x183   :  { %v100_v63 = vpop.permute.xlu2 %99 }
 0x184   :  { %vm101_vm4 = vcmp.eq.s32.totalorder %v3070_v28, %v100_v63  ;;  %v2648_v63 = vld [vmem:[%s4129_s7 + $0x34] sm:$0xf0] }
 0x185   :  { %v2477_v3 = vsel %vm101_vm4, 1.0, %v2956_v0 }
 0x186   :  { %v104_v4 = vpack.c.bf16 %v2477_v3, %v2477_v3 }
 0x188   :  { %2494 = vmatmul.msk.bf16.vlgmr.msra.gmra.mxu0 %vm129_vm5, %v104_v4  ;;  %v3214_v4 = vld [vmem:[%s4123_s1 + $0x10] sm:$0xff] }
 0x189   :  { %905 = vmatpush.bf16.msra.mxu0 %v3095_v57 }
 0x18c   :  { %v224_v7 = vpop.permute.xlu0 %223 }
 0x18d   :  { %v227_v9 = vpop.permute.xlu1 %226  ;;  %v232_v10 = vperm.slane %v224_v7, %v3073_v29  ;;  %906 = vmatpush.bf16.msra.mxu0 %v3101_v58 }
 0x18e   :  { %v234_v13 = vperm.slane %v227_v9, %v3070_v28  ;;  %v2523_v9 = vld [vmem:[%s4129_s7 + $0x38] sm:$0xf0] }
 0x18f   :  { %v233_v14 = vsel %vm186_vm1, %v232_v10, %v231_v8  ;;  %v2647_v8 = vld [vmem:[%s4129_s7 + $0x34] sm:$0xf] }
 0x190   :  { %v236_v15 = vsel %vm186_vm1, %v235_v11, %v234_v13  ;;  %v3225_v11 = vld [vmem:[%s4123_s1 + $0x18] sm:$0xff]  ;;  %v3228_v13 = vor.u32 %v2648_v63, %v2521_v62  ;;  %v2497_v62 = vld [vmem:[%s4129_s7] sm:$0xf]  ;;  %v2642_v63 = vld [vmem:[%s4129_s7 + $0x4] sm:$0xf0] }
 0x191   :  { %v237_v16 = vsel %vm191_vm2, %v236_v15, %v233_v14  ;;  %907 = vmatpush.bf16.msra.mxu0 %v3107_v59  ;;  %v3232_v15 = vor.u32 %v2647_v8, %v2523_v9  ;;  %v2499_v8 = vld [vmem:[%s4129_s7 + $0x8] sm:$0xf0] }
 0x192   :  { %v239_v17 = vsel %vm194_vm3, %v237_v16, 0.0  ;;  %v2513_v16 = vld [vmem:[%s4129_s7 + $0x20] sm:$0xf] }
 0x193   :  { %240 = vadd.xlane.f32.xlu1 %v239_v17  ;;  %v2646_v17 = vld [vmem:[%s4129_s7 + $0x24] sm:$0xf0]  ;;  %401 = vmatpush.bf16.msra.mxu2 %v3232_v15 }
 0x195   :  { %908 = vmatpush.bf16.msra.mxu0 %v3113_v60 }
 0x205   :  { %v3135_v18 = vpop.f32.mrf.mxu0 }
 0x206   :  { %v241_v19 = vpop.xlane.xlu1 %240  ;;  %470 = vrot.lane.b32.xlu1 %v3135_v18, %s2957_s22 }
 0x207   :  { %2709 = vrcp.f32 %v241_v19 }
 0x20d   :  { %v2710_v20 = vpop.eup %2709  ;;  %v144_v21 = vpop.f32.mrf.mxu0 }
 0x20e   :  { %v244_v22 = vperm.slane %v2710_v20, 0  ;;  %v245_v25 = vperm.slane %v2710_v20, 1  ;;  %v2645_v21 = vld [vmem:[%s4129_s7 + $0x24] sm:$0xf] }
 0x210   :  { %v249_v23 = vmul.f32 %v2704_v53, %v244_v22  ;;  %v248_v24 = vmul.f32 %v2702_v52, %v244_v22  ;;  %v251_v26 = vmul.f32 %v2708_v55, %v245_v25  ;;  %v250_v27 = vmul.f32 %v2706_v54, %v245_v25  ;;  %v2515_v22 = vld [vmem:[%s4129_s7 + $0x28] sm:$0xf0] }
 0x211   :  { %v3198_v53 = vor.u32 %v2650_v48, %v2529_v47 }
 0x212   :  { %259 = vperm.xlu0 %2676, %v249_v23   ;;  %254 = vperm.xlu2 %2675, %v248_v24   ;;  %v3248_v24 = vor.u32 %v2646_v17, %v2513_v16 }
 0x213   :  { %387 = vmatpush.bf16.msra.mxu1 %v3198_v53 }
 0x217   :  { %388 = vmatpush.bf16.msra.mxu1 %v3228_v13 }
 0x21a   :  { %269 = vperm.xlu0 %2676, %v251_v26   ;;  %264 = vperm.xlu2 %2675, %v250_v27   ;;  %v3253_v27 = vor.u32 %v2645_v21, %v2515_v22 }
 0x21b   :  { %389 = vmatpush.bf16.msra.mxu1 %v3248_v24 }
 0x21c   :  { %402 = vmatpush.bf16.msra.mxu2 %v3253_v27 }
 0x220   :  { %403 = vmatpush.bf16.msra.mxu2 %v3271_v42 }
 0x26c   :  { %v255_v30 = vpop.permute.xlu2 %254 }
 0x26d   :  { %v272_v45 = vmul.f32 %v255_v30, %v3142_v31  ;;  %v2505_v30 = vld [vmem:[%s4129_s7 + $0x10] sm:$0xf] }
 0x26e   :  { %v3268_v41 = vor.u32 %v2644_v32, %v2505_v30 }
 0x26f   :  { %v276_v54 = vsel %vm166_vm0, %v272_v45, 0.0 }
 0x270   :  { %390 = vmatpush.bf16.msra.mxu1 %v3268_v41 }
 0x274   :  { %v265_v3 = vpop.permute.xlu2 %264 }
 0x275   :  { %v274_v14 = vmul.f32 %v265_v3, %v3214_v4  ;;  %v2641_v3 = vld [vmem:[%s4129_s7 + $0x4] sm:$0xf]  ;;  %s563_s7 = sld [smem:[#allocation3]] }
 0x276   :  { %v3294_v9 = vor.u32 %v2641_v3, %v2499_v8  ;;  %v3340_v3 = vld [vmem:[%s4131_s9 + $0x30] sm:$0xff]  ;;  %v3346_v8 = vld [vmem:[%s4131_s9 + $0x28] sm:$0xff] }
 0x277   :  { %v285_v25 = vsel %vm166_vm0, %v274_v14, 0.0  ;;  %526 = vmatpush.bf16.msra.mxu3 %v3340_v3 }
 0x278   :  { %404 = vmatpush.bf16.msra.mxu2 %v3294_v9 }
 0x27b   :  { %527 = vmatpush.bf16.msra.mxu3 %v3346_v8  ;;  %p564_p0 = scmp.eq.s32.totalorder %s563_s7, 1 }
 0x27c   :  { %767 = vmatpush.bf16.msrb.mxu2 %v3164_v39 }
 0x27d   :  { %s565_s27 = scalar_select %p564_p0, 1, 0 }
 0x280   :  { %768 = vmatpush.bf16.msrb.mxu2 %v3182_v46 }
 0x284   :  { %v260_v49 = vpop.permute.xlu0 %259  ;;  %769 = vmatpush.bf16.msrb.mxu2 %v3203_v61 }
 0x285   :  { %v273_v52 = vmul.f32 %v260_v49, %v3175_v43 }
 0x287   :  { %v277_v55 = vsel %vm166_vm0, %v273_v52, 0.0 }
 0x288   :  { %v278_v7 = vadd.f32 %v277_v55, %v276_v54  ;;  %770 = vmatpush.bf16.msrb.mxu2 %v3232_v15 }
 0x28a   :  { %v279_v10 = vrot.slane %v278_v7, 4 }
 0x28c   :  { %v280_v19 = vadd.f32 %v279_v10, %v278_v7  ;;  %v270_v20 = vpop.permute.xlu0 %269  ;;  %v3289_v7 = vor.u32 %v2642_v63, %v2497_v62  ;;  %771 = vmatpush.bf16.msrb.mxu2 %v3253_v27 }
 0x28d   :  { %v275_v23 = vmul.f32 %v270_v20, %v3225_v11 }
 0x28e   :  { %v281_v33 = vrot.slane %v280_v19, 2  ;;  %391 = vmatpush.bf16.msra.mxu1 %v3289_v7 }
 0x28f   :  { %v286_v26 = vsel %vm166_vm0, %v275_v23, 0.0 }
 0x290   :  { %v287_v34 = vadd.f32 %v286_v26, %v285_v25  ;;  %v282_v47 = vadd.f32 %v281_v33, %v280_v19  ;;  %772 = vmatpush.bf16.msrb.mxu2 %v3271_v42  ;;  %v77_v19 = vld [vmem:[%s4130_s8] sm:$0x3]  ;;  %s2961_s8 = smov 48  }
 0x291   :  { %v3327_v20 = vperm.slane %v77_v19, 1  ;;  %v3331_v30 = vperm.slane %v77_v19, 0 }
 0x292   :  { %v288_v38 = vrot.slane %v287_v34, 4  ;;  %v283_v49 = vrot.slane %v282_v47, 1  ;;  %754 = vmatpush.bf16.msrb.mxu1 %v3153_v35 }
 0x294   :  { %v289_v45 = vadd.f32 %v288_v38, %v287_v34  ;;  %v284_v52 = vadd.f32 %v283_v49, %v282_v47  ;;  %773 = vmatpush.bf16.msrb.mxu2 %v3294_v9 }
 0x296   :  { %v290_v48 = vrot.slane %v289_v45, 2  ;;  %755 = vmatpush.bf16.msrb.mxu1 %v3178_v44 }
 0x298   :  { %v291_v50 = vadd.f32 %v290_v48, %v289_v45 }
 0x29a   :  { %v292_v51 = vrot.slane %v291_v50, 1  ;;  %756 = vmatpush.bf16.msrb.mxu1 %v3198_v53 }
 0x29c   :  { %v293_v54 = vadd.f32 %v292_v51, %v291_v50 }
 0x29e   :  { %v3276_v55 = vsel %vm191_vm2, %v293_v54, %v284_v52  ;;  %757 = vmatpush.bf16.msrb.mxu1 %v3228_v13 }
 0x29f   :  { %297 = vrot.lane.b32.xlu2 %v3276_v55, %s2958_s18 }
 0x2a2   :  { %758 = vmatpush.bf16.msrb.mxu1 %v3248_v24 }
 0x2a6   :  { %759 = vmatpush.bf16.msrb.mxu1 %v3268_v41 }
 0x2aa   :  { %760 = vmatpush.bf16.msrb.mxu1 %v3289_v7 }
 0x2f9   :  { %v298_v10 = vpop.permute.xlu2 %297 }
 0x2fa   :  { %v301_v14 = vsel %vm300_vm6, %v3135_v18, %v298_v10  ;;  %v3360_v10 = vld [vmem:[%s4131_s9 + $0x18] sm:$0xff] }
 0x2fb   :  { %v303_v16 = vsel %vm302_vm7, %v301_v14, 0.0  ;;  %v3367_v14 = vld [vmem:[%s4131_s9 + $0x10] sm:$0xff] }
 0x2fc   :  { %v304_v17 = vpack.c.bf16 %v303_v16, %v303_v16  ;;  %v3374_v16 = vld [vmem:[%s4131_s9 + $0x8] sm:$0xff] }
 0x2fe   :  { %2551 = vmatmul.msk.bf16.vlgmr.msra.gmra.mxu1 %vm380_vm8, %v304_v17  ;;  %2552 = vmatmul.msk.bf16.vlgmr.msra.gmra.mxu2 %vm380_vm8, %v304_v17 }
 0x2ff   :  { %1089 = vmatpush.bf16.msra.mxu1 %v3164_v39  ;;  %1171 = vmatpush.bf16.msra.mxu2 %v3340_v3 }
 0x303   :  { %1090 = vmatpush.bf16.msra.mxu1 %v3182_v46  ;;  %1172 = vmatpush.bf16.msra.mxu2 %v3346_v8 }
 0x307   :  { %1091 = vmatpush.bf16.msra.mxu1 %v3203_v61 }
 0x30b   :  { %1092 = vmatpush.bf16.msra.mxu1 %v3232_v15 }
 0x30f   :  { %1093 = vmatpush.bf16.msra.mxu1 %v3253_v27 }
 0x313   :  { %1094 = vmatpush.bf16.msra.mxu1 %v3271_v42 }
 0x317   :  { %1095 = vmatpush.bf16.msra.mxu1 %v3294_v9 }
 0x37b   :  { %v393_v18 = vpop.f32.mrf.mxu1 }
 0x37c   :  { %v394_v32 = vadd.f32 %v393_v18, %v3331_v30 }
 0x37e   :  { %v2553_v33 = vmul.f32 -1.442695, %v394_v32  ;;  %v3386_v32 = vld [vmem:[%s4131_s9] sm:$0xff] }
 0x381   :  { %v406_v21 = vpop.f32.mrf.mxu2 }
 0x382   :  { %v407_v22 = vadd.f32 %v406_v21, %v3327_v20 }
 0x383   :  { %v395_v23 = vpop.f32.mrf.mxu1 }
 0x384   :  { %2711 = vtanh.f32 %v407_v22  ;;  %v2554_v23 = vmul.f32 -1.442695, %v407_v22 }
 0x385   :  { %2713 = vpow2.f32 %v2553_v33 }
 0x389   :  { %v408_v25 = vpop.f32.mrf.mxu2 }
 0x38a   :  { %v2712_v26 = vpop.eup %2711 }
 0x38b   :  { %451 = vrot.lane.b32.xlu0 %v2712_v26, %s2959_s28  ;;  %v2714_v34 = vpop.eup %2713 }
 0x38c   :  { %v416_v36 = vadd.f32 1.0, %v2714_v34 }
 0x38e   :  { %2715 = vrcp.f32 %v416_v36  ;;  %v429_v49 = vand.u32 2147483648, %v416_v36  ;;  %vm423_vm10 = vweird.f32 %v416_v36  ;;  %v427_v50 = vand.u32 2147483647, %v416_v36 }
 0x390   :  { %v430_v52 = vor.u32 1.1754944e-38, %v429_v49  ;;  %vm428_vm12 = vcmp.eq.f32.partialorder %v427_v50, 8.507059e+37 }
 0x394   :  { %v2716_v37 = vpop.eup %2715 }
 0x395   :  { %v419_v38 = vmul.f32 %v2716_v37, %v416_v36  ;;  %vm424_vm9 = vweird.f32 %v2716_v37 }
 0x396   :  { %vm425_vm11 = vmor %vm423_vm10, %vm424_vm9  ;;  %vm474_vm9 = vcmask 785408   ;;  %vm539_vm10 = vcmp.lt.s32.totalorder %v3070_v28, 64 }
 0x397   :  { %v420_v45 = vsub.f32 1.0, %v419_v38 }
 0x399   :  { %v421_v47 = vmul.f32 %v2716_v37, %v420_v45 }
 0x39b   :  { %v422_v48 = vadd.f32 %v2716_v37, %v421_v47 }
 0x39d   :  { %v426_v51 = vsel %vm425_vm11, %v2716_v37, %v422_v48  ;;  %vm541_vm11 = vcmask 1041408  }
 0x39e   :  { %v431_v62 = vsel %vm428_vm12, %v430_v52, %v426_v51 }
 0x39f   :  { %v449_v17 = vmul.f32 0.0, %v431_v62 }
 0x3fd   :  { %v452_v54 = vpop.permute.xlu0 %451 }
 0x3fe   :  { %v454_v63 = vmul.f32 %v452_v54, %v431_v62  ;;  %v471_v54 = vpop.permute.xlu1 %470 }
 0x400   :  { %456 = vrot.lane.b32.xlu2 %v454_v63, %s2959_s28 }
 0x408   :  { %466 = vrot.lane.b32.xlu2 %v3276_v55, %s2959_s28  ;;  %v3353_v55 = vld [vmem:[%s4131_s9 + $0x20] sm:$0xff] }
 0x409   :  { %528 = vmatpush.bf16.msra.mxu3 %v3353_v55  ;;  %1173 = vmatpush.bf16.msra.mxu2 %v3353_v55 }
 0x40d   :  { %529 = vmatpush.bf16.msra.mxu3 %v3360_v10  ;;  %1174 = vmatpush.bf16.msra.mxu2 %v3360_v10 }
 0x411   :  { %530 = vmatpush.bf16.msra.mxu3 %v3367_v14  ;;  %1175 = vmatpush.bf16.msra.mxu2 %v3367_v14 }
 0x415   :  { %531 = vmatpush.bf16.msra.mxu3 %v3374_v16  ;;  %1176 = vmatpush.bf16.msra.mxu2 %v3374_v16 }
 0x419   :  { %532 = vmatpush.bf16.msra.mxu3 %v3386_v32  ;;  %1177 = vmatpush.bf16.msra.mxu2 %v3386_v32 }
 0x41d   :  { %849 = vmatpush.bf16.msrb.mxu3 %v3340_v3 }
 0x421   :  { %850 = vmatpush.bf16.msrb.mxu3 %v3346_v8 }
 0x425   :  { %851 = vmatpush.bf16.msrb.mxu3 %v3353_v55 }
 0x429   :  { %852 = vmatpush.bf16.msrb.mxu3 %v3360_v10 }
 0x42d   :  { %853 = vmatpush.bf16.msrb.mxu3 %v3367_v14 }
 0x431   :  { %854 = vmatpush.bf16.msrb.mxu3 %v3374_v16 }
 0x435   :  { %855 = vmatpush.bf16.msrb.mxu3 %v3386_v32 }
 0x45a   :  { %v457_v18 = vpop.permute.xlu2 %456 }
 0x45b   :  { %v3379_v19 = vadd.f32 %v457_v18, %v449_v17  ;;  %v3410_v18 = vld [vmem:[%s4132_s10] ss:$0 sm:$0xff] }
 0x45d   :  { %2717 = vtanh.f32 %v3379_v19 }
 0x45e   :  { %2719 = vpow2.f32 %v2554_v23 }
 0x462   :  { %v467_v52 = vpop.permute.xlu2 %466 }
 0x463   :  { %v2718_v21 = vpop.eup %2717 }
 0x464   :  { %462 = vrot.lane.b32.xlu0 %v2718_v21, %s2959_s28  ;;  %v2720_v25 = vpop.eup %2719 }
 0x465   :  { %v417_v26 = vadd.f32 1.0, %v2720_v25 }
 0x467   :  { %2721 = vrcp.f32 %v417_v26  ;;  %v444_v38 = vand.u32 2147483648, %v417_v26  ;;  %vm438_vm14 = vweird.f32 %v417_v26  ;;  %v442_v45 = vand.u32 2147483647, %v417_v26 }
 0x469   :  { %v445_v48 = vor.u32 1.1754944e-38, %v444_v38  ;;  %vm443_vm4 = vcmp.eq.f32.partialorder %v442_v45, 8.507059e+37 }
 0x46d   :  { %v2722_v33 = vpop.eup %2721 }
 0x46e   :  { %v434_v34 = vmul.f32 %v2722_v33, %v417_v26  ;;  %vm439_vm13 = vweird.f32 %v2722_v33 }
 0x46f   :  { %vm440_vm15 = vmor %vm438_vm14, %vm439_vm13 }
 0x470   :  { %v435_v22 = vsub.f32 1.0, %v434_v34 }
 0x472   :  { %v436_v36 = vmul.f32 %v2722_v33, %v435_v22 }
 0x474   :  { %v437_v37 = vadd.f32 %v2722_v33, %v436_v36 }
 0x476   :  { %v441_v47 = vsel %vm440_vm15, %v2722_v33, %v437_v37 }
 0x477   :  { %v446_v49 = vsel %vm443_vm4, %v445_v48, %v441_v47 }
 0x4d6   :  { %v463_v50 = vpop.permute.xlu0 %462 }
 0x4d7   :  { %v3397_v51 = vmul.f32 %v463_v50, %v446_v49 }
 0x4d9   :  { %v473_v62 = vsel %vm129_vm5, %v3397_v51, %v467_v52 }
 0x4da   :  { %v475_v63 = vsel %vm474_vm9, %v473_v62, %v471_v54 }
 0x4db   :  { %v476_v17 = vpack.c.bf16 %v475_v63, %v475_v63 }
 0x4dd   :  { %2583 = vmatmul.msk.bf16.vlgmr.msra.gmra.mxu3 %vm380_vm8, %v476_v17 }
 0x4de   :  { %1227 = vmatpush.bf16.msra.mxu3 %v3095_v57 }
 0x4e2   :  { %1228 = vmatpush.bf16.msra.mxu3 %v3101_v58 }
 0x4e6   :  { %1229 = vmatpush.bf16.msra.mxu3 %v3107_v59 }
 0x4ea   :  { %1230 = vmatpush.bf16.msra.mxu3 %v3113_v60 }
 0x560   :  { %v534_v21 = vpop.f32.mrf.mxu3 }
 0x561   :  { %v535_v23 = vadd.f32 %v3410_v18, %v534_v21 }
 0x563   :  { %538 = vst [vmem:[%s4133_s11] sm:$0x3] %v535_v23  ;;  %v594_v25 = vperm.slane %v535_v23, 0  ;;  %v593_v26 = vrot.slane %v535_v23, 1  ;;  %v540_v22 = vsel %vm539_vm10, %v535_v23, -inf }
 0x564   :  { %v542_v36 = vsel %vm541_vm11, %v540_v22, -inf }
 0x565   :  { %596 = vrot.lane.b32.xlu0 %v594_v25, %s2959_s28  ;;  %v595_v33 = vperm.slane %v593_v26, 0 }
 0x567   :  { %598 = vrot.lane.b32.xlu2 %v595_v33, %s2959_s28 }
 0x568   :  { %v536_v34 = vpop.f32.mrf.mxu3 }
 0x58f   :  { %543 = vmax.xlane.f32.xlu0 %v542_v36 }
 0x5c1   :  { %v599_v37 = vpop.permute.xlu2 %598 }
 0x5c2   :  { %v605_v38 = vadd.f32 %v599_v37, %v3051_v6  ;;  %v604_v54 = vadd.f32 %v599_v37, %v3046_v5 }
 0x5c4   :  { %2723 = vtanh.f32 %v605_v38 }
 0x5ca   :  { %v2724_v45 = vpop.eup %2723 }
 0x5cb   :  { %v613_v47 = vmul.f32 %v2724_v45, %v3060_v12 }
 0x5cd   :  { %v623_v48 = vsel %vm166_vm0, %v613_v47, 0.0 }
 0x5ce   :  { %624 = vadd.xlane.f32.xlu0 %v623_v48 }
 0x5d7   :  { %v597_v49 = vpop.permute.xlu0 %596 }
 0x5d8   :  { %v602_v50 = vadd.f32 %v597_v49, %v3036_v1  ;;  %v603_v52 = vadd.f32 %v597_v49, %v3041_v2 }
 0x5da   :  { %2725 = vtanh.f32 %v602_v50 }
 0x5db   :  { %2727 = vtanh.f32 %v603_v52 }
 0x5dc   :  { %2729 = vtanh.f32 %v604_v54 }
 0x5e0   :  { %v2726_v62 = vpop.eup %2725 }
 0x5e1   :  { %v2728_v63 = vpop.eup %2727  ;;  %v610_v6 = vmul.f32 %v2726_v62, %v3060_v12 }
 0x5e2   :  { %v611_v17 = vmul.f32 %v2728_v63, %v3060_v12  ;;  %v2730_v23 = vpop.eup %2729 }
 0x5e3   :  { %v614_v21 = vsel %vm166_vm0, %v610_v6, 0.0  ;;  %v612_v1 = vmul.f32 %v2730_v23, %v3060_v12 }
 0x5e4   :  { %v617_v25 = vsel %vm166_vm0, %v611_v17, 0.0  ;;  %615 = vadd.xlane.f32.xlu2 %v614_v21 }
 0x5e5   :  { %618 = vadd.xlane.f32.xlu1 %v617_v25  ;;  %v620_v2 = vsel %vm166_vm0, %v612_v1, 0.0 }
 0x5ec   :  { %621 = vadd.xlane.f32.xlu2 %v620_v2 }
 0x602   :  { %v544_v5 = vpop.xlane.xlu0 %543 }
 0x603   :  { %vm545_vm12 = vcmp.eq.f32.partialorder %v540_v22, %v544_v5 }
 0x604   :  { %vm546_vm13 = vmand %vm545_vm12, %vm539_vm10 }
 0x605   :  { %v547_v26 = vsel %vm546_vm13, %v3070_v28, 128 }
 0x606   :  { %v548_v33 = vsel %vm541_vm11, %v547_v26, 2147483647 }
 0x607   :  { %v550_v34 = vshra.s32 %v548_v33, 16  ;;  %v549_v63 = vand.u32 65535, %v548_v33 }
 0x609   :  { %v552_v36 = vcvt.s32.f32 %v550_v34  ;;  %v551_v17 = vcvt.s32.f32 %v549_v63 }
 0x60b   :  { %553 = vmin.xlane.f32.xlu2 %v552_v36 }
 0x641   :  { %v625_v45 = vpop.xlane.xlu0 %624 }
 0x642   :  { %v634_v22 = vperm.slane %v625_v45, %v3073_v29 }
 0x657   :  { %v616_v37 = vpop.xlane.xlu2 %615 }
 0x658   :  { %v619_v38 = vpop.xlane.xlu1 %618  ;;  %v630_v47 = vperm.slane %v616_v37, %v3070_v28 }
 0x659   :  { %v631_v12 = vperm.slane %v619_v38, %v3073_v29 }
 0x65b   :  { %v632_v50 = vsel %vm186_vm1, %v631_v12, %v630_v47 }
 0x65f   :  { %v622_v48 = vpop.xlane.xlu2 %621 }
 0x660   :  { %v633_v49 = vperm.slane %v622_v48, %v3070_v28 }
 0x662   :  { %v635_v52 = vsel %vm186_vm1, %v634_v22, %v633_v49 }
 0x663   :  { %v636_v54 = vsel %vm191_vm2, %v635_v52, %v632_v50  ;;  %v566_v52 = vstv %s565_s27 }
 0x664   :  { %v638_v62 = vsel %vm194_vm3, %v636_v54, -inf  ;;  %vm567_vm15 = vcmp.eq.s32.totalorder %v566_v52, 1 }
 0x665   :  { %639 = vmax.xlane.f32.xlu0 %v638_v62 }
 0x67e   :  { %v554_v6 = vpop.xlane.xlu2 %553 }
 0x67f   :  { %vm555_vm14 = vcmp.eq.f32.partialorder %v552_v36, %v554_v6 }
 0x680   :  { %v556_v21 = vsel %vm555_vm14, %v551_v17, inf }
 0x681   :  { %557 = vmin.xlane.f32.xlu1 %v556_v21 }
 0x6d8   :  { %v640_v23 = vpop.xlane.xlu0 %639 }
 0x6d9   :  { %v642_v25 = vperm.slane %v640_v23, 0  ;;  %v643_v1 = vperm.slane %v640_v23, 1 }
 0x6db   :  { %v646_v2 = vsub.f32 %v616_v37, %v642_v25  ;;  %v647_v5 = vsub.f32 %v619_v38, %v642_v25  ;;  %v648_v26 = vsub.f32 %v622_v48, %v643_v1  ;;  %v649_v22 = vsub.f32 %v625_v45, %v643_v1 }
 0x6dc   :  { %v2960_v38 = vmov 1   ;;  %v560_v48 = vcvt.f32.s32 %v554_v6 }
 0x6dd   :  { %v650_v34 = vmul.f32 1.442695, %v646_v2  ;;  %v652_v12 = vmul.f32 1.442695, %v647_v5  ;;  %v654_v47 = vmul.f32 1.442695, %v648_v26 }
 0x6de   :  { %v656_v33 = vmul.f32 1.442695, %v649_v22  ;;  %v561_v54 = vshll.u32 %v560_v48, 16 }
 0x6df   :  { %2731 = vpow2.f32 %v650_v34 }
 0x6e0   :  { %2733 = vpow2.f32 %v652_v12 }
 0x6e1   :  { %2735 = vpow2.f32 %v654_v47 }
 0x6e2   :  { %2737 = vpow2.f32 %v656_v33 }
 0x6e5   :  { %v2732_v49 = vpop.eup %2731 }
 0x6e6   :  { %v2734_v50 = vpop.eup %2733  ;;  %663 = vperm.xlu2 %2675, %v2732_v49  }
 0x6e7   :  { %v2736_v36 = vpop.eup %2735  ;;  %666 = vperm.xlu0 %2676, %v2734_v50  }
 0x6e8   :  { %669 = vperm.xlu1 %2677, %v2736_v36   ;;  %v2738_v37 = vpop.eup %2737 }
 0x6ee   :  { %2678 = vset.pattern.permute.xlu2 %v2960_v38 }
 0x6ef   :  { %672 = vperm.xlu0 %2676, %v2738_v37  }
 0x6f4   :  { %v558_v45 = vpop.xlane.xlu1 %557 }
 0x6f5   :  { %v559_v62 = vcvt.f32.s32 %v558_v45 }
 0x6f7   :  { %v562_v63 = vadd.s32 %v561_v54, %v559_v62 }
 0x6f9   :  { %v568_v17 = vsel %vm567_vm15, %v3089_v56, %v562_v63 }
 0x6fa   :  { %570 = vperm.xlu2 %2678, %v568_v17  }
 0x702   :  { %2679 = vset.pattern.permute.xlu2 %v2955_v40 }
 0x740   :  { %v664_v21 = vpop.permute.xlu2 %663 }
 0x741   :  { %v674_v26 = vperm.slane %v664_v21, %v3070_v28 }
 0x754   :  { %v571_v23 = vpop.permute.xlu2 %570 }
 0x755   :  { %vm572_vm4 = vcmp.eq.s32.totalorder %v3070_v28, %v571_v23 }
 0x756   :  { %v2584_v25 = vsel %vm572_vm4, 1.0, %v2956_v0 }
 0x757   :  { %v575_v1 = vpack.c.bf16 %v2584_v25, %v2584_v25 }
 0x759   :  { %v667_v2 = vpop.permute.xlu0 %666  ;;  %2585 = vmatmul.msk.bf16.vlgmr.msrb.gmra.mxu0 %vm129_vm5, %v575_v1 }
 0x75a   :  { %1076 = vmatpush.bf16.msrb.mxu0 %v3153_v35  ;;  %v670_v6 = vpop.permute.xlu1 %669  ;;  %v675_v56 = vperm.slane %v667_v2, %v3073_v29 }
 0x75b   :  { %v677_v34 = vperm.slane %v670_v6, %v3070_v28 }
 0x75c   :  { %v676_v47 = vsel %vm186_vm1, %v675_v56, %v674_v26 }
 0x75e   :  { %1077 = vmatpush.bf16.msrb.mxu0 %v3178_v44 }
 0x761   :  { %v673_v5 = vpop.permute.xlu0 %672 }
 0x762   :  { %v678_v12 = vperm.slane %v673_v5, %v3073_v29  ;;  %1078 = vmatpush.bf16.msrb.mxu0 %v3198_v53 }
 0x764   :  { %v679_v22 = vsel %vm186_vm1, %v678_v12, %v677_v34 }
 0x765   :  { %v680_v33 = vsel %vm191_vm2, %v679_v22, %v676_v47 }
 0x766   :  { %v682_v38 = vsel %vm194_vm3, %v680_v33, 0.0  ;;  %1079 = vmatpush.bf16.msrb.mxu0 %v3228_v13 }
 0x767   :  { %683 = vadd.xlane.f32.xlu0 %v682_v38 }
 0x76a   :  { %1080 = vmatpush.bf16.msrb.mxu0 %v3248_v24 }
 0x76e   :  { %1081 = vmatpush.bf16.msrb.mxu0 %v3268_v41 }
 0x772   :  { %1082 = vmatpush.bf16.msrb.mxu0 %v3289_v7 }
 0x7d6   :  { %v3466_v48 = vpop.f32.mrf.mxu0 }
 0x7da   :  { %v684_v52 = vpop.xlane.xlu0 %683 }
 0x7db   :  { %2739 = vrcp.f32 %v684_v52 }
 0x7de   :  { %v590_v45 = vpop.f32.mrf.mxu0 }
 0x7e1   :  { %v2740_v54 = vpop.eup %2739 }
 0x7e2   :  { %v687_v62 = vperm.slane %v2740_v54, 0  ;;  %v688_v21 = vperm.slane %v2740_v54, 1 }
 0x7e4   :  { %v692_v63 = vmul.f32 %v2734_v50, %v687_v62  ;;  %v691_v17 = vmul.f32 %v2732_v49, %v687_v62  ;;  %v694_v23 = vmul.f32 %v2738_v37, %v688_v21  ;;  %v693_v25 = vmul.f32 %v2736_v36, %v688_v21 }
 0x7e6   :  { %702 = vperm.xlu2 %2679, %v692_v63   ;;  %697 = vperm.xlu1 %2677, %v691_v17  }
 0x7ee   :  { %712 = vperm.xlu2 %2679, %v694_v23   ;;  %707 = vperm.xlu1 %2677, %v693_v25  }
 0x7f6   :  { %744 = vrot.lane.b32.xlu2 %v3397_v51, %s2961_s8 }
 0x840   :  { %v703_v1 = vpop.permute.xlu2 %702 }
 0x841   :  { %v716_v2 = vmul.f32 %v703_v1, %v3175_v43 }
 0x843   :  { %v720_v50 = vsel %vm166_vm0, %v716_v2, 0.0 }
 0x848   :  { %v713_v5 = vpop.permute.xlu2 %712 }
 0x849   :  { %v718_v36 = vmul.f32 %v713_v5, %v3225_v11 }
 0x84b   :  { %v729_v51 = vsel %vm166_vm0, %v718_v36, 0.0 }
 0x850   :  { %v745_v23 = vpop.permute.xlu2 %744 }
 0x858   :  { %v698_v6 = vpop.permute.xlu1 %697 }
 0x859   :  { %v715_v56 = vmul.f32 %v698_v6, %v3142_v31 }
 0x85b   :  { %v719_v49 = vsel %vm166_vm0, %v715_v56, 0.0 }
 0x85c   :  { %v721_v26 = vadd.f32 %v720_v50, %v719_v49 }
 0x85e   :  { %v722_v37 = vrot.slane %v721_v26, 4 }
 0x860   :  { %v723_v34 = vadd.f32 %v722_v37, %v721_v26  ;;  %v708_v12 = vpop.permute.xlu1 %707 }
 0x861   :  { %v717_v47 = vmul.f32 %v708_v12, %v3214_v4 }
 0x862   :  { %v724_v22 = vrot.slane %v723_v34, 2 }
 0x863   :  { %v728_v43 = vsel %vm166_vm0, %v717_v47, 0.0 }
 0x864   :  { %v730_v33 = vadd.f32 %v729_v51, %v728_v43  ;;  %v725_v52 = vadd.f32 %v724_v22, %v723_v34 }
 0x866   :  { %v731_v31 = vrot.slane %v730_v33, 4  ;;  %v726_v54 = vrot.slane %v725_v52, 1 }
 0x868   :  { %v732_v38 = vadd.f32 %v731_v31, %v730_v33  ;;  %v727_v17 = vadd.f32 %v726_v54, %v725_v52 }
 0x86a   :  { %v733_v45 = vrot.slane %v732_v38, 2 }
 0x86c   :  { %v734_v62 = vadd.f32 %v733_v45, %v732_v38 }
 0x86e   :  { %v735_v63 = vrot.slane %v734_v62, 1 }
 0x870   :  { %v736_v21 = vadd.f32 %v735_v63, %v734_v62 }
 0x872   :  { %v739_v11 = vsel %vm191_vm2, %v736_v21, %v727_v17 }
 0x873   :  { %740 = vrot.lane.b32.xlu1 %v739_v11, %s2958_s18 }
 0x8e5   :  { %v741_v4 = vpop.permute.xlu1 %740 }
 0x8e6   :  { %v747_v25 = vsel %vm300_vm6, %v3466_v48, %v741_v4 }
 0x8e7   :  { %v748_v1 = vsel %vm302_vm7, %v747_v25, %v745_v23 }
 0x8e8   :  { %v749_v2 = vpack.c.bf16 %v748_v1, %v748_v1 }
 0x8ea   :  { %2586 = vmatmul.msk.bf16.vlgmr.msrb.gmra.mxu1 %vm380_vm8, %v749_v2  ;;  %2587 = vmatmul.msk.bf16.vlgmr.msrb.gmra.mxu2 %vm380_vm8, %v749_v2 }
 0x8eb   :  { %1493 = vmatpush.bf16.msrb.mxu1 %v3340_v3  ;;  %1549 = vmatpush.bf16.msrb.mxu2 %v3095_v57 }
 0x8ef   :  { %1494 = vmatpush.bf16.msrb.mxu1 %v3346_v8  ;;  %1550 = vmatpush.bf16.msrb.mxu2 %v3101_v58 }
 0x8f3   :  { %1495 = vmatpush.bf16.msrb.mxu1 %v3353_v55  ;;  %1551 = vmatpush.bf16.msrb.mxu2 %v3107_v59 }
 0x8f7   :  { %1496 = vmatpush.bf16.msrb.mxu1 %v3360_v10  ;;  %1552 = vmatpush.bf16.msrb.mxu2 %v3113_v60 }
 0x8fb   :  { %1497 = vmatpush.bf16.msrb.mxu1 %v3367_v14 }
 0x8ff   :  { %1498 = vmatpush.bf16.msrb.mxu1 %v3374_v16 }
 0x903   :  { %1499 = vmatpush.bf16.msrb.mxu1 %v3386_v32 }
 0x967   :  { %v762_v3 = vpop.f32.mrf.mxu1 }
 0x968   :  { %v763_v59 = vadd.f32 %v762_v3, %v3331_v30 }
 0x96a   :  { %v2588_v56 = vmul.f32 -1.442695, %v763_v59 }
 0x96d   :  { %v775_v57 = vpop.f32.mrf.mxu2 }
 0x96e   :  { %v776_v8 = vadd.f32 %v775_v57, %v3327_v20 }
 0x96f   :  { %v764_v6 = vpop.f32.mrf.mxu1 }
 0x970   :  { %2741 = vtanh.f32 %v776_v8  ;;  %v2589_v54 = vmul.f32 -1.442695, %v776_v8 }
 0x971   :  { %2743 = vpow2.f32 %v2588_v56 }
 0x975   :  { %v777_v58 = vpop.f32.mrf.mxu2 }
 0x976   :  { %v2742_v55 = vpop.eup %2741 }
 0x977   :  { %820 = vrot.lane.b32.xlu1 %v2742_v55, %s2959_s28  ;;  %v2744_v60 = vpop.eup %2743 }
 0x978   :  { %v785_v50 = vadd.f32 1.0, %v2744_v60 }
 0x97a   :  { %2745 = vrcp.f32 %v785_v50  ;;  %v798_v34 = vand.u32 2147483648, %v785_v50  ;;  %vm792_vm13 = vweird.f32 %v785_v50  ;;  %v796_v12 = vand.u32 2147483647, %v785_v50 }
 0x97c   :  { %v799_v51 = vor.u32 1.1754944e-38, %v798_v34  ;;  %vm797_vm15 = vcmp.eq.f32.partialorder %v796_v12, 8.507059e+37 }
 0x980   :  { %v2746_v49 = vpop.eup %2745 }
 0x981   :  { %v788_v5 = vmul.f32 %v2746_v49, %v785_v50  ;;  %vm793_vm12 = vweird.f32 %v2746_v49 }
 0x982   :  { %vm794_vm14 = vmor %vm792_vm13, %vm793_vm12 }
 0x983   :  { %v789_v26 = vsub.f32 1.0, %v788_v5 }
 0x985   :  { %v790_v37 = vmul.f32 %v2746_v49, %v789_v26 }
 0x987   :  { %v791_v36 = vadd.f32 %v2746_v49, %v790_v37 }
 0x989   :  { %v795_v47 = vsel %vm794_vm14, %v2746_v49, %v791_v36 }
 0x98a   :  { %v800_v22 = vsel %vm797_vm15, %v799_v51, %v795_v47  ;;  %v3539_v51 = vld [vmem:[%s4127_s5] ss:$0 sm:$0xff] }
 0x98b   :  { %v818_v31 = vmul.f32 %v800_v22, %v3379_v19 }
 0x9e9   :  { %v821_v43 = vpop.permute.xlu1 %820 }
 0x9ea   :  { %v823_v33 = vmul.f32 %v821_v43, %v800_v22 }
 0x9ec   :  { %825 = vrot.lane.b32.xlu2 %v823_v33, %s2959_s28 }
 0x9f4   :  { %835 = vrot.lane.b32.xlu2 %v739_v11, %s2959_s28 }
 0xa46   :  { %v826_v38 = vpop.permute.xlu2 %825 }
 0xa47   :  { %v3502_v52 = vadd.f32 %v826_v38, %v818_v31  ;;  %v3546_v31 = vld [vmem:[%s4124_s2] sm:$0xff] }
 0xa49   :  { %2747 = vtanh.f32 %v3502_v52 }
 0xa4a   :  { %2749 = vpow2.f32 %v2589_v54 }
 0xa4e   :  { %v836_v8 = vpop.permute.xlu2 %835 }
 0xa4f   :  { %v2748_v45 = vpop.eup %2747 }
 0xa50   :  { %831 = vrot.lane.b32.xlu1 %v2748_v45, %s2959_s28  ;;  %v2750_v62 = vpop.eup %2749  ;;  %v3552_v45 = vld [vmem:[%s4124_s2 + $0x8] sm:$0xff] }
 0xa51   :  { %v786_v63 = vadd.f32 1.0, %v2750_v62 }
 0xa53   :  { %2751 = vrcp.f32 %v786_v63  ;;  %v813_v23 = vand.u32 2147483648, %v786_v63  ;;  %vm807_vm12 = vweird.f32 %v786_v63  ;;  %v811_v25 = vand.u32 2147483647, %v786_v63 }
 0xa55   :  { %v814_v3 = vor.u32 1.1754944e-38, %v813_v23  ;;  %vm812_vm14 = vcmp.eq.f32.partialorder %v811_v25, 8.507059e+37 }
 0xa58   :  { %839 = vrot.lane.b32.xlu1 %v3466_v48, %s2957_s22 }
 0xa59   :  { %v2752_v17 = vpop.eup %2751 }
 0xa5a   :  { %v803_v21 = vmul.f32 %v2752_v17, %v786_v63  ;;  %vm808_vm4 = vweird.f32 %v2752_v17  ;;  %v3558_v63 = vld [vmem:[%s4124_s2 + $0x18] sm:$0xff] }
 0xa5b   :  { %vm809_vm13 = vmor %vm807_vm12, %vm808_vm4 }
 0xa5c   :  { %v804_v11 = vsub.f32 1.0, %v803_v21 }
 0xa5e   :  { %v805_v19 = vmul.f32 %v2752_v17, %v804_v11 }
 0xa60   :  { %v806_v4 = vadd.f32 %v2752_v17, %v805_v19 }
 0xa62   :  { %v810_v1 = vsel %vm809_vm13, %v2752_v17, %v806_v4 }
 0xa63   :  { %v815_v48 = vsel %vm812_vm14, %v814_v3, %v810_v1 }
 0xac2   :  { %v832_v2 = vpop.permute.xlu1 %831 }
 0xac3   :  { %v3508_v57 = vmul.f32 %v832_v2, %v815_v48 }
 0xac5   :  { %v842_v6 = vsel %vm129_vm5, %v3508_v57, %v836_v8 }
 0xaca   :  { %v840_v58 = vpop.permute.xlu1 %839 }
 0xacb   :  { %v843_v55 = vsel %vm474_vm9, %v842_v6, %v840_v58 }
 0xacc   :  { %v844_v59 = vpack.c.bf16 %v843_v55, %v843_v55 }
 0xace   :  { %2590 = vmatmul.msk.bf16.vlgmr.msrb.gmra.mxu3 %vm380_vm8, %v844_v59 }
 0xacf   :  { %1398 = vmatpush.bf16.msrb.mxu3 %v3153_v35 }
 0xad3   :  { %1399 = vmatpush.bf16.msrb.mxu3 %v3178_v44 }
 0xad7   :  { %1400 = vmatpush.bf16.msrb.mxu3 %v3198_v53 }
 0xadb   :  { %1401 = vmatpush.bf16.msrb.mxu3 %v3228_v13 }
 0xadf   :  { %1402 = vmatpush.bf16.msrb.mxu3 %v3248_v24 }
 0xae3   :  { %1403 = vmatpush.bf16.msrb.mxu3 %v3268_v41 }
 0xae7   :  { %1404 = vmatpush.bf16.msrb.mxu3 %v3289_v7 }
 0xb51   :  { %v857_v56 = vpop.f32.mrf.mxu3 }
 0xb52   :  { %v858_v60 = vadd.f32 %v3410_v18, %v857_v56  ;;  %v3533_v18 = vld [vmem:[%s4124_s2 + $0x10] sm:$0xff] }
 0xb54   :  { %2591 = vst [vmem:[%s4133_s11 + $0x2] sm:$0x3] %v858_v60  ;;  %v916_v50 = vperm.slane %v858_v60, 0  ;;  %v863_v49 = vsel %vm539_vm10, %v858_v60, -inf  ;;  %v915_v5 = vrot.slane %v858_v60, 1 }
 0xb55   :  { %v864_v26 = vsel %vm541_vm11, %v863_v49, -inf }
 0xb56   :  { %918 = vrot.lane.b32.xlu0 %v916_v50, %s2959_s28  ;;  %865 = vmax.xlane.f32.xlu1 %v864_v26  ;;  %v917_v37 = vperm.slane %v915_v5, 0 }
 0xb58   :  { %920 = vrot.lane.b32.xlu2 %v917_v37, %s2959_s28 }
 0xb59   :  { %v859_v36 = vpop.f32.mrf.mxu3 }
 0xbb2   :  { %v921_v34 = vpop.permute.xlu2 %920 }
 0xbb3   :  { %v926_v12 = vadd.f32 %v3533_v18, %v921_v34  ;;  %v927_v17 = vadd.f32 %v3558_v63, %v921_v34 }
 0xbb5   :  { %2753 = vtanh.f32 %v926_v12 }
 0xbbb   :  { %v2754_v47 = vpop.eup %2753 }
 0xbbc   :  { %v934_v43 = vmul.f32 %v3539_v51, %v2754_v47 }
 0xbbe   :  { %v942_v22 = vsel %vm166_vm0, %v934_v43, 0.0 }
 0xbbf   :  { %943 = vadd.xlane.f32.xlu1 %v942_v22 }
 0xbc8   :  { %v919_v33 = vpop.permute.xlu0 %918 }
 0xbc9   :  { %v924_v38 = vadd.f32 %v3546_v31, %v919_v33  ;;  %v925_v54 = vadd.f32 %v3552_v45, %v919_v33  ;;  %v866_v62 = vpop.xlane.xlu1 %865 }
 0xbca   :  { %vm867_vm15 = vcmp.eq.f32.partialorder %v863_v49, %v866_v62 }
 0xbcb   :  { %2755 = vtanh.f32 %v924_v38  ;;  %vm868_vm4 = vmand %vm867_vm15, %vm539_vm10 }
 0xbcc   :  { %2757 = vtanh.f32 %v925_v54  ;;  %v869_v21 = vsel %vm868_vm4, %v3070_v28, 128 }
 0xbcd   :  { %v870_v11 = vsel %vm541_vm11, %v869_v21, 2147483647  ;;  %2759 = vtanh.f32 %v927_v17 }
 0xbce   :  { %v872_v19 = vshra.s32 %v870_v11, 16  ;;  %v871_v59 = vand.u32 65535, %v870_v11 }
 0xbd0   :  { %v874_v4 = vcvt.s32.f32 %v872_v19  ;;  %v873_v60 = vcvt.s32.f32 %v871_v59 }
 0xbd1   :  { %v2756_v23 = vpop.eup %2755 }
 0xbd2   :  { %v2758_v25 = vpop.eup %2757  ;;  %875 = vmin.xlane.f32.xlu1 %v874_v4  ;;  %v932_v1 = vmul.f32 %v3539_v51, %v2756_v23 }
 0xbd3   :  { %v933_v2 = vmul.f32 %v3539_v51, %v2758_v25  ;;  %v2760_v48 = vpop.eup %2759 }
 0xbd4   :  { %v936_v3 = vsel %vm166_vm0, %v932_v1, 0.0  ;;  %v935_v6 = vmul.f32 %v3539_v51, %v2760_v48 }
 0xbd5   :  { %v939_v8 = vsel %vm166_vm0, %v933_v2, 0.0  ;;  %937 = vadd.xlane.f32.xlu2 %v936_v3 }
 0xbd6   :  { %940 = vadd.xlane.f32.xlu0 %v939_v8  ;;  %v945_v58 = vsel %vm166_vm0, %v935_v6, 0.0 }
 0xbdd   :  { %946 = vadd.xlane.f32.xlu2 %v945_v58 }
 0xc32   :  { %v944_v55 = vpop.xlane.xlu1 %943 }
 0xc33   :  { %v955_v34 = vperm.slane %v944_v55, %v3070_v28 }
 0xc45   :  { %v876_v56 = vpop.xlane.xlu1 %875 }
 0xc46   :  { %vm877_vm12 = vcmp.eq.f32.partialorder %v874_v4, %v876_v56  ;;  %v882_v2 = vcvt.f32.s32 %v876_v56  ;;  %v3582_v56 = vld [vmem:[%s4125_s3] sm:$0x3] }
 0xc47   :  { %v878_v50 = vsel %vm877_vm12, %v873_v60, inf }
 0xc48   :  { %v938_v49 = vpop.xlane.xlu2 %937  ;;  %879 = vmin.xlane.f32.xlu0 %v878_v50  ;;  %v883_v59 = vshll.u32 %v882_v2, 16  ;;  %v2962_v50 = vmov 2  }
 0xc49   :  { %v941_v5 = vpop.xlane.xlu0 %940  ;;  %v952_v37 = vperm.slane %v938_v49, %v3070_v28 }
 0xc4a   :  { %v953_v26 = vperm.slane %v941_v5, %v3073_v29 }
 0xc4c   :  { %v954_v47 = vsel %vm186_vm1, %v953_v26, %v952_v37 }
 0xc50   :  { %v947_v36 = vpop.xlane.xlu2 %946 }
 0xc51   :  { %v956_v12 = vperm.slane %v947_v36, %v3073_v29 }
 0xc53   :  { %v957_v43 = vsel %vm186_vm1, %v956_v12, %v955_v34 }
 0xc54   :  { %v958_v22 = vsel %vm191_vm2, %v957_v43, %v954_v47 }
 0xc55   :  { %v960_v33 = vsel %vm194_vm3, %v958_v22, -inf }
 0xc56   :  { %961 = vmax.xlane.f32.xlu2 %v960_v33 }
 0xcbb   :  { %v880_v1 = vpop.xlane.xlu0 %879 }
 0xcbc   :  { %v881_v6 = vcvt.f32.s32 %v880_v1 }
 0xcbe   :  { %v884_v60 = vadd.s32 %v883_v59, %v881_v6 }
 0xcc9   :  { %v962_v38 = vpop.xlane.xlu2 %961 }
 0xcca   :  { %v964_v54 = vperm.slane %v962_v38, 0  ;;  %v965_v62 = vperm.slane %v962_v38, 1 }
 0xccc   :  { %v968_v17 = vsub.f32 %v938_v49, %v964_v54  ;;  %v969_v21 = vsub.f32 %v941_v5, %v964_v54  ;;  %v970_v11 = vsub.f32 %v944_v55, %v965_v62  ;;  %v971_v25 = vsub.f32 %v947_v36, %v965_v62 }
 0xccd   :  { %v888_v55 = vstv %s887_s24 }
 0xcce   :  { %v972_v19 = vmul.f32 1.442695, %v968_v17  ;;  %v974_v4 = vmul.f32 1.442695, %v969_v21  ;;  %v976_v23 = vmul.f32 1.442695, %v970_v11 }
 0xccf   :  { %v978_v48 = vmul.f32 1.442695, %v971_v25  ;;  %vm889_vm13 = vcmp.eq.s32.totalorder %v888_v55, 1 }
 0xcd0   :  { %2761 = vpow2.f32 %v972_v19  ;;  %v890_v49 = vsel %vm889_vm13, %v3582_v56, %v884_v60 }
 0xcd1   :  { %2763 = vpow2.f32 %v974_v4 }
 0xcd2   :  { %2765 = vpow2.f32 %v976_v23 }
 0xcd3   :  { %2767 = vpow2.f32 %v978_v48 }
 0xcd6   :  { %v2762_v3 = vpop.eup %2761 }
 0xcd7   :  { %v2764_v8 = vpop.eup %2763  ;;  %985 = vperm.xlu1 %2677, %v2762_v3  }
 0xcd8   :  { %v2766_v58 = vpop.eup %2765  ;;  %988 = vperm.xlu2 %2679, %v2764_v8  }
 0xcd9   :  { %991 = vperm.xlu0 %2676, %v2766_v58   ;;  %v2768_v5 = vpop.eup %2767 }
 0xcdf   :  { %2680 = vset.pattern.permute.xlu1 %v2962_v50 }
 0xce0   :  { %892 = vperm.xlu1 %2680, %v890_v49   ;;  %v3610_v49 = vld [vmem:[%s4123_s1] sm:$0xff] }
 0xce1   :  { %994 = vperm.xlu0 %2676, %v2768_v5  }
 0xce8   :  { %2681 = vset.pattern.permute.xlu1 %v2955_v40 }
 0xd32   :  { %v989_v36 = vpop.permute.xlu2 %988 }
 0xd33   :  { %v997_v43 = vperm.slane %v989_v36, %v3073_v29 }
 0xd49   :  { %v986_v26 = vpop.permute.xlu1 %985 }
 0xd4a   :  { %v996_v34 = vperm.slane %v986_v26, %v3070_v28 }
 0xd4b   :  { %v992_v37 = vpop.permute.xlu0 %991 }
 0xd4c   :  { %v999_v22 = vperm.slane %v992_v37, %v3070_v28  ;;  %v998_v62 = vsel %vm186_vm1, %v997_v43, %v996_v34 }
 0xd52   :  { %v893_v12 = vpop.permute.xlu1 %892 }
 0xd53   :  { %v995_v47 = vpop.permute.xlu0 %994  ;;  %vm894_vm14 = vcmp.eq.s32.totalorder %v3070_v28, %v893_v12 }
 0xd54   :  { %v1000_v33 = vperm.slane %v995_v47, %v3073_v29  ;;  %v2593_v38 = vsel %vm894_vm14, 1.0, %v2956_v0  ;;  %v3624_v47 = vld [vmem:[%s4123_s1 + $0x10] sm:$0xff] }
 0xd55   :  { %v897_v54 = vpack.c.bf16 %v2593_v38, %v2593_v38 }
 0xd56   :  { %v1001_v17 = vsel %vm186_vm1, %v1000_v33, %v999_v22  ;;  %v3630_v22 = vld [vmem:[%s4123_s1 + $0x18] sm:$0xff] }
 0xd57   :  { %v1002_v21 = vsel %vm191_vm2, %v1001_v17, %v998_v62  ;;  %2594 = vmatmul.msk.bf16.vlgmr.msra.gmra.mxu0 %vm129_vm5, %v897_v54 }
 0xd58   :  { %v1004_v11 = vsel %vm194_vm3, %v1002_v21, 0.0  ;;  %1411 = vmatpush.bf16.msra.mxu0 %v3164_v39 }
 0xd59   :  { %1005 = vadd.xlane.f32.xlu2 %v1004_v11 }
 0xd5c   :  { %1412 = vmatpush.bf16.msra.mxu0 %v3182_v46 }
 0xd60   :  { %1413 = vmatpush.bf16.msra.mxu0 %v3203_v61 }
 0xd64   :  { %1414 = vmatpush.bf16.msra.mxu0 %v3232_v15 }
 0xd68   :  { %1415 = vmatpush.bf16.msra.mxu0 %v3253_v27 }
 0xd6c   :  { %1416 = vmatpush.bf16.msra.mxu0 %v3271_v42 }
 0xd70   :  { %1417 = vmatpush.bf16.msra.mxu0 %v3294_v9 }
 0xdcc   :  { %v1006_v19 = vpop.xlane.xlu2 %1005 }
 0xdcd   :  { %2769 = vrcp.f32 %v1006_v19 }
 0xdd3   :  { %v2770_v4 = vpop.eup %2769 }
 0xdd4   :  { %v910_v23 = vpop.f32.mrf.mxu0  ;;  %v1009_v25 = vperm.slane %v2770_v4, 0  ;;  %v1010_v48 = vperm.slane %v2770_v4, 1 }
 0xdd5   :  { %1161 = vrot.lane.b32.xlu2 %v910_v23, %s2957_s22 }
 0xdd6   :  { %v1014_v1 = vmul.f32 %v2764_v8, %v1009_v25  ;;  %v1013_v2 = vmul.f32 %v2762_v3, %v1009_v25  ;;  %v1016_v59 = vmul.f32 %v2768_v5, %v1010_v48  ;;  %v1015_v55 = vmul.f32 %v2766_v58, %v1010_v48  ;;  %v3616_v8 = vld [vmem:[%s4123_s1 + $0x8] sm:$0xff] }
 0xdd8   :  { %1024 = vperm.xlu1 %2681, %v1014_v1   ;;  %1019 = vperm.xlu0 %2676, %v1013_v2  }
 0xddc   :  { %v912_v6 = vpop.f32.mrf.mxu0 }
 0xde0   :  { %1034 = vperm.xlu1 %2681, %v1016_v59   ;;  %1029 = vperm.xlu0 %2676, %v1015_v55  }
 0xde8   :  { %1066 = vrot.lane.b32.xlu1 %v3508_v57, %s2961_s8 }
 0xe4a   :  { %v1020_v60 = vpop.permute.xlu0 %1019  ;;  %v1025_v50 = vpop.permute.xlu1 %1024 }
 0xe4b   :  { %v1037_v3 = vmul.f32 %v3610_v49, %v1020_v60  ;;  %v1038_v58 = vmul.f32 %v3616_v8, %v1025_v50 }
 0xe4d   :  { %v1041_v5 = vsel %vm166_vm0, %v1037_v3, 0.0  ;;  %v1042_v57 = vsel %vm166_vm0, %v1038_v58, 0.0 }
 0xe4e   :  { %v1043_v26 = vadd.f32 %v1042_v57, %v1041_v5  ;;  %v2913_v5 = vld [vmem:[%s4131_s9 + $0x30] sm:$0xff]  ;;  %v2914_v57 = vld [vmem:[%s4131_s9 + $0x28] sm:$0xff] }
 0xe50   :  { %v1044_v37 = vrot.slane %v1043_v26, 4 }
 0xe52   :  { %v1045_v36 = vadd.f32 %v1044_v37, %v1043_v26  ;;  %v1030_v34 = vpop.permute.xlu0 %1029  ;;  %v1035_v12 = vpop.permute.xlu1 %1034 }
 0xe53   :  { %v1039_v43 = vmul.f32 %v3624_v47, %v1030_v34  ;;  %v1040_v33 = vmul.f32 %v3630_v22, %v1035_v12 }
 0xe54   :  { %v1046_v62 = vrot.slane %v1045_v36, 2 }
 0xe55   :  { %v1050_v38 = vsel %vm166_vm0, %v1039_v43, 0.0  ;;  %v1051_v54 = vsel %vm166_vm0, %v1040_v33, 0.0 }
 0xe56   :  { %v1052_v17 = vadd.f32 %v1051_v54, %v1050_v38  ;;  %v1047_v11 = vadd.f32 %v1046_v62, %v1045_v36 }
 0xe58   :  { %v1053_v21 = vrot.slane %v1052_v17, 4  ;;  %v1048_v1 = vrot.slane %v1047_v11, 1 }
 0xe5a   :  { %v1054_v19 = vadd.f32 %v1053_v21, %v1052_v17  ;;  %v1049_v48 = vadd.f32 %v1048_v1, %v1047_v11  ;;  %v1067_v60 = vpop.permute.xlu1 %1066 }
 0xe5c   :  { %v1055_v4 = vrot.slane %v1054_v19, 2 }
 0xe5e   :  { %v1056_v25 = vadd.f32 %v1055_v4, %v1054_v19 }
 0xe60   :  { %v1057_v2 = vrot.slane %v1056_v25, 1 }
 0xe62   :  { %v1058_v6 = vadd.f32 %v1057_v2, %v1056_v25 }
 0xe64   :  { %v1061_v59 = vsel %vm191_vm2, %v1058_v6, %v1049_v48 }
 0xe65   :  { %1062 = vrot.lane.b32.xlu0 %v1061_v59, %s2958_s18 }
 0xed7   :  { %v1063_v55 = vpop.permute.xlu0 %1062 }
 0xed8   :  { %v1069_v50 = vsel %vm300_vm6, %v910_v23, %v1063_v55  ;;  %v2915_v23 = vld [vmem:[%s4131_s9 + $0x20] sm:$0xff] }
 0xed9   :  { %v1070_v3 = vsel %vm302_vm7, %v1069_v50, %v1067_v60 }
 0xeda   :  { %v1071_v58 = vpack.c.bf16 %v1070_v3, %v1070_v3 }
 0xedc   :  { %2595 = vmatmul.msk.bf16.vlgmr.msrb.gmra.mxu0 %vm380_vm8, %v1071_v58  ;;  %2596 = vmatmul.msk.bf16.vlgmr.msra.gmra.mxu1 %vm380_vm8, %v1071_v58 }
 0xedd   :  { %1815 = vmatpush.bf16.msrb.mxu0 %v2913_v5  ;;  %2042 = vmatpush.bf16.msra.mxu1 %v3153_v35 }
 0xee1   :  { %1816 = vmatpush.bf16.msrb.mxu0 %v2914_v57  ;;  %2043 = vmatpush.bf16.msra.mxu1 %v3178_v44 }
 0xee5   :  { %1817 = vmatpush.bf16.msrb.mxu0 %v2915_v23  ;;  %2044 = vmatpush.bf16.msra.mxu1 %v3198_v53 }
 0xee9   :  { %1818 = vmatpush.bf16.msrb.mxu0 %v3360_v10  ;;  %2045 = vmatpush.bf16.msra.mxu1 %v3228_v13 }
 0xeed   :  { %1819 = vmatpush.bf16.msrb.mxu0 %v3367_v14  ;;  %2046 = vmatpush.bf16.msra.mxu1 %v3248_v24 }
 0xef1   :  { %1820 = vmatpush.bf16.msrb.mxu0 %v3374_v16  ;;  %2047 = vmatpush.bf16.msra.mxu1 %v3268_v41 }
 0xef5   :  { %1821 = vmatpush.bf16.msrb.mxu0 %v3386_v32  ;;  %2048 = vmatpush.bf16.msra.mxu1 %v3289_v7 }
 0xf59   :  { %v1084_v26 = vpop.f32.mrf.mxu0  ;;  %v1097_v37 = vpop.f32.mrf.mxu1 }
 0xf5a   :  { %v1098_v36 = vadd.f32 %v1097_v37, %v3327_v20  ;;  %v1085_v14 = vadd.f32 %v1084_v26, %v3331_v30 }
 0xf5c   :  { %2771 = vtanh.f32 %v1098_v36  ;;  %v2597_v43 = vmul.f32 -1.442695, %v1085_v14  ;;  %v2598_v50 = vmul.f32 -1.442695, %v1098_v36 }
 0xf5e   :  { %2773 = vpow2.f32 %v2597_v43 }
 0xf61   :  { %v1086_v10 = vpop.f32.mrf.mxu0  ;;  %v1099_v34 = vpop.f32.mrf.mxu1 }
 0xf62   :  { %v2772_v12 = vpop.eup %2771 }
 0xf63   :  { %1142 = vrot.lane.b32.xlu0 %v2772_v12, %s2959_s28 }
 0xf64   :  { %v2774_v16 = vpop.eup %2773 }
 0xf65   :  { %v1107_v33 = vadd.f32 1.0, %v2774_v16  ;;  %v1162_v16 = vpop.permute.xlu2 %1161 }
 0xf67   :  { %2775 = vrcp.f32 %v1107_v33  ;;  %v1120_v21 = vand.u32 2147483648, %v1107_v33  ;;  %vm1114_vm4 = vweird.f32 %v1107_v33  ;;  %v1118_v11 = vand.u32 2147483647, %v1107_v33 }
 0xf69   :  { %v1121_v4 = vor.u32 1.1754944e-38, %v1120_v21  ;;  %vm1119_vm13 = vcmp.eq.f32.partialorder %v1118_v11, 8.507059e+37 }
 0xf6d   :  { %v2776_v32 = vpop.eup %2775 }
 0xf6e   :  { %v1110_v38 = vmul.f32 %v2776_v32, %v1107_v33  ;;  %vm1115_vm15 = vweird.f32 %v2776_v32 }
 0xf6f   :  { %vm1116_vm12 = vmor %vm1114_vm4, %vm1115_vm15 }
 0xf70   :  { %v1111_v54 = vsub.f32 1.0, %v1110_v38 }
 0xf72   :  { %v1112_v62 = vmul.f32 %v2776_v32, %v1111_v54 }
 0xf74   :  { %v1113_v17 = vadd.f32 %v2776_v32, %v1112_v62  ;;  %v3687_v62 = vld [vmem:[%s4132_s10] ss:$0 sm:$0xff] }
 0xf76   :  { %v1117_v19 = vsel %vm1116_vm12, %v2776_v32, %v1113_v17 }
 0xf77   :  { %v1122_v1 = vsel %vm1119_vm13, %v1121_v4, %v1117_v19 }
 0xf78   :  { %v1140_v48 = vmul.f32 %v1122_v1, %v3502_v52 }
 0xfd5   :  { %v1143_v25 = vpop.permute.xlu0 %1142 }
 0xfd6   :  { %v1145_v2 = vmul.f32 %v1143_v25, %v1122_v1 }
 0xfd8   :  { %1147 = vrot.lane.b32.xlu1 %v1145_v2, %s2959_s28 }
 0xfe0   :  { %1157 = vrot.lane.b32.xlu1 %v1061_v59, %s2959_s28 }
0x104a   :  { %v1148_v6 = vpop.permute.xlu1 %1147 }
0x104b   :  { %v3667_v55 = vadd.f32 %v1148_v6, %v1140_v48 }
0x104d   :  { %2777 = vtanh.f32 %v3667_v55 }
0x104e   :  { %2779 = vpow2.f32 %v2598_v50 }
0x1052   :  { %v1158_v43 = vpop.permute.xlu1 %1157 }
0x1053   :  { %v2778_v60 = vpop.eup %2777 }
0x1054   :  { %1153 = vrot.lane.b32.xlu0 %v2778_v60, %s2959_s28  ;;  %v2780_v3 = vpop.eup %2779 }
0x1055   :  { %v1108_v58 = vadd.f32 1.0, %v2780_v3 }
0x1057   :  { %2781 = vrcp.f32 %v1108_v58  ;;  %v1135_v52 = vand.u32 2147483648, %v1108_v58  ;;  %vm1129_vm15 = vweird.f32 %v1108_v58  ;;  %v1133_v37 = vand.u32 2147483647, %v1108_v58 }
0x1059   :  { %v1136_v34 = vor.u32 1.1754944e-38, %v1135_v52  ;;  %vm1134_vm12 = vcmp.eq.f32.partialorder %v1133_v37, 8.507059e+37 }
0x105d   :  { %v2782_v5 = vpop.eup %2781 }
0x105e   :  { %v1125_v57 = vmul.f32 %v2782_v5, %v1108_v58  ;;  %vm1130_vm14 = vweird.f32 %v2782_v5 }
0x105f   :  { %vm1131_vm4 = vmor %vm1129_vm15, %vm1130_vm14 }
0x1060   :  { %v1126_v23 = vsub.f32 1.0, %v1125_v57 }
0x1062   :  { %v1127_v26 = vmul.f32 %v2782_v5, %v1126_v23 }
0x1064   :  { %v1128_v59 = vadd.f32 %v2782_v5, %v1127_v26 }
0x1066   :  { %v1132_v10 = vsel %vm1131_vm4, %v2782_v5, %v1128_v59 }
0x1067   :  { %v1137_v12 = vsel %vm1134_vm12, %v1136_v34, %v1132_v10 }
0x10c6   :  { %v1154_v14 = vpop.permute.xlu0 %1153 }
0x10c7   :  { %v3671_v36 = vmul.f32 %v1154_v14, %v1137_v12 }
0x10c9   :  { %v1164_v33 = vsel %vm129_vm5, %v3671_v36, %v1158_v43 }
0x10ca   :  { %v1165_v32 = vsel %vm474_vm9, %v1164_v33, %v1162_v16 }
0x10cb   :  { %v1166_v38 = vpack.c.bf16 %v1165_v32, %v1165_v32 }
0x10cd   :  { %2599 = vmatmul.msk.bf16.vlgmr.msra.gmra.mxu2 %vm380_vm8, %v1166_v38 }
0x10ce   :  { %1720 = vmatpush.bf16.msra.mxu2 %v3153_v35 }
0x10d2   :  { %1721 = vmatpush.bf16.msra.mxu2 %v3178_v44 }
0x10d6   :  { %1722 = vmatpush.bf16.msra.mxu2 %v3198_v53 }
0x10da   :  { %1723 = vmatpush.bf16.msra.mxu2 %v3228_v13 }
0x10de   :  { %1724 = vmatpush.bf16.msra.mxu2 %v3248_v24 }
0x10e2   :  { %1725 = vmatpush.bf16.msra.mxu2 %v3268_v41 }
0x10e6   :  { %1726 = vmatpush.bf16.msra.mxu2 %v3289_v7 }
0x1150   :  { %v1179_v54 = vpop.f32.mrf.mxu2 }
0x1151   :  { %v1180_v17 = vadd.f32 %v3687_v62, %v1179_v54 }
0x1153   :  { %2600 = vst [vmem:[%s4133_s11 + $0x4] sm:$0x3] %v1180_v17  ;;  %v1238_v21 = vperm.slane %v1180_v17, 0  ;;  %v1237_v11 = vrot.slane %v1180_v17, 1  ;;  %v1185_v25 = vsel %vm539_vm10, %v1180_v17, -inf }
0x1154   :  { %v1186_v1 = vsel %vm541_vm11, %v1185_v25, -inf }
0x1155   :  { %1240 = vrot.lane.b32.xlu0 %v1238_v21, %s2959_s28  ;;  %v1239_v19 = vperm.slane %v1237_v11, 0 }
0x1157   :  { %1242 = vrot.lane.b32.xlu1 %v1239_v19, %s2959_s28 }
0x1158   :  { %v1181_v4 = vpop.f32.mrf.mxu2 }
0x117f   :  { %1187 = vmax.xlane.f32.xlu0 %v1186_v1 }
0x11c7   :  { %v1241_v2 = vpop.permute.xlu0 %1240 }
0x11c8   :  { %v1246_v48 = vadd.f32 %v3546_v31, %v1241_v2  ;;  %v1247_v6 = vadd.f32 %v3552_v45, %v1241_v2 }
0x11c9   :  { %v1243_v60 = vpop.permute.xlu1 %1242 }
0x11ca   :  { %2783 = vtanh.f32 %v1246_v48  ;;  %v1248_v50 = vadd.f32 %v3533_v18, %v1243_v60  ;;  %v1249_v3 = vadd.f32 %v3558_v63, %v1243_v60 }
0x11cb   :  { %2785 = vtanh.f32 %v1247_v6 }
0x11cc   :  { %2787 = vtanh.f32 %v1248_v50 }
0x11cd   :  { %2789 = vtanh.f32 %v1249_v3 }
0x11d0   :  { %v2784_v58 = vpop.eup %2783 }
0x11d1   :  { %v2786_v5 = vpop.eup %2785  ;;  %v1254_v57 = vmul.f32 %v3539_v51, %v2784_v58 }
0x11d2   :  { %v2788_v23 = vpop.eup %2787  ;;  %v1255_v26 = vmul.f32 %v3539_v51, %v2786_v5 }
0x11d3   :  { %v1258_v31 = vsel %vm166_vm0, %v1254_v57, 0.0  ;;  %v1256_v45 = vmul.f32 %v3539_v51, %v2788_v23  ;;  %v2790_v59 = vpop.eup %2789 }
0x11d4   :  { %v1261_v52 = vsel %vm166_vm0, %v1255_v26, 0.0  ;;  %1259 = vadd.xlane.f32.xlu1 %v1258_v31  ;;  %v1257_v63 = vmul.f32 %v3539_v51, %v2790_v59 }
0x11d5   :  { %1262 = vadd.xlane.f32.xlu2 %v1261_v52  ;;  %v1264_v18 = vsel %vm166_vm0, %v1256_v45, 0.0 }
0x11d6   :  { %1265 = vadd.xlane.f32.xlu0 %v1264_v18  ;;  %v1267_v37 = vsel %vm166_vm0, %v1257_v63, 0.0 }
0x11dc   :  { %1268 = vadd.xlane.f32.xlu1 %v1267_v37 }
0x11f2   :  { %v1188_v10 = vpop.xlane.xlu0 %1187 }
0x11f3   :  { %vm1189_vm13 = vcmp.eq.f32.partialorder %v1185_v25, %v1188_v10  ;;  %v2963_v10 = vmov 3  }
0x11f4   :  { %vm1190_vm14 = vmand %vm1189_vm13, %vm539_vm10 }
0x11f5   :  { %v1191_v34 = vsel %vm1190_vm14, %v3070_v28, 128 }
0x11f6   :  { %v1192_v12 = vsel %vm541_vm11, %v1191_v34, 2147483647 }
0x11f7   :  { %v1194_v14 = vshra.s32 %v1192_v12, 16  ;;  %v1193_v1 = vand.u32 65535, %v1192_v12  ;;  %v1210_v12 = vstv %s1209_s0 }
0x11f8   :  { %vm1211_vm4 = vcmp.eq.s32.totalorder %v1210_v12, 1 }
0x11f9   :  { %v1196_v43 = vcvt.s32.f32 %v1194_v14  ;;  %v1195_v48 = vcvt.s32.f32 %v1193_v1 }
0x11fb   :  { %1197 = vmin.xlane.f32.xlu0 %v1196_v43 }
0x1247   :  { %v1260_v16 = vpop.xlane.xlu1 %1259 }
0x1248   :  { %v1263_v33 = vpop.xlane.xlu2 %1262  ;;  %v1274_v38 = vperm.slane %v1260_v16, %v3070_v28 }
0x1249   :  { %v1266_v32 = vpop.xlane.xlu0 %1265  ;;  %v1275_v51 = vperm.slane %v1263_v33, %v3073_v29 }
0x124a   :  { %v1277_v17 = vperm.slane %v1266_v32, %v3070_v28 }
0x124b   :  { %v1276_v11 = vsel %vm186_vm1, %v1275_v51, %v1274_v38 }
0x124f   :  { %v1269_v54 = vpop.xlane.xlu1 %1268 }
0x1250   :  { %v1278_v21 = vperm.slane %v1269_v54, %v3073_v29 }
0x1252   :  { %v1279_v19 = vsel %vm186_vm1, %v1278_v21, %v1277_v17 }
0x1253   :  { %v1280_v4 = vsel %vm191_vm2, %v1279_v19, %v1276_v11 }
0x1254   :  { %v1282_v25 = vsel %vm194_vm3, %v1280_v4, -inf }
0x1255   :  { %1283 = vmax.xlane.f32.xlu1 %v1282_v25 }
0x126e   :  { %v1198_v2 = vpop.xlane.xlu0 %1197 }
0x126f   :  { %vm1199_vm15 = vcmp.eq.f32.partialorder %v1196_v43, %v1198_v2  ;;  %v1204_v34 = vcvt.f32.s32 %v1198_v2 }
0x1270   :  { %v1200_v6 = vsel %vm1199_vm15, %v1195_v48, inf }
0x1271   :  { %1201 = vmin.xlane.f32.xlu2 %v1200_v6  ;;  %v1205_v43 = vshll.u32 %v1204_v34, 16 }
0x12c8   :  { %v1284_v60 = vpop.xlane.xlu1 %1283 }
0x12c9   :  { %v1286_v50 = vperm.slane %v1284_v60, 0  ;;  %v1287_v3 = vperm.slane %v1284_v60, 1 }
0x12cb   :  { %v1290_v58 = vsub.f32 %v1260_v16, %v1286_v50  ;;  %v1291_v5 = vsub.f32 %v1263_v33, %v1286_v50  ;;  %v1292_v57 = vsub.f32 %v1266_v32, %v1287_v3  ;;  %v1293_v45 = vsub.f32 %v1269_v54, %v1287_v3 }
0x12cd   :  { %v1294_v23 = vmul.f32 1.442695, %v1290_v58  ;;  %v1296_v26 = vmul.f32 1.442695, %v1291_v5  ;;  %v1298_v31 = vmul.f32 1.442695, %v1292_v57 }
0x12ce   :  { %v1300_v59 = vmul.f32 1.442695, %v1293_v45 }
0x12cf   :  { %2791 = vpow2.f32 %v1294_v23 }
0x12d0   :  { %2793 = vpow2.f32 %v1296_v26 }
0x12d1   :  { %2795 = vpow2.f32 %v1298_v31 }
0x12d2   :  { %2797 = vpow2.f32 %v1300_v59 }
0x12d5   :  { %v2792_v52 = vpop.eup %2791 }
0x12d6   :  { %v2794_v18 = vpop.eup %2793  ;;  %1307 = vperm.xlu0 %2676, %v2792_v52  }
0x12d7   :  { %v2796_v63 = vpop.eup %2795  ;;  %1310 = vperm.xlu1 %2681, %v2794_v18  }
0x12d8   :  { %1313 = vperm.xlu2 %2679, %v2796_v63   ;;  %v2798_v37 = vpop.eup %2797 }
0x12de   :  { %1316 = vperm.xlu0 %2676, %v2798_v37  }
0x12e0   :  { %2682 = vset.pattern.permute.xlu2 %v2963_v10 }
0x12e4   :  { %v1202_v14 = vpop.xlane.xlu2 %1201 }
0x12e5   :  { %v1203_v16 = vcvt.f32.s32 %v1202_v14 }
0x12e7   :  { %v1206_v33 = vadd.s32 %v1205_v43, %v1203_v16 }
0x12e9   :  { %v1212_v32 = vsel %vm1211_vm4, %v3582_v56, %v1206_v33 }
0x12ea   :  { %1214 = vperm.xlu2 %2682, %v1212_v32  }
0x12f2   :  { %2683 = vset.pattern.permute.xlu2 %v2955_v40 }
0x1332   :  { %v1314_v51 = vpop.permute.xlu2 %1313 }
0x1333   :  { %v1321_v25 = vperm.slane %v1314_v51, %v3070_v28 }
0x1344   :  { %v1215_v38 = vpop.permute.xlu2 %1214 }
0x1345   :  { %vm1216_vm12 = vcmp.eq.s32.totalorder %v3070_v28, %v1215_v38 }
0x1346   :  { %v2602_v54 = vsel %vm1216_vm12, 1.0, %v2956_v0 }
0x1347   :  { %v1219_v17 = vpack.c.bf16 %v2602_v54, %v2602_v54 }
0x1348   :  { %v1308_v21 = vpop.permute.xlu0 %1307 }
0x1349   :  { %2603 = vmatmul.msk.bf16.vlgmr.msra.gmra.mxu3 %vm129_vm5, %v1219_v17  ;;  %v1311_v11 = vpop.permute.xlu1 %1310  ;;  %v1318_v19 = vperm.slane %v1308_v21, %v3070_v28 }
0x134a   :  { %1733 = vmatpush.bf16.msra.mxu3 %v3164_v39  ;;  %v1319_v56 = vperm.slane %v1311_v11, %v3073_v29 }
0x134c   :  { %v1320_v2 = vsel %vm186_vm1, %v1319_v56, %v1318_v19 }
0x134e   :  { %1734 = vmatpush.bf16.msra.mxu3 %v3182_v46 }
0x1350   :  { %v1317_v4 = vpop.permute.xlu0 %1316 }
0x1351   :  { %v1322_v1 = vperm.slane %v1317_v4, %v3073_v29 }
0x1352   :  { %1735 = vmatpush.bf16.msra.mxu3 %v3203_v61 }
0x1353   :  { %v1323_v48 = vsel %vm186_vm1, %v1322_v1, %v1321_v25 }
0x1354   :  { %v1324_v6 = vsel %vm191_vm2, %v1323_v48, %v1320_v2 }
0x1355   :  { %v1326_v60 = vsel %vm194_vm3, %v1324_v6, 0.0 }
0x1356   :  { %1327 = vadd.xlane.f32.xlu1 %v1326_v60  ;;  %1736 = vmatpush.bf16.msra.mxu3 %v3232_v15 }
0x135a   :  { %1737 = vmatpush.bf16.msra.mxu3 %v3253_v27 }
0x135e   :  { %1738 = vmatpush.bf16.msra.mxu3 %v3271_v42 }
0x1362   :  { %1739 = vmatpush.bf16.msra.mxu3 %v3294_v9 }
0x13c9   :  { %v1328_v50 = vpop.xlane.xlu1 %1327 }
0x13ca   :  { %2799 = vrcp.f32 %v1328_v50  ;;  %v2917_v50 = vld [vmem:[%s4126_s4 + $0x18] sm:$0xff] }
0x13cc   :  { %v1232_v3 = vpop.f32.mrf.mxu3 }
0x13cd   :  { %1483 = vrot.lane.b32.xlu1 %v1232_v3, %s2957_s22 }
0x13d0   :  { %v2800_v58 = vpop.eup %2799 }
0x13d1   :  { %v1331_v5 = vperm.slane %v2800_v58, 0  ;;  %v1332_v31 = vperm.slane %v2800_v58, 1  ;;  %v2918_v58 = vld [vmem:[%s4126_s4 + $0x10] sm:$0xff] }
0x13d3   :  { %v1336_v57 = vmul.f32 %v2794_v18, %v1331_v5  ;;  %v1335_v23 = vmul.f32 %v2792_v52, %v1331_v5  ;;  %v1338_v45 = vmul.f32 %v2798_v37, %v1332_v31  ;;  %v1337_v59 = vmul.f32 %v2796_v63, %v1332_v31  ;;  %v2920_v5 = vld [vmem:[%s4126_s4] sm:$0xff] }
0x13d4   :  { %v1234_v26 = vpop.f32.mrf.mxu3 }
0x13d5   :  { %1346 = vperm.xlu2 %2683, %v1336_v57   ;;  %1341 = vperm.xlu0 %2676, %v1335_v23  }
0x13dd   :  { %1356 = vperm.xlu2 %2683, %v1338_v45   ;;  %1351 = vperm.xlu0 %2676, %v1337_v59  }
0x13e5   :  { %1388 = vrot.lane.b32.xlu2 %v3671_v36, %s2961_s8 }
0x142f   :  { %v1347_v10 = vpop.permute.xlu2 %1346 }
0x1430   :  { %v1360_v34 = vmul.f32 %v3616_v8, %v1347_v10 }
0x1432   :  { %v1364_v18 = vsel %vm166_vm0, %v1360_v34, 0.0 }
0x1437   :  { %v1357_v43 = vpop.permute.xlu2 %1356 }
0x1438   :  { %v1362_v63 = vmul.f32 %v3630_v22, %v1357_v43 }
0x143a   :  { %v1373_v36 = vsel %vm166_vm0, %v1362_v63, 0.0 }
0x143f   :  { %v1389_v2 = vpop.permute.xlu2 %1388 }
0x1447   :  { %v1342_v12 = vpop.permute.xlu0 %1341 }
0x1448   :  { %v1359_v14 = vmul.f32 %v3610_v49, %v1342_v12 }
0x144a   :  { %v1363_v52 = vsel %vm166_vm0, %v1359_v14, 0.0 }
0x144b   :  { %v1365_v16 = vadd.f32 %v1364_v18, %v1363_v52 }
0x144d   :  { %v1366_v33 = vrot.slane %v1365_v16, 4 }
0x144f   :  { %v1367_v37 = vadd.f32 %v1366_v33, %v1365_v16  ;;  %v1352_v32 = vpop.permute.xlu0 %1351 }
0x1450   :  { %v1361_v51 = vmul.f32 %v3624_v47, %v1352_v32 }
0x1451   :  { %v1368_v38 = vrot.slane %v1367_v37, 2 }
0x1452   :  { %v1372_v8 = vsel %vm166_vm0, %v1361_v51, 0.0 }
0x1453   :  { %v1374_v54 = vadd.f32 %v1373_v36, %v1372_v8  ;;  %v1369_v17 = vadd.f32 %v1368_v38, %v1367_v37 }
0x1455   :  { %v1375_v49 = vrot.slane %v1374_v54, 4  ;;  %v1370_v19 = vrot.slane %v1369_v17, 1 }
0x1457   :  { %v1376_v21 = vadd.f32 %v1375_v49, %v1374_v54  ;;  %v1371_v25 = vadd.f32 %v1370_v19, %v1369_v17 }
0x1459   :  { %v1377_v11 = vrot.slane %v1376_v21, 2 }
0x145b   :  { %v1378_v56 = vadd.f32 %v1377_v11, %v1376_v21 }
0x145d   :  { %v1379_v4 = vrot.slane %v1378_v56, 1 }
0x145f   :  { %v1380_v1 = vadd.f32 %v1379_v4, %v1378_v56 }
0x1461   :  { %v1383_v22 = vsel %vm191_vm2, %v1380_v1, %v1371_v25 }
0x1462   :  { %1384 = vrot.lane.b32.xlu0 %v1383_v22, %s2958_s18 }
0x14d4   :  { %v1385_v47 = vpop.permute.xlu0 %1384 }
0x14d5   :  { %v1391_v48 = vsel %vm300_vm6, %v1232_v3, %v1385_v47  ;;  %v2919_v3 = vld [vmem:[%s4126_s4 + $0x8] sm:$0xff] }
0x14d6   :  { %v1392_v6 = vsel %vm302_vm7, %v1391_v48, %v1389_v2 }
0x14d7   :  { %v1393_v60 = vpack.c.bf16 %v1392_v6, %v1392_v6 }
0x14d9   :  { %2604 = vmatmul.msk.bf16.vlgmr.msrb.gmra.mxu3 %vm380_vm8, %v1393_v60  ;;  %2605 = vmatmul.msk.bf16.vlgmr.msra.gmra.mxu0 %vm380_vm8, %v1393_v60 }
0x14da   :  { %1871 = vmatpush.bf16.msrb.mxu3 %v2917_v50  ;;  %2193 = vmatpush.bf16.msra.mxu0 %v2917_v50 }
0x14de   :  { %1872 = vmatpush.bf16.msrb.mxu3 %v2918_v58  ;;  %2194 = vmatpush.bf16.msra.mxu0 %v2918_v58 }
0x14e2   :  { %1873 = vmatpush.bf16.msrb.mxu3 %v2919_v3  ;;  %2195 = vmatpush.bf16.msra.mxu0 %v2919_v3 }
0x14e6   :  { %1874 = vmatpush.bf16.msrb.mxu3 %v2920_v5  ;;  %2196 = vmatpush.bf16.msra.mxu0 %v2920_v5  ;;  %v1484_v5 = vpop.permute.xlu1 %1483 }
0x1556   :  { %v1419_v57 = vpop.f32.mrf.mxu0 }
0x1557   :  { %v1420_v23 = vadd.f32 %v1419_v57, %v3327_v20 }
0x1559   :  { %2801 = vtanh.f32 %v1420_v23  ;;  %v2607_v11 = vmul.f32 -1.442695, %v1420_v23 }
0x155c   :  { %v1406_v26 = vpop.f32.mrf.mxu3 }
0x155d   :  { %v1407_v10 = vadd.f32 %v1406_v26, %v3331_v30 }
0x155e   :  { %v1421_v31 = vpop.f32.mrf.mxu0 }
0x155f   :  { %v2802_v45 = vpop.eup %2801  ;;  %v2606_v34 = vmul.f32 -1.442695, %v1407_v10 }
0x1560   :  { %1464 = vrot.lane.b32.xlu0 %v2802_v45, %s2959_s28 }
0x1561   :  { %2803 = vpow2.f32 %v2606_v34 }
0x1564   :  { %v1408_v59 = vpop.f32.mrf.mxu3 }
0x1567   :  { %v2804_v12 = vpop.eup %2803 }
0x1568   :  { %v1429_v14 = vadd.f32 1.0, %v2804_v12 }
0x156a   :  { %2805 = vrcp.f32 %v1429_v14  ;;  %v1442_v63 = vand.u32 2147483648, %v1429_v14  ;;  %vm1436_vm14 = vweird.f32 %v1429_v14  ;;  %v1440_v37 = vand.u32 2147483647, %v1429_v14 }
0x156c   :  { %v1443_v51 = vor.u32 1.1754944e-38, %v1442_v63  ;;  %vm1441_vm4 = vcmp.eq.f32.partialorder %v1440_v37, 8.507059e+37 }
0x1570   :  { %v2806_v18 = vpop.eup %2805 }
0x1571   :  { %v1432_v52 = vmul.f32 %v2806_v18, %v1429_v14  ;;  %vm1437_vm13 = vweird.f32 %v2806_v18 }
0x1572   :  { %vm1438_vm15 = vmor %vm1436_vm14, %vm1437_vm13 }
0x1573   :  { %v1433_v43 = vsub.f32 1.0, %v1432_v52 }
0x1575   :  { %v1434_v16 = vmul.f32 %v2806_v18, %v1433_v43 }
0x1577   :  { %v1435_v33 = vadd.f32 %v2806_v18, %v1434_v16 }
0x1579   :  { %v1439_v32 = vsel %vm1438_vm15, %v2806_v18, %v1435_v33  ;;  %v3812_v33 = vld [vmem:[%s4127_s5] ss:$0 sm:$0xff] }
0x157a   :  { %v1444_v8 = vsel %vm1441_vm4, %v1443_v51, %v1439_v32  ;;  %v3819_v51 = vld [vmem:[%s4124_s2] sm:$0xff] }
0x157b   :  { %v1462_v54 = vmul.f32 %v1444_v8, %v3667_v55 }
0x15d2   :  { %v1465_v36 = vpop.permute.xlu0 %1464 }
0x15d3   :  { %v1467_v38 = vmul.f32 %v1465_v36, %v1444_v8  ;;  %v3825_v8 = vld [vmem:[%s4124_s2 + $0x8] sm:$0xff] }
0x15d5   :  { %1469 = vrot.lane.b32.xlu2 %v1467_v38, %s2959_s28 }
0x15dd   :  { %1479 = vrot.lane.b32.xlu2 %v1383_v22, %s2959_s28 }
0x162f   :  { %v1470_v49 = vpop.permute.xlu2 %1469 }
0x1630   :  { %v3777_v17 = vadd.f32 %v1470_v49, %v1462_v54  ;;  %v3831_v54 = vld [vmem:[%s4124_s2 + $0x18] sm:$0xff] }
0x1632   :  { %2807 = vtanh.f32 %v3777_v17 }
0x1633   :  { %2809 = vpow2.f32 %v2607_v11 }
0x1637   :  { %v1480_v3 = vpop.permute.xlu2 %1479 }
0x1638   :  { %v2808_v21 = vpop.eup %2807 }
0x1639   :  { %1475 = vrot.lane.b32.xlu0 %v2808_v21, %s2959_s28  ;;  %v2810_v56 = vpop.eup %2809 }
0x163a   :  { %v1430_v19 = vadd.f32 1.0, %v2810_v56 }
0x163c   :  { %2811 = vrcp.f32 %v1430_v19  ;;  %v1457_v55 = vand.u32 2147483648, %v1430_v19  ;;  %vm1451_vm13 = vweird.f32 %v1430_v19  ;;  %v1455_v2 = vand.u32 2147483647, %v1430_v19 }
0x163e   :  { %v1458_v6 = vor.u32 1.1754944e-38, %v1457_v55  ;;  %vm1456_vm15 = vcmp.eq.f32.partialorder %v1455_v2, 8.507059e+37 }
0x1642   :  { %v2812_v4 = vpop.eup %2811 }
0x1643   :  { %v1447_v25 = vmul.f32 %v2812_v4, %v1430_v19  ;;  %vm1452_vm12 = vweird.f32 %v2812_v4 }
0x1644   :  { %vm1453_vm14 = vmor %vm1451_vm13, %vm1452_vm12 }
0x1645   :  { %v1448_v1 = vsub.f32 1.0, %v1447_v25 }
0x1647   :  { %v1449_v47 = vmul.f32 %v2812_v4, %v1448_v1 }
0x1649   :  { %v1450_v22 = vadd.f32 %v2812_v4, %v1449_v47 }
0x164b   :  { %v1454_v48 = vsel %vm1453_vm14, %v2812_v4, %v1450_v22 }
0x164c   :  { %v1459_v60 = vsel %vm1456_vm15, %v1458_v6, %v1454_v48 }
0x16ab   :  { %v1476_v50 = vpop.permute.xlu0 %1475 }
0x16ac   :  { %v3781_v58 = vmul.f32 %v1476_v50, %v1459_v60 }
0x16ae   :  { %v1486_v57 = vsel %vm129_vm5, %v3781_v58, %v1480_v3 }
0x16af   :  { %v1487_v23 = vsel %vm474_vm9, %v1486_v57, %v1484_v5 }
0x16b0   :  { %v1488_v26 = vpack.c.bf16 %v1487_v23, %v1487_v23 }
0x16b2   :  { %2608 = vmatmul.msk.bf16.vlgmr.msrb.gmra.mxu1 %vm380_vm8, %v1488_v26 }
0x16b3   :  { %2377 = vmatpush.bf16.msrb.mxu1 %v3164_v39 }
0x16b7   :  { %2378 = vmatpush.bf16.msrb.mxu1 %v3182_v46 }
0x16bb   :  { %2379 = vmatpush.bf16.msrb.mxu1 %v3203_v61 }
0x16bf   :  { %2380 = vmatpush.bf16.msrb.mxu1 %v3232_v15 }
0x16c3   :  { %2381 = vmatpush.bf16.msrb.mxu1 %v3253_v27 }
0x16c7   :  { %2382 = vmatpush.bf16.msrb.mxu1 %v3271_v42 }
0x16cb   :  { %2383 = vmatpush.bf16.msrb.mxu1 %v3294_v9 }
0x172f   :  { %v1501_v31 = vpop.f32.mrf.mxu1 }
0x1730   :  { %v1502_v45 = vadd.f32 %v3687_v62, %v1501_v31  ;;  %v3806_v62 = vld [vmem:[%s4124_s2 + $0x10] sm:$0xff]  ;;  %s2610_s2 = sld [smem:[#allocation3 + $0x3]] }
0x1732   :  { %2609 = vst [vmem:[%s4133_s11 + $0x6] sm:$0x3] %v1502_v45  ;;  %v1560_v59 = vperm.slane %v1502_v45, 0  ;;  %v1559_v10 = vrot.slane %v1502_v45, 1  ;;  %v1507_v14 = vsel %vm539_vm10, %v1502_v45, -inf }
0x1733   :  { %v1508_v18 = vsel %vm541_vm11, %v1507_v14, -inf }
0x1734   :  { %1562 = vrot.lane.b32.xlu0 %v1560_v59, %s2959_s28  ;;  %v1561_v34 = vperm.slane %v1559_v10, 0 }
0x1736   :  { %1564 = vrot.lane.b32.xlu2 %v1561_v34, %s2959_s28  ;;  %p1530_p3 = scmp.eq.s32.totalorder %s2610_s2, 1 }
0x1737   :  { %v1503_v12 = vpop.f32.mrf.mxu1 }
0x1738   :  { %s1531_s7 = scalar_select %p1530_p3, 1, 0 }
0x175e   :  { %1509 = vmax.xlane.f32.xlu0 %v1508_v18 }
0x1790   :  { %v1565_v52 = vpop.permute.xlu2 %1564 }
0x1791   :  { %v1570_v43 = vadd.f32 %v3806_v62, %v1565_v52  ;;  %v1571_v49 = vadd.f32 %v3831_v54, %v1565_v52 }
0x1793   :  { %2813 = vtanh.f32 %v1570_v43 }
0x1799   :  { %v2814_v16 = vpop.eup %2813 }
0x179a   :  { %v1578_v63 = vmul.f32 %v3812_v33, %v2814_v16 }
0x179c   :  { %v1586_v37 = vsel %vm166_vm0, %v1578_v63, 0.0 }
0x179d   :  { %1587 = vadd.xlane.f32.xlu0 %v1586_v37 }
0x17a6   :  { %v1563_v32 = vpop.permute.xlu0 %1562 }
0x17a7   :  { %v1568_v36 = vadd.f32 %v3819_v51, %v1563_v32  ;;  %v1569_v38 = vadd.f32 %v3825_v8, %v1563_v32 }
0x17a9   :  { %2815 = vtanh.f32 %v1568_v36 }
0x17aa   :  { %2817 = vtanh.f32 %v1569_v38 }
0x17ab   :  { %2819 = vtanh.f32 %v1571_v49 }
0x17af   :  { %v2816_v21 = vpop.eup %2815 }
0x17b0   :  { %v2818_v11 = vpop.eup %2817  ;;  %v1576_v56 = vmul.f32 %v3812_v33, %v2816_v21 }
0x17b1   :  { %v1577_v19 = vmul.f32 %v3812_v33, %v2818_v11  ;;  %v2820_v25 = vpop.eup %2819 }
0x17b2   :  { %v1580_v4 = vsel %vm166_vm0, %v1576_v56, 0.0  ;;  %v1579_v47 = vmul.f32 %v3812_v33, %v2820_v25 }
0x17b3   :  { %v1583_v1 = vsel %vm166_vm0, %v1577_v19, 0.0  ;;  %1581 = vadd.xlane.f32.xlu2 %v1580_v4 }
0x17b4   :  { %1584 = vadd.xlane.f32.xlu1 %v1583_v1  ;;  %v1589_v22 = vsel %vm166_vm0, %v1579_v47, 0.0 }
0x17bb   :  { %1590 = vadd.xlane.f32.xlu2 %v1589_v22  ;;  %v2964_v22 = vmov 4  }
0x17d1   :  { %v1510_v55 = vpop.xlane.xlu0 %1509 }
0x17d2   :  { %vm1511_vm4 = vcmp.eq.f32.partialorder %v1507_v14, %v1510_v55 }
0x17d3   :  { %vm1512_vm12 = vmand %vm1511_vm4, %vm539_vm10 }
0x17d4   :  { %v1513_v2 = vsel %vm1512_vm12, %v3070_v28, 128 }
0x17d5   :  { %v1514_v48 = vsel %vm541_vm11, %v1513_v2, 2147483647  ;;  %v1532_v2 = vstv %s1531_s7 }
0x17d6   :  { %v1516_v6 = vshra.s32 %v1514_v48, 16  ;;  %v1515_v14 = vand.u32 65535, %v1514_v48  ;;  %vm1533_vm14 = vcmp.eq.s32.totalorder %v1532_v2, 1 }
0x17d8   :  { %v1518_v60 = vcvt.s32.f32 %v1516_v6  ;;  %v1517_v52 = vcvt.s32.f32 %v1515_v14 }
0x17da   :  { %1519 = vmin.xlane.f32.xlu0 %v1518_v60 }
0x1810   :  { %v1588_v5 = vpop.xlane.xlu0 %1587 }
0x1811   :  { %v1599_v31 = vperm.slane %v1588_v5, %v3070_v28 }
0x1826   :  { %v1582_v50 = vpop.xlane.xlu2 %1581 }
0x1827   :  { %v1585_v3 = vpop.xlane.xlu1 %1584  ;;  %v1596_v23 = vperm.slane %v1582_v50, %v3070_v28 }
0x1828   :  { %v1597_v57 = vperm.slane %v1585_v3, %v3073_v29 }
0x182a   :  { %v1598_v59 = vsel %vm186_vm1, %v1597_v57, %v1596_v23 }
0x182e   :  { %v1591_v26 = vpop.xlane.xlu2 %1590 }
0x182f   :  { %v1600_v45 = vperm.slane %v1591_v26, %v3073_v29 }
0x1831   :  { %v1601_v10 = vsel %vm186_vm1, %v1600_v45, %v1599_v31 }
0x1832   :  { %v1602_v34 = vsel %vm191_vm2, %v1601_v10, %v1598_v59 }
0x1833   :  { %v1604_v12 = vsel %vm194_vm3, %v1602_v34, -inf }
0x1834   :  { %1605 = vmax.xlane.f32.xlu2 %v1604_v12 }
0x184d   :  { %v1520_v18 = vpop.xlane.xlu0 %1519 }
0x184e   :  { %vm1521_vm13 = vcmp.eq.f32.partialorder %v1518_v60, %v1520_v18  ;;  %v1526_v55 = vcvt.f32.s32 %v1520_v18 }
0x184f   :  { %v1522_v43 = vsel %vm1521_vm13, %v1517_v52, inf }
0x1850   :  { %1523 = vmin.xlane.f32.xlu0 %v1522_v43  ;;  %v1527_v6 = vshll.u32 %v1526_v55, 16 }
0x18a7   :  { %v1606_v16 = vpop.xlane.xlu2 %1605 }
0x18a8   :  { %v1608_v63 = vperm.slane %v1606_v16, 0  ;;  %v1609_v37 = vperm.slane %v1606_v16, 1 }
0x18aa   :  { %v1612_v32 = vsub.f32 %v1582_v50, %v1608_v63  ;;  %v1613_v36 = vsub.f32 %v1585_v3, %v1608_v63  ;;  %v1614_v38 = vsub.f32 %v1588_v5, %v1609_v37  ;;  %v1615_v56 = vsub.f32 %v1591_v26, %v1609_v37  ;;  %v3855_v3 = vld [vmem:[%s4125_s3] sm:$0x3] }
0x18ac   :  { %v1616_v49 = vmul.f32 1.442695, %v1612_v32  ;;  %v1618_v21 = vmul.f32 1.442695, %v1613_v36  ;;  %v1620_v11 = vmul.f32 1.442695, %v1614_v38 }
0x18ad   :  { %v1622_v19 = vmul.f32 1.442695, %v1615_v56  ;;  %v3889_v56 = vld [vmem:[%s4123_s1] sm:$0xff] }
0x18ae   :  { %2821 = vpow2.f32 %v1616_v49 }
0x18af   :  { %2823 = vpow2.f32 %v1618_v21 }
0x18b0   :  { %2825 = vpow2.f32 %v1620_v11 }
0x18b1   :  { %2827 = vpow2.f32 %v1622_v19 }
0x18b4   :  { %v2822_v4 = vpop.eup %2821 }
0x18b5   :  { %v2824_v25 = vpop.eup %2823  ;;  %1629 = vperm.xlu1 %2681, %v2822_v4  }
0x18b6   :  { %v2826_v1 = vpop.eup %2825  ;;  %1632 = vperm.xlu2 %2683, %v2824_v25  }
0x18b7   :  { %1635 = vperm.xlu0 %2676, %v2826_v1   ;;  %v2828_v47 = vpop.eup %2827 }
0x18bd   :  { %1638 = vperm.xlu1 %2681, %v2828_v47  }
0x18be   :  { %2684 = vset.pattern.permute.xlu2 %v2964_v22  ;;  %v3897_v22 = vld [vmem:[%s4123_s1 + $0x18] sm:$0xff] }
0x18c3   :  { %v1524_v48 = vpop.xlane.xlu0 %1523 }
0x18c4   :  { %v1525_v60 = vcvt.f32.s32 %v1524_v48 }
0x18c6   :  { %v1528_v50 = vadd.s32 %v1527_v6, %v1525_v60  ;;  %v3903_v6 = vld [vmem:[%s4123_s1 + $0x10] sm:$0xff] }
0x18c8   :  { %v1534_v5 = vsel %vm1533_vm14, %v3855_v3, %v1528_v50 }
0x18c9   :  { %1536 = vperm.xlu2 %2684, %v1534_v5  }
0x18d1   :  { %2685 = vset.pattern.permute.xlu2 %v2955_v40 }
0x1910   :  { %v1633_v57 = vpop.permute.xlu2 %1632 }
0x1911   :  { %v1641_v12 = vperm.slane %v1633_v57, %v3073_v29 }
0x1923   :  { %v1537_v23 = vpop.permute.xlu2 %1536 }
0x1924   :  { %vm1538_vm15 = vcmp.eq.s32.totalorder %v3070_v28, %v1537_v23 }
0x1925   :  { %v2611_v26 = vsel %vm1538_vm15, 1.0, %v2956_v0 }
0x1926   :  { %v1541_v31 = vpack.c.bf16 %v2611_v26, %v2611_v26 }
0x1927   :  { %v1630_v45 = vpop.permute.xlu1 %1629 }
0x1928   :  { %2612 = vmatmul.msk.bf16.vlgmr.msrb.gmra.mxu2 %vm129_vm5, %v1541_v31  ;;  %v1640_v10 = vperm.slane %v1630_v45, %v3070_v28 }
0x1929   :  { %2055 = vmatpush.bf16.msrb.mxu2 %v3164_v39  ;;  %v1636_v59 = vpop.permute.xlu0 %1635 }
0x192a   :  { %v1643_v14 = vperm.slane %v1636_v59, %v3070_v28  ;;  %v1642_v52 = vsel %vm186_vm1, %v1641_v12, %v1640_v10 }
0x192d   :  { %2056 = vmatpush.bf16.msrb.mxu2 %v3182_v46 }
0x192f   :  { %v1639_v34 = vpop.permute.xlu1 %1638 }
0x1930   :  { %v1644_v18 = vperm.slane %v1639_v34, %v3073_v29 }
0x1931   :  { %2057 = vmatpush.bf16.msrb.mxu2 %v3203_v61 }
0x1932   :  { %v1645_v43 = vsel %vm186_vm1, %v1644_v18, %v1643_v14 }
0x1933   :  { %v1646_v39 = vsel %vm191_vm2, %v1645_v43, %v1642_v52 }
0x1934   :  { %v1648_v16 = vsel %vm194_vm3, %v1646_v39, 0.0 }
0x1935   :  { %1649 = vadd.xlane.f32.xlu0 %v1648_v16  ;;  %2058 = vmatpush.bf16.msrb.mxu2 %v3232_v15 }
0x1939   :  { %2059 = vmatpush.bf16.msrb.mxu2 %v3253_v27 }
0x193d   :  { %2060 = vmatpush.bf16.msrb.mxu2 %v3271_v42  ;;  %v3883_v42 = vld [vmem:[%s4123_s1 + $0x8] sm:$0xff] }
0x1941   :  { %2061 = vmatpush.bf16.msrb.mxu2 %v3294_v9 }
0x19a8   :  { %v1650_v46 = vpop.xlane.xlu0 %1649 }
0x19a9   :  { %2829 = vrcp.f32 %v1650_v46 }
0x19ab   :  { %v1554_v61 = vpop.f32.mrf.mxu2 }
0x19ac   :  { %1805 = vrot.lane.b32.xlu0 %v1554_v61, %s2957_s22 }
0x19af   :  { %v2830_v63 = vpop.eup %2829 }
0x19b0   :  { %v1653_v37 = vperm.slane %v2830_v63, 0  ;;  %v1654_v49 = vperm.slane %v2830_v63, 1 }
0x19b2   :  { %v1658_v32 = vmul.f32 %v2824_v25, %v1653_v37  ;;  %v1657_v36 = vmul.f32 %v2822_v4, %v1653_v37  ;;  %v1660_v15 = vmul.f32 %v2828_v47, %v1654_v49  ;;  %v1659_v21 = vmul.f32 %v2826_v1, %v1654_v49  ;;  %v2931_v37 = vld [vmem:[%s4131_s9 + $0x30] sm:$0xff]  ;;  %v2936_v49 = vld [vmem:[%s4131_s9 + $0x8] sm:$0xff] }
0x19b3   :  { %v1556_v38 = vpop.f32.mrf.mxu2 }
0x19b4   :  { %1668 = vperm.xlu2 %2685, %v1658_v32   ;;  %1663 = vperm.xlu1 %2681, %v1657_v36   ;;  %v2932_v32 = vld [vmem:[%s4131_s9 + $0x28] sm:$0xff]  ;;  %v2934_v36 = vld [vmem:[%s4131_s9 + $0x18] sm:$0xff]  ;;  %v2935_v38 = vld [vmem:[%s4131_s9 + $0x10] sm:$0xff] }
0x19bc   :  { %1678 = vperm.xlu2 %2685, %v1660_v15   ;;  %1673 = vperm.xlu1 %2681, %v1659_v21   ;;  %v2937_v15 = vld [vmem:[%s4131_s9] sm:$0xff] }
0x19c4   :  { %1710 = vrot.lane.b32.xlu2 %v3781_v58, %s2961_s8 }
0x1a0e   :  { %v1669_v27 = vpop.permute.xlu2 %1668 }
0x1a0f   :  { %v1682_v9 = vmul.f32 %v3883_v42, %v1669_v27 }
0x1a11   :  { %v1686_v4 = vsel %vm166_vm0, %v1682_v9, 0.0 }
0x1a16   :  { %v1679_v25 = vpop.permute.xlu2 %1678 }
0x1a17   :  { %v1684_v55 = vmul.f32 %v3897_v22, %v1679_v25 }
0x1a19   :  { %v1695_v50 = vsel %vm166_vm0, %v1684_v55, 0.0 }
0x1a1e   :  { %v1711_v39 = vpop.permute.xlu2 %1710 }
0x1a26   :  { %v1664_v11 = vpop.permute.xlu1 %1663 }
0x1a27   :  { %v1681_v19 = vmul.f32 %v3889_v56, %v1664_v11 }
0x1a29   :  { %v1685_v58 = vsel %vm166_vm0, %v1681_v19, 0.0 }
0x1a2a   :  { %v1687_v1 = vadd.f32 %v1686_v4, %v1685_v58 }
0x1a2c   :  { %v1688_v47 = vrot.slane %v1687_v1, 4 }
0x1a2e   :  { %v1689_v2 = vadd.f32 %v1688_v47, %v1687_v1  ;;  %v1674_v48 = vpop.permute.xlu1 %1673 }
0x1a2f   :  { %v1683_v60 = vmul.f32 %v3903_v6, %v1674_v48 }
0x1a30   :  { %v1690_v57 = vrot.slane %v1689_v2, 2 }
0x1a31   :  { %v1694_v5 = vsel %vm166_vm0, %v1683_v60, 0.0 }
0x1a32   :  { %v1696_v23 = vadd.f32 %v1695_v50, %v1694_v5  ;;  %v1691_v31 = vadd.f32 %v1690_v57, %v1689_v2 }
0x1a34   :  { %v1697_v26 = vrot.slane %v1696_v23, 4  ;;  %v1692_v34 = vrot.slane %v1691_v31, 1 }
0x1a36   :  { %v1698_v45 = vadd.f32 %v1697_v26, %v1696_v23  ;;  %v1693_v14 = vadd.f32 %v1692_v34, %v1691_v31 }
0x1a38   :  { %v1699_v59 = vrot.slane %v1698_v45, 2 }
0x1a3a   :  { %v1700_v10 = vadd.f32 %v1699_v59, %v1698_v45 }
0x1a3c   :  { %v1701_v12 = vrot.slane %v1700_v10, 1 }
0x1a3e   :  { %v1702_v18 = vadd.f32 %v1701_v12, %v1700_v10 }
0x1a40   :  { %v1705_v52 = vsel %vm191_vm2, %v1702_v18, %v1693_v14 }
0x1a41   :  { %1706 = vrot.lane.b32.xlu1 %v1705_v52, %s2958_s18 }
0x1ab3   :  { %v1707_v43 = vpop.permute.xlu1 %1706 }
0x1ab4   :  { %v1713_v16 = vsel %vm300_vm6, %v1554_v61, %v1707_v43  ;;  %v2933_v61 = vld [vmem:[%s4131_s9 + $0x20] sm:$0xff] }
0x1ab5   :  { %v1714_v46 = vsel %vm302_vm7, %v1713_v16, %v1711_v39 }
0x1ab6   :  { %v1715_v63 = vpack.c.bf16 %v1714_v46, %v1714_v46 }
0x1ab8   :  { %2613 = vmatmul.msk.bf16.vlgmr.msra.gmra.mxu2 %vm380_vm8, %v1715_v63  ;;  %2614 = vmatmul.msk.bf16.vlgmr.msra.gmra.mxu3 %vm380_vm8, %v1715_v63 }
0x1ab9   :  { %2137 = vmatpush.bf16.msra.mxu3 %v2931_v37  ;;  %2459 = vmatpush.bf16.msra.mxu2 %v2931_v37 }
0x1abd   :  { %2138 = vmatpush.bf16.msra.mxu3 %v2932_v32  ;;  %2460 = vmatpush.bf16.msra.mxu2 %v2932_v32 }
0x1ac1   :  { %2139 = vmatpush.bf16.msra.mxu3 %v2933_v61  ;;  %2461 = vmatpush.bf16.msra.mxu2 %v2933_v61 }
0x1ac5   :  { %2140 = vmatpush.bf16.msra.mxu3 %v2934_v36  ;;  %2462 = vmatpush.bf16.msra.mxu2 %v2934_v36 }
0x1ac9   :  { %2141 = vmatpush.bf16.msra.mxu3 %v2935_v38  ;;  %2463 = vmatpush.bf16.msra.mxu2 %v2935_v38 }
0x1acd   :  { %2142 = vmatpush.bf16.msra.mxu3 %v2936_v49  ;;  %2464 = vmatpush.bf16.msra.mxu2 %v2936_v49 }
0x1ad1   :  { %2143 = vmatpush.bf16.msra.mxu3 %v2937_v15  ;;  %2465 = vmatpush.bf16.msra.mxu2 %v2937_v15 }
0x1b3b   :  { %v1728_v21 = vpop.f32.mrf.mxu2  ;;  %v1741_v27 = vpop.f32.mrf.mxu3 }
0x1b3c   :  { %v1742_v9 = vadd.f32 %v1741_v27, %v3327_v20  ;;  %v1729_v58 = vadd.f32 %v1728_v21, %v3331_v30  ;;  %v1806_v27 = vpop.permute.xlu0 %1805 }
0x1b3e   :  { %2831 = vtanh.f32 %v1742_v9  ;;  %v2615_v25 = vmul.f32 -1.442695, %v1729_v58  ;;  %v2616_v18 = vmul.f32 -1.442695, %v1742_v9  ;;  %v3961_v58 = vld [vmem:[%s4132_s10] ss:$0 sm:$0xff] }
0x1b3f   :  { %s2619_s10 = sld [smem:[#allocation3 + $0x4]] }
0x1b40   :  { %2833 = vpow2.f32 %v2615_v25 }
0x1b43   :  { %v1730_v11 = vpop.f32.mrf.mxu2  ;;  %v1743_v19 = vpop.f32.mrf.mxu3 }
0x1b44   :  { %v2832_v4 = vpop.eup %2831 }
0x1b45   :  { %1786 = vrot.lane.b32.xlu1 %v2832_v4, %s2959_s28  ;;  %p1852_p4 = scmp.eq.s32.totalorder %s2619_s10, 1 }
0x1b46   :  { %v2834_v1 = vpop.eup %2833 }
0x1b47   :  { %v1751_v47 = vadd.f32 1.0, %v2834_v1  ;;  %s1853_s30 = scalar_select %p1852_p4, 1, 0 }
0x1b49   :  { %2835 = vrcp.f32 %v1751_v47  ;;  %v1764_v5 = vand.u32 2147483648, %v1751_v47  ;;  %vm1758_vm12 = vweird.f32 %v1751_v47  ;;  %v1762_v57 = vand.u32 2147483647, %v1751_v47 }
0x1b4b   :  { %v1765_v26 = vor.u32 1.1754944e-38, %v1764_v5  ;;  %vm1763_vm14 = vcmp.eq.f32.partialorder %v1762_v57, 8.507059e+37 }
0x1b4f   :  { %v2836_v55 = vpop.eup %2835 }
0x1b50   :  { %v1754_v2 = vmul.f32 %v2836_v55, %v1751_v47  ;;  %vm1759_vm4 = vweird.f32 %v2836_v55 }
0x1b51   :  { %vm1760_vm13 = vmor %vm1758_vm12, %vm1759_vm4 }
0x1b52   :  { %v1755_v48 = vsub.f32 1.0, %v1754_v2 }
0x1b54   :  { %v1756_v60 = vmul.f32 %v2836_v55, %v1755_v48 }
0x1b56   :  { %v1757_v50 = vadd.f32 %v2836_v55, %v1756_v60 }
0x1b58   :  { %v1761_v23 = vsel %vm1760_vm13, %v2836_v55, %v1757_v50 }
0x1b59   :  { %v1766_v45 = vsel %vm1763_vm14, %v1765_v26, %v1761_v23 }
0x1b5a   :  { %v1784_v10 = vmul.f32 %v1766_v45, %v3777_v17 }
0x1bb7   :  { %v1787_v31 = vpop.permute.xlu1 %1786 }
0x1bb8   :  { %v1789_v59 = vmul.f32 %v1787_v31, %v1766_v45 }
0x1bba   :  { %1791 = vrot.lane.b32.xlu2 %v1789_v59, %s2959_s28 }
0x1bc2   :  { %1801 = vrot.lane.b32.xlu2 %v1705_v52, %s2959_s28 }
0x1c14   :  { %v1792_v34 = vpop.permute.xlu2 %1791 }
0x1c15   :  { %v3941_v12 = vadd.f32 %v1792_v34, %v1784_v10 }
0x1c17   :  { %2837 = vtanh.f32 %v3941_v12 }
0x1c18   :  { %2839 = vpow2.f32 %v2616_v18 }
0x1c1c   :  { %v1802_v21 = vpop.permute.xlu2 %1801 }
0x1c1d   :  { %v2838_v14 = vpop.eup %2837 }
0x1c1e   :  { %1797 = vrot.lane.b32.xlu1 %v2838_v14, %s2959_s28  ;;  %v2840_v43 = vpop.eup %2839 }
0x1c1f   :  { %v1752_v39 = vadd.f32 1.0, %v2840_v43 }
0x1c21   :  { %2841 = vrcp.f32 %v1752_v39  ;;  %v1779_v17 = vand.u32 2147483648, %v1752_v39  ;;  %vm1773_vm4 = vweird.f32 %v1752_v39  ;;  %v1777_v32 = vand.u32 2147483647, %v1752_v39 }
0x1c23   :  { %v1780_v36 = vor.u32 1.1754944e-38, %v1779_v17  ;;  %vm1778_vm13 = vcmp.eq.f32.partialorder %v1777_v32, 8.507059e+37 }
0x1c27   :  { %v2842_v16 = vpop.eup %2841 }
0x1c28   :  { %v1769_v46 = vmul.f32 %v2842_v16, %v1752_v39  ;;  %vm1774_vm15 = vweird.f32 %v2842_v16 }
0x1c29   :  { %vm1775_vm12 = vmor %vm1773_vm4, %vm1774_vm15 }
0x1c2a   :  { %v1770_v63 = vsub.f32 1.0, %v1769_v46 }
0x1c2c   :  { %v1771_v37 = vmul.f32 %v2842_v16, %v1770_v63 }
0x1c2e   :  { %v1772_v52 = vadd.f32 %v2842_v16, %v1771_v37 }
0x1c30   :  { %v1776_v61 = vsel %vm1775_vm12, %v2842_v16, %v1772_v52 }
0x1c31   :  { %v1781_v38 = vsel %vm1778_vm13, %v1780_v36, %v1776_v61 }
0x1c90   :  { %v1798_v49 = vpop.permute.xlu1 %1797 }
0x1c91   :  { %v3945_v15 = vmul.f32 %v1798_v49, %v1781_v38 }
0x1c93   :  { %v1808_v9 = vsel %vm129_vm5, %v3945_v15, %v1802_v21 }
0x1c94   :  { %v1809_v11 = vsel %vm474_vm9, %v1808_v9, %v1806_v27 }
0x1c95   :  { %v1810_v19 = vpack.c.bf16 %v1809_v11, %v1809_v11 }
0x1c97   :  { %2617 = vmatmul.msk.bf16.vlgmr.msrb.gmra.mxu0 %vm380_vm8, %v1810_v19 }
0x1c98   :  { %2364 = vmatpush.bf16.msrb.mxu0 %v3153_v35 }
0x1c9c   :  { %2365 = vmatpush.bf16.msrb.mxu0 %v3178_v44 }
0x1ca0   :  { %2366 = vmatpush.bf16.msrb.mxu0 %v3198_v53 }
0x1ca4   :  { %2367 = vmatpush.bf16.msrb.mxu0 %v3228_v13 }
0x1ca8   :  { %2368 = vmatpush.bf16.msrb.mxu0 %v3248_v24 }
0x1cac   :  { %2369 = vmatpush.bf16.msrb.mxu0 %v3268_v41 }
0x1cb0   :  { %2370 = vmatpush.bf16.msrb.mxu0 %v3289_v7 }
0x1d14   :  { %v1823_v4 = vpop.f32.mrf.mxu0 }
0x1d15   :  { %v1824_v35 = vadd.f32 %v3961_v58, %v1823_v4 }
0x1d17   :  { %2618 = vst [vmem:[%s4133_s11 + $0x8] sm:$0x3] %v1824_v35  ;;  %v1882_v44 = vperm.slane %v1824_v35, 0  ;;  %v1881_v53 = vrot.slane %v1824_v35, 1  ;;  %v1829_v41 = vsel %vm539_vm10, %v1824_v35, -inf }
0x1d18   :  { %v1830_v7 = vsel %vm541_vm11, %v1829_v41, -inf }
0x1d19   :  { %1884 = vrot.lane.b32.xlu1 %v1882_v44, %s2959_s28  ;;  %v1883_v13 = vperm.slane %v1881_v53, 0 }
0x1d1b   :  { %1886 = vrot.lane.b32.xlu2 %v1883_v13, %s2959_s28 }
0x1d1c   :  { %v1825_v24 = vpop.f32.mrf.mxu0 }
0x1d43   :  { %1831 = vmax.xlane.f32.xlu1 %v1830_v7 }
0x1d75   :  { %v1887_v25 = vpop.permute.xlu2 %1886 }
0x1d76   :  { %v1892_v1 = vadd.f32 %v3806_v62, %v1887_v25  ;;  %v1893_v5 = vadd.f32 %v3831_v54, %v1887_v25 }
0x1d78   :  { %2843 = vtanh.f32 %v1892_v1 }
0x1d7e   :  { %v2844_v47 = vpop.eup %2843 }
0x1d7f   :  { %v1900_v55 = vmul.f32 %v3812_v33, %v2844_v47 }
0x1d81   :  { %v1908_v2 = vsel %vm166_vm0, %v1900_v55, 0.0 }
0x1d82   :  { %1909 = vadd.xlane.f32.xlu1 %v1908_v2 }
0x1d8b   :  { %v1885_v48 = vpop.permute.xlu1 %1884 }
0x1d8c   :  { %v1890_v60 = vadd.f32 %v3819_v51, %v1885_v48  ;;  %v1891_v50 = vadd.f32 %v3825_v8, %v1885_v48 }
0x1d8e   :  { %2845 = vtanh.f32 %v1890_v60 }
0x1d8f   :  { %2847 = vtanh.f32 %v1891_v50 }
0x1d90   :  { %2849 = vtanh.f32 %v1893_v5  ;;  %v2965_v5 = vmov 5  }
0x1d94   :  { %v2846_v57 = vpop.eup %2845 }
0x1d95   :  { %v2848_v23 = vpop.eup %2847  ;;  %v1898_v26 = vmul.f32 %v3812_v33, %v2846_v57 }
0x1d96   :  { %v1899_v31 = vmul.f32 %v3812_v33, %v2848_v23  ;;  %v2850_v59 = vpop.eup %2849  ;;  %v1854_v23 = vstv %s1853_s30 }
0x1d97   :  { %v1902_v45 = vsel %vm166_vm0, %v1898_v26, 0.0  ;;  %v1901_v34 = vmul.f32 %v3812_v33, %v2850_v59  ;;  %vm1855_vm12 = vcmp.eq.s32.totalorder %v1854_v23, 1 }
0x1d98   :  { %v1905_v10 = vsel %vm166_vm0, %v1899_v31, 0.0  ;;  %1903 = vadd.xlane.f32.xlu2 %v1902_v45 }
0x1d99   :  { %1906 = vadd.xlane.f32.xlu0 %v1905_v10  ;;  %v1911_v14 = vsel %vm166_vm0, %v1901_v34, 0.0 }
0x1da0   :  { %1912 = vadd.xlane.f32.xlu2 %v1911_v14 }
0x1db6   :  { %v1832_v18 = vpop.xlane.xlu1 %1831 }
0x1db7   :  { %vm1833_vm14 = vcmp.eq.f32.partialorder %v1829_v41, %v1832_v18 }
0x1db8   :  { %vm1834_vm15 = vmand %vm1833_vm14, %vm539_vm10 }
0x1db9   :  { %v1835_v43 = vsel %vm1834_vm15, %v3070_v28, 128 }
0x1dba   :  { %v1836_v39 = vsel %vm541_vm11, %v1835_v43, 2147483647 }
0x1dbb   :  { %v1838_v16 = vshra.s32 %v1836_v39, 16  ;;  %v1837_v9 = vand.u32 65535, %v1836_v39 }
0x1dbd   :  { %v1840_v46 = vcvt.s32.f32 %v1838_v16  ;;  %v1839_v19 = vcvt.s32.f32 %v1837_v9 }
0x1dbf   :  { %1841 = vmin.xlane.f32.xlu1 %v1840_v46 }
0x1df5   :  { %v1910_v52 = vpop.xlane.xlu1 %1909 }
0x1df6   :  { %v1921_v61 = vperm.slane %v1910_v52, %v3070_v28 }
0x1e0b   :  { %v1904_v63 = vpop.xlane.xlu2 %1903 }
0x1e0c   :  { %v1907_v37 = vpop.xlane.xlu0 %1906  ;;  %v1918_v17 = vperm.slane %v1904_v63, %v3070_v28 }
0x1e0d   :  { %v1919_v33 = vperm.slane %v1907_v37, %v3073_v29 }
0x1e0f   :  { %v1920_v38 = vsel %vm186_vm1, %v1919_v33, %v1918_v17 }
0x1e13   :  { %v1913_v32 = vpop.xlane.xlu2 %1912 }
0x1e14   :  { %v1922_v36 = vperm.slane %v1913_v32, %v3073_v29 }
0x1e16   :  { %v1923_v49 = vsel %vm186_vm1, %v1922_v36, %v1921_v61 }
0x1e17   :  { %v1924_v21 = vsel %vm191_vm2, %v1923_v49, %v1920_v38 }
0x1e18   :  { %v1926_v27 = vsel %vm194_vm3, %v1924_v21, -inf }
0x1e19   :  { %1927 = vmax.xlane.f32.xlu0 %v1926_v27 }
0x1e32   :  { %v1842_v11 = vpop.xlane.xlu1 %1841 }
0x1e33   :  { %vm1843_vm4 = vcmp.eq.f32.partialorder %v1840_v46, %v1842_v11  ;;  %v1848_v57 = vcvt.f32.s32 %v1842_v11 }
0x1e34   :  { %v1844_v4 = vsel %vm1843_vm4, %v1839_v19, inf }
0x1e35   :  { %1845 = vmin.xlane.f32.xlu2 %v1844_v4  ;;  %v1849_v31 = vshll.u32 %v1848_v57, 16 }
0x1e8c   :  { %v1928_v35 = vpop.xlane.xlu0 %1927 }
0x1e8d   :  { %v1930_v44 = vperm.slane %v1928_v35, 0  ;;  %v1931_v53 = vperm.slane %v1928_v35, 1 }
0x1e8f   :  { %v1934_v13 = vsub.f32 %v1904_v63, %v1930_v44  ;;  %v1935_v24 = vsub.f32 %v1907_v37, %v1930_v44  ;;  %v1936_v41 = vsub.f32 %v1910_v52, %v1931_v53  ;;  %v1937_v47 = vsub.f32 %v1913_v32, %v1931_v53 }
0x1e91   :  { %v1938_v7 = vmul.f32 1.442695, %v1934_v13  ;;  %v1940_v25 = vmul.f32 1.442695, %v1935_v24  ;;  %v1942_v1 = vmul.f32 1.442695, %v1936_v41 }
0x1e92   :  { %v1944_v55 = vmul.f32 1.442695, %v1937_v47 }
0x1e93   :  { %2851 = vpow2.f32 %v1938_v7 }
0x1e94   :  { %2853 = vpow2.f32 %v1940_v25 }
0x1e95   :  { %2855 = vpow2.f32 %v1942_v1 }
0x1e96   :  { %2857 = vpow2.f32 %v1944_v55 }
0x1e99   :  { %v2852_v2 = vpop.eup %2851 }
0x1e9a   :  { %v2854_v48 = vpop.eup %2853  ;;  %1951 = vperm.xlu1 %2681, %v2852_v2  }
0x1e9b   :  { %v2856_v60 = vpop.eup %2855  ;;  %1954 = vperm.xlu0 %2676, %v2854_v48  }
0x1e9c   :  { %1957 = vperm.xlu2 %2685, %v2856_v60   ;;  %v2858_v50 = vpop.eup %2857 }
0x1ea2   :  { %2686 = vset.pattern.permute.xlu1 %v2965_v5 }
0x1ea3   :  { %1960 = vperm.xlu0 %2676, %v2858_v50  }
0x1ea8   :  { %v1846_v26 = vpop.xlane.xlu2 %1845 }
0x1ea9   :  { %v1847_v45 = vcvt.f32.s32 %v1846_v26 }
0x1eab   :  { %v1850_v59 = vadd.s32 %v1849_v31, %v1847_v45 }
0x1ead   :  { %v1856_v10 = vsel %vm1855_vm12, %v3855_v3, %v1850_v59 }
0x1eae   :  { %1858 = vperm.xlu1 %2686, %v1856_v10  }
0x1eb6   :  { %2687 = vset.pattern.permute.xlu1 %v2955_v40 }
0x1ef6   :  { %v1958_v18 = vpop.permute.xlu2 %1957 }
0x1ef7   :  { %v1965_v46 = vperm.slane %v1958_v18, %v3070_v28 }
0x1f0c   :  { %v1952_v14 = vpop.permute.xlu1 %1951 }
0x1f0d   :  { %v1955_v34 = vpop.permute.xlu0 %1954  ;;  %v1962_v39 = vperm.slane %v1952_v14, %v3070_v28 }
0x1f0e   :  { %v1963_v43 = vperm.slane %v1955_v34, %v3073_v29 }
0x1f10   :  { %v1964_v37 = vsel %vm186_vm1, %v1963_v43, %v1962_v39 }
0x1f15   :  { %v1961_v16 = vpop.permute.xlu0 %1960 }
0x1f16   :  { %v1966_v63 = vperm.slane %v1961_v16, %v3073_v29 }
0x1f18   :  { %v1967_v52 = vsel %vm186_vm1, %v1966_v63, %v1965_v46 }
0x1f19   :  { %v1968_v33 = vsel %vm191_vm2, %v1967_v52, %v1964_v37 }
0x1f1a   :  { %v1970_v17 = vsel %vm194_vm3, %v1968_v33, 0.0 }
0x1f1b   :  { %1971 = vadd.xlane.f32.xlu2 %v1970_v17 }
0x1f20   :  { %v1859_v32 = vpop.permute.xlu1 %1858 }
0x1f21   :  { %vm1860_vm13 = vcmp.eq.s32.totalorder %v3070_v28, %v1859_v32 }
0x1f22   :  { %v2620_v61 = vsel %vm1860_vm13, 1.0, %v2956_v0 }
0x1f23   :  { %v1863_v36 = vpack.c.bf16 %v2620_v61, %v2620_v61 }
0x1f25   :  { %2621 = vmatmul.msk.bf16.vlgmr.msrb.gmra.mxu3 %vm129_vm5, %v1863_v36 }
0x1f8e   :  { %v1972_v38 = vpop.xlane.xlu2 %1971 }
0x1f8f   :  { %2859 = vrcp.f32 %v1972_v38 }
0x1f95   :  { %v2860_v49 = vpop.eup %2859 }
0x1f96   :  { %v1975_v21 = vperm.slane %v2860_v49, 0  ;;  %v1976_v11 = vperm.slane %v2860_v49, 1 }
0x1f98   :  { %v1980_v27 = vmul.f32 %v2854_v48, %v1975_v21  ;;  %v1979_v9 = vmul.f32 %v2852_v2, %v1975_v21  ;;  %v1982_v19 = vmul.f32 %v2858_v50, %v1976_v11  ;;  %v1981_v4 = vmul.f32 %v2856_v60, %v1976_v11 }
0x1f9a   :  { %1990 = vperm.xlu1 %2687, %v1980_v27   ;;  %1985 = vperm.xlu0 %2676, %v1979_v9  }
0x1fa2   :  { %2000 = vperm.xlu1 %2687, %v1982_v19   ;;  %1995 = vperm.xlu0 %2676, %v1981_v4  }
0x1fa8   :  { %v1876_v35 = vpop.f32.mrf.mxu3 }
0x1fa9   :  { %2127 = vrot.lane.b32.xlu2 %v1876_v35, %s2957_s22 }
0x1faa   :  { %2032 = vrot.lane.b32.xlu1 %v3945_v15, %s2961_s8 }
0x1fb0   :  { %v1878_v44 = vpop.f32.mrf.mxu3 }
0x200c   :  { %v1986_v53 = vpop.permute.xlu0 %1985  ;;  %v1991_v13 = vpop.permute.xlu1 %1990 }
0x200d   :  { %v2003_v24 = vmul.f32 %v3889_v56, %v1986_v53  ;;  %v2004_v41 = vmul.f32 %v3883_v42, %v1991_v13 }
0x200f   :  { %v2007_v7 = vsel %vm166_vm0, %v2003_v24, 0.0  ;;  %v2008_v25 = vsel %vm166_vm0, %v2004_v41, 0.0 }
0x2010   :  { %v2009_v1 = vadd.f32 %v2008_v25, %v2007_v7 }
0x2012   :  { %v2010_v47 = vrot.slane %v2009_v1, 4 }
0x2014   :  { %v2011_v55 = vadd.f32 %v2010_v47, %v2009_v1  ;;  %v1996_v2 = vpop.permute.xlu0 %1995  ;;  %v2001_v48 = vpop.permute.xlu1 %2000 }
0x2015   :  { %v2005_v60 = vmul.f32 %v3903_v6, %v1996_v2  ;;  %v2006_v15 = vmul.f32 %v3897_v22, %v2001_v48 }
0x2016   :  { %v2012_v57 = vrot.slane %v2011_v55, 2 }
0x2017   :  { %v2016_v50 = vsel %vm166_vm0, %v2005_v60, 0.0  ;;  %v2017_v5 = vsel %vm166_vm0, %v2006_v15, 0.0 }
0x2018   :  { %v2018_v23 = vadd.f32 %v2017_v5, %v2016_v50  ;;  %v2013_v31 = vadd.f32 %v2012_v57, %v2011_v55 }
0x201a   :  { %v2019_v26 = vrot.slane %v2018_v23, 4  ;;  %v2014_v10 = vrot.slane %v2013_v31, 1 }
0x201c   :  { %v2020_v45 = vadd.f32 %v2019_v26, %v2018_v23  ;;  %v2015_v18 = vadd.f32 %v2014_v10, %v2013_v31  ;;  %v2033_v46 = vpop.permute.xlu1 %2032 }
0x201e   :  { %v2021_v59 = vrot.slane %v2020_v45, 2 }
0x2020   :  { %v2022_v34 = vadd.f32 %v2021_v59, %v2020_v45 }
0x2022   :  { %v2023_v14 = vrot.slane %v2022_v34, 1 }
0x2024   :  { %v2024_v43 = vadd.f32 %v2023_v14, %v2022_v34 }
0x2026   :  { %v2027_v39 = vsel %vm191_vm2, %v2024_v43, %v2015_v18 }
0x2027   :  { %2028 = vrot.lane.b32.xlu0 %v2027_v39, %s2958_s18 }
0x2099   :  { %v2029_v16 = vpop.permute.xlu0 %2028 }
0x209a   :  { %v2035_v63 = vsel %vm300_vm6, %v1876_v35, %v2029_v16 }
0x209b   :  { %v2036_v37 = vsel %vm302_vm7, %v2035_v63, %v2033_v46 }
0x209c   :  { %v2037_v52 = vpack.c.bf16 %v2036_v37, %v2036_v37 }
0x209e   :  { %2622 = vmatmul.msk.bf16.vlgmr.msra.gmra.mxu1 %vm380_vm8, %v2037_v52  ;;  %2623 = vmatmul.msk.bf16.vlgmr.msrb.gmra.mxu2 %vm380_vm8, %v2037_v52 }
0x211b   :  { %v2050_v33 = vpop.f32.mrf.mxu1 }
0x211c   :  { %v2051_v49 = vadd.f32 %v2050_v33, %v3331_v30 }
0x211e   :  { %v2624_v21 = vmul.f32 -1.442695, %v2051_v49 }
0x2121   :  { %v2063_v17 = vpop.f32.mrf.mxu2 }
0x2122   :  { %v2064_v32 = vadd.f32 %v2063_v17, %v3327_v20 }
0x2123   :  { %v2052_v61 = vpop.f32.mrf.mxu1 }
0x2124   :  { %2861 = vtanh.f32 %v2064_v32  ;;  %v2625_v60 = vmul.f32 -1.442695, %v2064_v32 }
0x2125   :  { %2863 = vpow2.f32 %v2624_v21 }
0x2129   :  { %v2065_v36 = vpop.f32.mrf.mxu2 }
0x212a   :  { %v2862_v38 = vpop.eup %2861 }
0x212b   :  { %2108 = vrot.lane.b32.xlu0 %v2862_v38, %s2959_s28  ;;  %v2864_v27 = vpop.eup %2863 }
0x212c   :  { %v2073_v9 = vadd.f32 1.0, %v2864_v27 }
0x212e   :  { %2865 = vrcp.f32 %v2073_v9  ;;  %v2086_v53 = vand.u32 2147483648, %v2073_v9  ;;  %vm2080_vm15 = vweird.f32 %v2073_v9  ;;  %v2084_v13 = vand.u32 2147483647, %v2073_v9 }
0x2130   :  { %v2087_v41 = vor.u32 1.1754944e-38, %v2086_v53  ;;  %vm2085_vm12 = vcmp.eq.f32.partialorder %v2084_v13, 8.507059e+37 }
0x2134   :  { %v2866_v11 = vpop.eup %2865 }
0x2135   :  { %v2076_v19 = vmul.f32 %v2866_v11, %v2073_v9  ;;  %vm2081_vm14 = vweird.f32 %v2866_v11 }
0x2136   :  { %vm2082_vm4 = vmor %vm2080_vm15, %vm2081_vm14 }
0x2137   :  { %v2077_v4 = vsub.f32 1.0, %v2076_v19 }
0x2139   :  { %v2078_v35 = vmul.f32 %v2866_v11, %v2077_v4 }
0x213b   :  { %v2079_v44 = vadd.f32 %v2866_v11, %v2078_v35 }
0x213d   :  { %v2083_v24 = vsel %vm2082_vm4, %v2866_v11, %v2079_v44  ;;  %v2939_v44 = vld [vmem:[%s4127_s5] ss:$0 sm:$0xff]  ;;  %s2628_s5 = sld [smem:[#allocation3 + $0x5]] }
0x213e   :  { %v2088_v25 = vsel %vm2085_vm12, %v2087_v41, %v2083_v24 }
0x213f   :  { %v2106_v47 = vmul.f32 %v2088_v25, %v3941_v12 }
0x2143   :  { %p2174_p5 = scmp.eq.s32.totalorder %s2628_s5, 1 }
0x2145   :  { %s2175_s15 = scalar_select %p2174_p5, 1, 0 }
0x219d   :  { %v2109_v7 = vpop.permute.xlu0 %2108 }
0x219e   :  { %v2111_v1 = vmul.f32 %v2109_v7, %v2088_v25 }
0x21a0   :  { %2113 = vrot.lane.b32.xlu1 %v2111_v1, %s2959_s28 }
0x21a8   :  { %2123 = vrot.lane.b32.xlu1 %v2027_v39, %s2959_s28  ;;  %v2128_v39 = vpop.permute.xlu2 %2127 }
0x2212   :  { %v2114_v55 = vpop.permute.xlu1 %2113 }
0x2213   :  { %v4032_v2 = vadd.f32 %v2114_v55, %v2106_v47 }
0x2215   :  { %2867 = vtanh.f32 %v4032_v2 }
0x2216   :  { %2869 = vpow2.f32 %v2625_v60 }
0x221a   :  { %v2124_v43 = vpop.permute.xlu1 %2123 }
0x221b   :  { %v2868_v48 = vpop.eup %2867 }
0x221c   :  { %2119 = vrot.lane.b32.xlu0 %v2868_v48, %s2959_s28  ;;  %v2870_v15 = vpop.eup %2869 }
0x221d   :  { %v2074_v50 = vadd.f32 1.0, %v2870_v15 }
0x221f   :  { %2871 = vrcp.f32 %v2074_v50  ;;  %v2101_v12 = vand.u32 2147483648, %v2074_v50  ;;  %vm2095_vm14 = vweird.f32 %v2074_v50  ;;  %v2099_v45 = vand.u32 2147483647, %v2074_v50 }
0x2221   :  { %v2102_v10 = vor.u32 1.1754944e-38, %v2101_v12  ;;  %vm2100_vm4 = vcmp.eq.f32.partialorder %v2099_v45, 8.507059e+37 }
0x2225   :  { %v2872_v5 = vpop.eup %2871 }
0x2226   :  { %v2091_v57 = vmul.f32 %v2872_v5, %v2074_v50  ;;  %vm2096_vm13 = vweird.f32 %v2872_v5 }
0x2227   :  { %vm2097_vm15 = vmor %vm2095_vm14, %vm2096_vm13 }
0x2228   :  { %v2092_v23 = vsub.f32 1.0, %v2091_v57 }
0x222a   :  { %v2093_v26 = vmul.f32 %v2872_v5, %v2092_v23 }
0x222c   :  { %v2094_v31 = vadd.f32 %v2872_v5, %v2093_v26 }
0x222e   :  { %v2098_v59 = vsel %vm2097_vm15, %v2872_v5, %v2094_v31 }
0x222f   :  { %v2103_v34 = vsel %vm2100_vm4, %v2102_v10, %v2098_v59 }
0x228e   :  { %v2120_v14 = vpop.permute.xlu0 %2119 }
0x228f   :  { %v4036_v18 = vmul.f32 %v2120_v14, %v2103_v34 }
0x2291   :  { %v2130_v16 = vsel %vm129_vm5, %v4036_v18, %v2124_v43 }
0x2292   :  { %v2131_v46 = vsel %vm474_vm9, %v2130_v16, %v2128_v39 }
0x2293   :  { %v2132_v63 = vpack.c.bf16 %v2131_v46, %v2131_v46 }
0x2295   :  { %2626 = vmatmul.msk.bf16.vlgmr.msra.gmra.mxu3 %vm380_vm8, %v2132_v63 }
0x2318   :  { %v2145_v37 = vpop.f32.mrf.mxu3 }
0x2319   :  { %v2146_v52 = vadd.f32 %v3961_v58, %v2145_v37 }
0x231b   :  { %2627 = vst [vmem:[%s4133_s11 + $0xa] sm:$0x3] %v2146_v52  ;;  %v2204_v33 = vperm.slane %v2146_v52, 0  ;;  %v2203_v17 = vrot.slane %v2146_v52, 1  ;;  %v2151_v36 = vsel %vm539_vm10, %v2146_v52, -inf }
0x231c   :  { %v2152_v38 = vsel %vm541_vm11, %v2151_v36, -inf }
0x231d   :  { %2206 = vrot.lane.b32.xlu0 %v2204_v33, %s2959_s28  ;;  %v2205_v32 = vperm.slane %v2203_v17, 0 }
0x231f   :  { %2208 = vrot.lane.b32.xlu1 %v2205_v32, %s2959_s28 }
0x2320   :  { %v2147_v61 = vpop.f32.mrf.mxu3 }
0x2347   :  { %2153 = vmax.xlane.f32.xlu0 %v2152_v38 }
0x238f   :  { %v2207_v49 = vpop.permute.xlu0 %2206 }
0x2390   :  { %v2212_v21 = vadd.f32 %v3819_v51, %v2207_v49  ;;  %v2213_v27 = vadd.f32 %v3825_v8, %v2207_v49 }
0x2391   :  { %v2209_v9 = vpop.permute.xlu1 %2208 }
0x2392   :  { %2873 = vtanh.f32 %v2212_v21  ;;  %v2214_v11 = vadd.f32 %v3806_v62, %v2209_v9  ;;  %v2215_v19 = vadd.f32 %v3831_v54, %v2209_v9 }
0x2393   :  { %2875 = vtanh.f32 %v2213_v27 }
0x2394   :  { %2877 = vtanh.f32 %v2214_v11 }
0x2395   :  { %2879 = vtanh.f32 %v2215_v19 }
0x2398   :  { %v2874_v4 = vpop.eup %2873 }
0x2399   :  { %v2876_v35 = vpop.eup %2875  ;;  %v2220_v53 = vmul.f32 %v2939_v44, %v2874_v4  ;;  %v2176_v4 = vstv %s2175_s15 }
0x239a   :  { %v2878_v13 = vpop.eup %2877  ;;  %v2221_v51 = vmul.f32 %v2939_v44, %v2876_v35 }
0x239b   :  { %v2224_v8 = vsel %vm166_vm0, %v2220_v53, 0.0  ;;  %v2222_v24 = vmul.f32 %v2939_v44, %v2878_v13  ;;  %v2880_v41 = vpop.eup %2879  ;;  %v2966_v13 = vmov 6  }
0x239c   :  { %v2227_v62 = vsel %vm166_vm0, %v2221_v51, 0.0  ;;  %2225 = vadd.xlane.f32.xlu1 %v2224_v8  ;;  %v2223_v7 = vmul.f32 %v2939_v44, %v2880_v41 }
0x239d   :  { %2228 = vadd.xlane.f32.xlu2 %v2227_v62  ;;  %v2230_v54 = vsel %vm166_vm0, %v2222_v24, 0.0 }
0x239e   :  { %2231 = vadd.xlane.f32.xlu0 %v2230_v54  ;;  %v2233_v25 = vsel %vm166_vm0, %v2223_v7, 0.0 }
0x23a4   :  { %2234 = vadd.xlane.f32.xlu1 %v2233_v25 }
0x23ba   :  { %v2154_v1 = vpop.xlane.xlu0 %2153 }
0x23bb   :  { %vm2155_vm12 = vcmp.eq.f32.partialorder %v2151_v36, %v2154_v1 }
0x23bc   :  { %vm2156_vm13 = vmand %vm2155_vm12, %vm539_vm10 }
0x23bd   :  { %v2157_v47 = vsel %vm2156_vm13, %v3070_v28, 128 }
0x23be   :  { %v2158_v55 = vsel %vm541_vm11, %v2157_v47, 2147483647  ;;  %vm2177_vm11 = vcmp.eq.s32.totalorder %v2176_v4, 1 }
0x23bf   :  { %v2160_v48 = vshra.s32 %v2158_v55, 16  ;;  %v2159_v14 = vand.u32 65535, %v2158_v55 }
0x23c1   :  { %v2162_v60 = vcvt.s32.f32 %v2160_v48  ;;  %v2161_v39 = vcvt.s32.f32 %v2159_v14 }
0x23c3   :  { %2163 = vmin.xlane.f32.xlu0 %v2162_v60 }
0x240f   :  { %v2226_v15 = vpop.xlane.xlu1 %2225 }
0x2410   :  { %v2229_v50 = vpop.xlane.xlu2 %2228  ;;  %v2240_v23 = vperm.slane %v2226_v15, %v3070_v28 }
0x2411   :  { %v2232_v5 = vpop.xlane.xlu0 %2231  ;;  %v2241_v57 = vperm.slane %v2229_v50, %v3073_v29 }
0x2412   :  { %v2243_v31 = vperm.slane %v2232_v5, %v3070_v28 }
0x2413   :  { %v2242_v45 = vsel %vm186_vm1, %v2241_v57, %v2240_v23 }
0x2417   :  { %v2235_v26 = vpop.xlane.xlu1 %2234 }
0x2418   :  { %v2244_v12 = vperm.slane %v2235_v26, %v3073_v29 }
0x241a   :  { %v2245_v59 = vsel %vm186_vm1, %v2244_v12, %v2243_v31 }
0x241b   :  { %v2246_v10 = vsel %vm191_vm2, %v2245_v59, %v2242_v45 }
0x241c   :  { %v2248_v34 = vsel %vm194_vm3, %v2246_v10, -inf }
0x241d   :  { %2249 = vmax.xlane.f32.xlu1 %v2248_v34 }
0x2436   :  { %v2164_v43 = vpop.xlane.xlu0 %2163 }
0x2437   :  { %vm2165_vm10 = vcmp.eq.f32.partialorder %v2162_v60, %v2164_v43  ;;  %v2170_v19 = vcvt.f32.s32 %v2164_v43 }
0x2438   :  { %v2166_v16 = vsel %vm2165_vm10, %v2161_v39, inf }
0x2439   :  { %2167 = vmin.xlane.f32.xlu2 %v2166_v16  ;;  %v2171_v44 = vshll.u32 %v2170_v19, 16 }
0x2490   :  { %v2250_v46 = vpop.xlane.xlu1 %2249 }
0x2491   :  { %v2252_v63 = vperm.slane %v2250_v46, 0  ;;  %v2253_v37 = vperm.slane %v2250_v46, 1 }
0x2493   :  { %v2256_v52 = vsub.f32 %v2226_v15, %v2252_v63  ;;  %v2257_v33 = vsub.f32 %v2229_v50, %v2252_v63  ;;  %v2258_v17 = vsub.f32 %v2232_v5, %v2253_v37  ;;  %v2259_v38 = vsub.f32 %v2235_v26, %v2253_v37 }
0x2495   :  { %v2260_v32 = vmul.f32 1.442695, %v2256_v52  ;;  %v2262_v61 = vmul.f32 1.442695, %v2257_v33  ;;  %v2264_v36 = vmul.f32 1.442695, %v2258_v17 }
0x2496   :  { %v2266_v49 = vmul.f32 1.442695, %v2259_v38 }
0x2497   :  { %2881 = vpow2.f32 %v2260_v32 }
0x2498   :  { %2883 = vpow2.f32 %v2262_v61 }
0x2499   :  { %2885 = vpow2.f32 %v2264_v36 }
0x249a   :  { %2887 = vpow2.f32 %v2266_v49 }
0x249d   :  { %v2882_v21 = vpop.eup %2881 }
0x249e   :  { %v2884_v27 = vpop.eup %2883  ;;  %2273 = vperm.xlu0 %2676, %v2882_v21  }
0x249f   :  { %v2886_v9 = vpop.eup %2885  ;;  %2276 = vperm.xlu1 %2687, %v2884_v27  }
0x24a0   :  { %2279 = vperm.xlu2 %2685, %v2886_v9   ;;  %v2888_v11 = vpop.eup %2887 }
0x24a6   :  { %2282 = vperm.xlu0 %2676, %v2888_v11  }
0x24ac   :  { %v2168_v35 = vpop.xlane.xlu2 %2167 }
0x24ad   :  { %v2169_v53 = vcvt.f32.s32 %v2168_v35 }
0x24ae   :  { %2688 = vset.pattern.permute.xlu0 %v2966_v13 }
0x24af   :  { %v2172_v51 = vadd.s32 %v2171_v44, %v2169_v53 }
0x24b1   :  { %v2178_v8 = vsel %vm2177_vm11, %v3855_v3, %v2172_v51 }
0x24b2   :  { %2180 = vperm.xlu0 %2688, %v2178_v8  }
0x24ba   :  { %2689 = vset.pattern.permute.xlu0 %v2955_v40 }
0x24fa   :  { %v2280_v62 = vpop.permute.xlu2 %2279 }
0x24fb   :  { %v2287_v1 = vperm.slane %v2280_v62, %v3070_v28 }
0x2510   :  { %v2274_v24 = vpop.permute.xlu0 %2273 }
0x2511   :  { %v2277_v41 = vpop.permute.xlu1 %2276  ;;  %v2284_v7 = vperm.slane %v2274_v24, %v3070_v28 }
0x2512   :  { %v2285_v54 = vperm.slane %v2277_v41, %v3073_v29 }
0x2514   :  { %v2286_v55 = vsel %vm186_vm1, %v2285_v54, %v2284_v7 }
0x2518   :  { %v2283_v25 = vpop.permute.xlu0 %2282 }
0x2519   :  { %v2288_v47 = vperm.slane %v2283_v25, %v3073_v29 }
0x251b   :  { %v2289_v48 = vsel %vm186_vm1, %v2288_v47, %v2287_v1 }
0x251c   :  { %v2290_v3 = vsel %vm191_vm2, %v2289_v48, %v2286_v55 }
0x251d   :  { %v2292_v40 = vsel %vm194_vm3, %v2290_v3, 0.0 }
0x251e   :  { %2293 = vadd.xlane.f32.xlu2 %v2292_v40 }
0x2524   :  { %v2181_v60 = vpop.permute.xlu0 %2180 }
0x2525   :  { %vm2182_vm14 = vcmp.eq.s32.totalorder %v3070_v28, %v2181_v60 }
0x2526   :  { %v2629_v15 = vsel %vm2182_vm14, 1.0, %v2956_v0 }
0x2527   :  { %v2185_v50 = vpack.c.bf16 %v2629_v15, %v2629_v15 }
0x2529   :  { %2630 = vmatmul.msk.bf16.vlgmr.msra.gmra.mxu0 %vm129_vm5, %v2185_v50 }
0x2591   :  { %v2294_v5 = vpop.xlane.xlu2 %2293 }
0x2592   :  { %2889 = vrcp.f32 %v2294_v5 }
0x2598   :  { %v2890_v29 = vpop.eup %2889 }
0x2599   :  { %v2297_v57 = vperm.slane %v2890_v29, 0  ;;  %v2298_v23 = vperm.slane %v2890_v29, 1 }
0x259b   :  { %v2303_v26 = vmul.f32 %v2886_v9, %v2298_v23  ;;  %v2301_v31 = vmul.f32 %v2882_v21, %v2297_v57  ;;  %v2302_v12 = vmul.f32 %v2884_v27, %v2297_v57  ;;  %v2304_v0 = vmul.f32 %v2888_v11, %v2298_v23 }
0x259d   :  { %2317 = vperm.xlu0 %2689, %v2303_v26   ;;  %2307 = vperm.xlu1 %2687, %v2301_v31  }
0x25a5   :  { %2354 = vrot.lane.b32.xlu0 %v4036_v18, %s2961_s8  ;;  %2312 = vperm.xlu1 %2687, %v2302_v12  }
0x25a6   :  { %v4089_v28 = vpop.f32.mrf.mxu0 }
0x25ad   :  { %2322 = vperm.xlu1 %2687, %v2304_v0  }
0x25ae   :  { %v2200_v45 = vpop.f32.mrf.mxu0 }
0x260f   :  { %v2308_v59 = vpop.permute.xlu1 %2307  ;;  %v2318_v16 = vpop.permute.xlu0 %2317 }
0x2610   :  { %v2325_v10 = vmul.f32 %v3889_v56, %v2308_v59  ;;  %v2327_v18 = vmul.f32 %v3903_v6, %v2318_v16 }
0x2612   :  { %v2329_v43 = vsel %vm166_vm0, %v2325_v10, 0.0  ;;  %v2338_v17 = vsel %vm166_vm0, %v2327_v18, 0.0 }
0x2617   :  { %v2313_v34 = vpop.permute.xlu1 %2312  ;;  %v2355_v4 = vpop.permute.xlu0 %2354 }
0x2618   :  { %v2326_v14 = vmul.f32 %v3883_v42, %v2313_v34 }
0x261a   :  { %v2330_v39 = vsel %vm166_vm0, %v2326_v14, 0.0 }
0x261b   :  { %v2331_v46 = vadd.f32 %v2330_v39, %v2329_v43 }
0x261d   :  { %v2332_v63 = vrot.slane %v2331_v46, 4 }
0x261f   :  { %v2333_v37 = vadd.f32 %v2332_v63, %v2331_v46  ;;  %v2323_v52 = vpop.permute.xlu1 %2322 }
0x2620   :  { %v2328_v33 = vmul.f32 %v3897_v22, %v2323_v52 }
0x2621   :  { %v2334_v32 = vrot.slane %v2333_v37, 2 }
0x2622   :  { %v2339_v56 = vsel %vm166_vm0, %v2328_v33, 0.0 }
0x2623   :  { %v2340_v61 = vadd.f32 %v2339_v56, %v2338_v17  ;;  %v2335_v36 = vadd.f32 %v2334_v32, %v2333_v37 }
0x2625   :  { %v2341_v42 = vrot.slane %v2340_v61, 4  ;;  %v2336_v21 = vrot.slane %v2335_v36, 1 }
0x2627   :  { %v2342_v38 = vadd.f32 %v2341_v42, %v2340_v61  ;;  %v2337_v11 = vadd.f32 %v2336_v21, %v2335_v36 }
0x2629   :  { %v2343_v49 = vrot.slane %v2342_v38, 2 }
0x262b   :  { %v2344_v27 = vadd.f32 %v2343_v49, %v2342_v38 }
0x262d   :  { %v2345_v9 = vrot.slane %v2344_v27, 1 }
0x262f   :  { %v2346_v19 = vadd.f32 %v2345_v9, %v2344_v27 }
0x2631   :  { %v2349_v6 = vsel %vm191_vm2, %v2346_v19, %v2337_v11 }
0x2632   :  { %2445 = vrot.lane.b32.xlu2 %v2349_v6, %s2959_s28  ;;  %2350 = vrot.lane.b32.xlu1 %v2349_v6, %s2958_s18 }
0x268c   :  { %v2446_v37 = vpop.permute.xlu2 %2445 }
0x26a4   :  { %v2351_v22 = vpop.permute.xlu1 %2350 }
0x26a5   :  { %v2357_v35 = vsel %vm300_vm6, %v4089_v28, %v2351_v22 }
0x26a6   :  { %v2358_v44 = vsel %vm302_vm7, %v2357_v35, %v2355_v4 }
0x26a7   :  { %v2359_v53 = vpack.c.bf16 %v2358_v44, %v2358_v44 }
0x26a9   :  { %2631 = vmatmul.msk.bf16.vlgmr.msrb.gmra.mxu0 %vm380_vm8, %v2359_v53  ;;  %2632 = vmatmul.msk.bf16.vlgmr.msrb.gmra.mxu1 %vm380_vm8, %v2359_v53 }
0x2726   :  { %v2372_v13 = vpop.f32.mrf.mxu0  ;;  %v2385_v51 = vpop.f32.mrf.mxu1 }
0x2727   :  { %v2386_v8 = vadd.f32 %v2385_v51, %v3327_v20  ;;  %v2373_v54 = vadd.f32 %v2372_v13, %v3331_v30 }
0x2729   :  { %2891 = vtanh.f32 %v2386_v8  ;;  %v2633_v7 = vmul.f32 -1.442695, %v2373_v54  ;;  %v2634_v12 = vmul.f32 -1.442695, %v2386_v8 }
0x272b   :  { %2893 = vpow2.f32 %v2633_v7 }
0x272e   :  { %v2374_v24 = vpop.f32.mrf.mxu0  ;;  %v2387_v41 = vpop.f32.mrf.mxu1 }
0x272f   :  { %v2892_v62 = vpop.eup %2891 }
0x2730   :  { %2430 = vrot.lane.b32.xlu1 %v2892_v62, %s2959_s28 }
0x2731   :  { %v2894_v25 = vpop.eup %2893 }
0x2732   :  { %v2395_v1 = vadd.f32 1.0, %v2894_v25 }
0x2734   :  { %2895 = vrcp.f32 %v2395_v1  ;;  %v2408_v20 = vand.u32 2147483648, %v2395_v1  ;;  %vm2402_vm1 = vweird.f32 %v2395_v1  ;;  %v2406_v60 = vand.u32 2147483647, %v2395_v1 }
0x2736   :  { %v2409_v50 = vor.u32 1.1754944e-38, %v2408_v20  ;;  %vm2407_vm3 = vcmp.eq.f32.partialorder %v2406_v60, 8.507059e+37 }
0x273a   :  { %v2896_v47 = vpop.eup %2895 }
0x273b   :  { %v2398_v55 = vmul.f32 %v2896_v47, %v2395_v1  ;;  %vm2403_vm0 = vweird.f32 %v2896_v47 }
0x273c   :  { %vm2404_vm2 = vmor %vm2402_vm1, %vm2403_vm0 }
0x273d   :  { %v2399_v48 = vsub.f32 1.0, %v2398_v55 }
0x273f   :  { %v2400_v3 = vmul.f32 %v2896_v47, %v2399_v48 }
0x2741   :  { %v2401_v40 = vadd.f32 %v2896_v47, %v2400_v3 }
0x2743   :  { %v2405_v15 = vsel %vm2404_vm2, %v2896_v47, %v2401_v40 }
0x2744   :  { %v2410_v30 = vsel %vm2407_vm3, %v2409_v50, %v2405_v15 }
0x2745   :  { %v2428_v57 = vmul.f32 %v2410_v30, %v4032_v2 }
0x27a2   :  { %v2431_v5 = vpop.permute.xlu1 %2430 }
0x27a3   :  { %v2433_v29 = vmul.f32 %v2431_v5, %v2410_v30 }
0x27a5   :  { %2435 = vrot.lane.b32.xlu0 %v2433_v29, %s2959_s28 }
0x27ad   :  { %2449 = vrot.lane.b32.xlu0 %v4089_v28, %s2957_s22 }
0x2817   :  { %v2436_v23 = vpop.permute.xlu0 %2435 }
0x2818   :  { %v2438_v26 = vadd.f32 %v2436_v23, %v2428_v57 }
0x281a   :  { %2897 = vtanh.f32 %v2438_v26 }
0x281b   :  { %2899 = vpow2.f32 %v2634_v12 }
0x281f   :  { %v2450_v52 = vpop.permute.xlu0 %2449 }
0x2820   :  { %v2898_v31 = vpop.eup %2897 }
0x2821   :  { %2441 = vrot.lane.b32.xlu1 %v2898_v31, %s2959_s28  ;;  %v2900_v0 = vpop.eup %2899 }
0x2822   :  { %v2396_v45 = vadd.f32 1.0, %v2900_v0 }
0x2824   :  { %2901 = vrcp.f32 %v2396_v45  ;;  %v2423_v28 = vand.u32 2147483648, %v2396_v45  ;;  %vm2417_vm7 = vweird.f32 %v2396_v45  ;;  %v2421_v2 = vand.u32 2147483647, %v2396_v45 }
0x2826   :  { %v2424_v16 = vor.u32 1.1754944e-38, %v2423_v28  ;;  %vm2422_vm4 = vcmp.eq.f32.partialorder %v2421_v2, 8.507059e+37 }
0x282a   :  { %v2902_v59 = vpop.eup %2901 }
0x282b   :  { %v2413_v10 = vmul.f32 %v2902_v59, %v2396_v45  ;;  %vm2418_vm6 = vweird.f32 %v2902_v59 }
0x282c   :  { %vm2419_vm15 = vmor %vm2417_vm7, %vm2418_vm6 }
0x282d   :  { %v2414_v34 = vsub.f32 1.0, %v2413_v10 }
0x282f   :  { %v2415_v14 = vmul.f32 %v2902_v59, %v2414_v34 }
0x2831   :  { %v2416_v43 = vadd.f32 %v2902_v59, %v2415_v14 }
0x2833   :  { %v2420_v39 = vsel %vm2419_vm15, %v2902_v59, %v2416_v43 }
0x2834   :  { %v2425_v46 = vsel %vm2422_vm4, %v2424_v16, %v2420_v39 }
0x2893   :  { %v2442_v63 = vpop.permute.xlu1 %2441 }
0x2894   :  { %v2444_v18 = vmul.f32 %v2442_v63, %v2425_v46 }
0x2896   :  { %v2452_v33 = vsel %vm129_vm5, %v2444_v18, %v2446_v37 }
0x2897   :  { %v2453_v17 = vsel %vm474_vm9, %v2452_v33, %v2450_v52 }
0x2898   :  { %v2454_v56 = vpack.c.bf16 %v2453_v17, %v2453_v17 }
0x289a   :  { %2635 = vmatmul.msk.bf16.vlgmr.msra.gmra.mxu2 %vm380_vm8, %v2454_v56 }
0x291d   :  { %v2467_v32 = vpop.f32.mrf.mxu2 }
0x291e   :  { %v2468_v61 = vadd.f32 %v3961_v58, %v2467_v32 }
0x2920   :  { %2636 = vst [vmem:[%s4133_s11 + $0xc] sm:$0x3] %v2468_v61 }
0x2925   :  { %v2469_v42 = vpop.f32.mrf.mxu2 }

</bundles_post_ra>
